<compile_context>
chip_gen: v5e
topology: v5e:2x2
jax: 0.10.0
libtpu: 0.0.40
codegen_flags: <defaults>
</compile_context>

<pallas_src>
import functools
import math

import jax
import jax.numpy as jnp
from jax.experimental import pallas as pl
from jax.experimental.pallas import tpu as pltpu

# Full-precision matmuls in the pure-JAX reference (and the f32 kernel path).
jax.config.update("jax_default_matmul_precision", "highest")


# ----------------------------------------------------------------------------
# Fused kernel: whole reversible encoder layer forward (single grid step).
# ----------------------------------------------------------------------------
def reversible_layer_kernel(*refs, T, B, H, eps, has_mask, mxu_dtype):
    if has_mask:
        (x1_ref, x2_ref,
         ln1_g, ln1_b, w_in, b_in, w_out, b_out,
         ln2_g, ln2_b, w_ff1, b_ff1, w_ff2, b_ff2, bias_ref,
         y1_ref, y2_ref,
         qkv_tm, qkv_bm, ctx_bm, ctx_tm) = refs
    else:
        (x1_ref, x2_ref,
         ln1_g, ln1_b, w_in, b_in, w_out, b_out,
         ln2_g, ln2_b, w_ff1, b_ff1, w_ff2, b_ff2,
         y1_ref, y2_ref,
         qkv_tm, qkv_bm, ctx_bm, ctx_tm) = refs
        bias_ref = None

    f32 = jnp.float32
    M, D = x2_ref.shape               # M = T * B, time-major rows (row = t*B + b)
    Dh = D // H

    # Cast activations to the MXU dtype at the matmul boundary only; weights already live
    # in that dtype in HBM (no per-use weight casts).  Accumulation is always f32.
    cast = (lambda a: a) if mxu_dtype is None else (lambda a: a.astype(mxu_dtype))

    def layer_norm(x, g_ref, b_ref):      # f32 elementwise (v5e-safe)
        mu = jnp.mean(x, axis=-1, keepdims=True)
        xc = x - mu
        var = jnp.mean(xc * xc, axis=-1, keepdims=True)
        return xc * jax.lax.rsqrt(var + eps) * g_ref[...] + b_ref[...]

    # ------------------ SelfAttention: z1 = OutProj(MHA(LN1(x2))) ------------------
    x2 = x2_ref[...]                                   # (M, D) f32
    q_norm = layer_norm(x2, ln1_g, ln1_b)
    # ONE fused QKV projection over the whole (M, D) slab (batch folded into M).
    # 1/sqrt(Dh) is already folded into the q-columns of w_in / b_in.
    qkv = jnp.dot(cast(q_norm), w_in[...], preferred_element_type=f32) + b_in[...]
    qkv_tm[...] = qkv                                  # stage for the strided relayout below

    # Single relayout of qkv: time-major (M, 3D) -> batch-major (B, T, 3D) so attention can
    # run as B-batched matmuls.  Strided sublane reads gather each batch element's rows.
    for b in range(B):
        qkv_bm[b] = qkv_tm[pl.ds(b, T, stride=B), :]

    qkv_b = qkv_bm[...]                                # (B, T, 3D) f32
    bias = bias_ref[...] if has_mask else None         # (B, 1, T) additive key-padding mask

    # Heads processed one at a time (H is small; see review #10), each batched over B on the
    # MXU.  Per-head contexts are written into a (M, D) batch-major slab so the output
    # projection can be ONE (M, D) @ (D, D) matmul.
    for h in range(H):
        lo = h * Dh
        q_h = cast(qkv_b[:, :, lo:lo + Dh])            # (B, T, Dh)
        k_h = cast(qkv_b[:, :, D + lo:D + lo + Dh])
        v_h = cast(qkv_b[:, :, 2 * D + lo:2 * D + lo + Dh])

        s = jnp.einsum('bqd,bkd->bqk', q_h, k_h,
                       preferred_element_type=f32)     # (B, T, T), scale pre-folded
        if has_mask:
            s = s + bias                               # broadcast over heads / query rows
        s = s - jnp.max(s, axis=-1, keepdims=True)
        e = jnp.exp(s)
        p = e / jnp.sum(e, axis=-1, keepdims=True)     # exact softmax, f32

        ctx_h = jnp.einsum('bqk,bkd->bqd', cast(p), v_h,
                           preferred_element_type=f32)  # (B, T, Dh) f32
        for b in range(B):
            ctx_bm[pl.ds(b * T, T), lo:lo + Dh] = ctx_h[b]

    # Relayout context back to time-major so residual / FFN / output stores stay in the
    # original (seq, batch) row order (no wrapper transposes needed).
    for t in range(T):
        ctx_tm[pl.ds(t * B, B), :] = ctx_bm[pl.ds(t, B, stride=T), :]

    # ONE fused output projection over the whole (M, D) slab + residual.
    z1 = jnp.dot(cast(ctx_tm[...]), w_out[...], preferred_element_type=f32) + b_out[...]
    y1 = z1 + x1_ref[...]                              # eval: dropout == identity
    y1_ref[...] = y1.astype(y1_ref.dtype)

    # ------------------ FeedForward: z2 = W2 @ relu(W1 @ LN2(y1)) ------------------
    y_norm = layer_norm(y1, ln2_g, ln2_b)
    h1 = jnp.maximum(
        jnp.dot(cast(y_norm), w_ff1[...], preferred_element_type=f32) + b_ff1[...], 0.0)
    z2 = jnp.dot(cast(h1), w_ff2[...], preferred_element_type=f32) + b_ff2[...]
    y2_ref[...] = (z2 + x2).astype(y2_ref.dtype)       # eval: dropout == identity


# ----------------------------------------------------------------------------
# Parameter preparation: fold 1/sqrt(Dh) into q-columns, store weights as bf16.
# ----------------------------------------------------------------------------
def prepare_params(params, n_heads, mxu_dtype=jnp.bfloat16):
    D = params["w_out"].shape[0]
    Dh = D // n_heads
    scale = 1.0 / math.sqrt(Dh)
    wdtype = jnp.float32 if mxu_dtype is None else mxu_dtype
    col_scale = jnp.concatenate(
        [jnp.full((D,), scale, jnp.float32), jnp.ones((2 * D,), jnp.float32)])
    vec = lambda v: v.reshape(1, -1).astype(jnp.float32)
    return {
        "ln1_gamma": vec(params["ln1_gamma"]), "ln1_beta": vec(params["ln1_beta"]),
        "ln2_gamma": vec(params["ln2_gamma"]), "ln2_beta": vec(params["ln2_beta"]),
        "w_in": (params["w_in"] * col_scale[None, :]).astype(wdtype),
        "b_in": vec(params["b_in"] * col_scale),
        "w_out": params["w_out"].astype(wdtype), "b_out": vec(params["b_out"]),
        "w_ff1": params["w_ff1"].astype(wdtype), "b_ff1": vec(params["b_ff1"]),
        "w_ff2": params["w_ff2"].astype(wdtype), "b_ff2": vec(params["b_ff2"]),
    }


# ----------------------------------------------------------------------------
# Wrapper: single fused pallas_call, zero HBM layout passes around it.
# ----------------------------------------------------------------------------
def reversible_encoder_layer_forward(x1, x2, prep, n_heads, attn_mask=None, eps=1e-5):
    """x1, x2: (T, B, D) float32 (ONMT [seq, batch, model]).  Returns (y1, y2)."""
    T, B, D = x1.shape
    assert D % n_heads == 0
    M = T * B

    # Free row-major reshapes (metadata only) -- no transpose HBM passes.
    x1f = x1.reshape(M, D)
    x2f = x2.reshape(M, D)

    inputs = [x1f, x2f,
              prep["ln1_gamma"], prep["ln1_beta"],
              prep["w_in"], prep["b_in"], prep["w_out"], prep["b_out"],
              prep["ln2_gamma"], prep["ln2_beta"],
              prep["w_ff1"], prep["b_ff1"], prep["w_ff2"], prep["b_ff2"]]

    has_mask = attn_mask is not None
    if has_mask:
        # (B, 1, T) additive bias -- no per-head broadcast, no (B*H, T, T) tensor.
        bias = jnp.where(attn_mask, -1e9, 0.0).astype(jnp.float32).reshape(B, 1, T)
        inputs.append(bias)

    def full_spec(a):
        nd = a.ndim
        return pl.BlockSpec(a.shape, lambda i, nd=nd: (0,) * nd)

    in_specs = [full_spec(a) for a in inputs]
    out_spec = pl.BlockSpec((M, D), lambda i: (0, 0))

    mxu_dtype = None if prep["w_in"].dtype == jnp.float32 else prep["w_in"].dtype

    kernel = functools.partial(
        reversible_layer_kernel,
        T=T, B=B, H=n_heads, eps=eps, has_mask=has_mask, mxu_dtype=mxu_dtype)

    y1f, y2f = pl.pallas_call(
        kernel,
        out_shape=(jax.ShapeDtypeStruct((M, D), x1.dtype),
                   jax.ShapeDtypeStruct((M, D), x2.dtype)),
        grid=(1,),
        in_specs=in_specs,
        out_specs=(out_spec, out_spec),
        scratch_shapes=[
            pltpu.VMEM((M, 3 * D), jnp.float32),      # qkv, time-major staging
            pltpu.VMEM((B, T, 3 * D), jnp.float32),   # qkv, batch-major (per-batch contiguous)
            pltpu.VMEM((M, D), jnp.float32),          # context, batch-major
            pltpu.VMEM((M, D), jnp.float32),          # context, time-major
        ],
        compiler_params=pltpu.CompilerParams(
            dimension_semantics=("arbitrary",)),
    )(*inputs)

    return y1f.reshape(T, B, D), y2f.reshape(T, B, D)


# ----------------------------------------------------------------------------
# Synthetic params and a pure-JAX reference (raw f32 params, no scale folding).
# ----------------------------------------------------------------------------
def init_params(key, model_size, inner_size):
    D, F = model_size, inner_size
    ks = jax.random.split(key, 12)
    scaled = lambda k, shape, fan_in: (
        jax.random.normal(k, shape, jnp.float32) / math.sqrt(fan_in))
    small = lambda k, shape: 0.02 * jax.random.normal(k, shape, jnp.float32)
    return {
        "ln1_gamma": 1.0 + 0.1 * jax.random.normal(ks[0], (D,), jnp.float32),
        "ln1_beta": small(ks[1], (D,)),
        "ln2_gamma": 1.0 + 0.1 * jax.random.normal(ks[2], (D,), jnp.float32),
        "ln2_beta": small(ks[3], (D,)),
        "w_in": scaled(ks[4], (D, 3 * D), D),   # share=1 fused [q ; k ; v] projection
        "b_in": small(ks[5], (3 * D,)),
        "w_out": scaled(ks[6], (D, D), D),
        "b_out": small(ks[7], (D,)),
        "w_ff1": scaled(ks[8], (D, F), D),
        "b_ff1": small(ks[9], (F,)),
        "w_ff2": scaled(ks[10], (F, D), F),
        "b_ff2": small(ks[11], (D,)),
    }


def reference_forward(x1, x2, params, n_heads, attn_mask=None, eps=1e-5):
    T, B, D = x1.shape
    H = n_heads
    Dh = D // H

    def ln(x, g, b):
        mu = jnp.mean(x, axis=-1, keepdims=True)
        var = jnp.mean((x - mu) ** 2, axis=-1, keepdims=True)
        return (x - mu) * jax.lax.rsqrt(var + eps) * g + b

    q_norm = ln(x2, params["ln1_gamma"], params["ln1_beta"])
    qkv = q_norm @ params["w_in"] + params["b_in"]                   # (T, B, 3D)
    q, k, v = jnp.split(qkv, 3, axis=-1)
    split = lambda t: t.reshape(T, B, H, Dh).transpose(1, 2, 0, 3)   # (B, H, T, Dh)
    qh, kh, vh = split(q), split(k), split(v)
    s = jnp.einsum("bhqd,bhkd->bhqk", qh, kh) / math.sqrt(Dh)
    if attn_mask is not None:
        s = s + jnp.where(attn_mask, -1e9, 0.0)[:, None, None, :]
    p = jax.nn.softmax(s, axis=-1)
    ctx = jnp.einsum("bhqk,bhkd->bhqd", p, vh)
    ctx = ctx.transpose(2, 0, 1, 3).reshape(T, B, D)
    z1 = ctx @ params["w_out"] + params["b_out"]
    y1 = z1 + x1
    y_norm = ln(y1, params["ln2_gamma"], params["ln2_beta"])
    h1 = jax.nn.relu(y_norm @ params["w_ff1"] + params["b_ff1"])
    z2 = h1 @ params["w_ff2"] + params["b_ff2"]
    y2 = z2 + x2
    return y1, y2


if __name__ == "__main__":
    # opt: model_size=32, n_heads=4, inner_size=4*model_size; eval mode.
    T, B, D, H = 8, 2, 32, 4
    INNER = 4 * D

    key = jax.random.PRNGKey(0)
    kp, kx1, kx2 = jax.random.split(key, 3)
    params = init_params(kp, D, INNER)
    x1 = jax.random.normal(kx1, (T, B, D), jnp.float32)
    x2 = jax.random.normal(kx2, (T, B, D), jnp.float32)

    fwd = jax.jit(reversible_encoder_layer_forward, static_argnames=("n_heads",))

    # --- f32 MXU path: tight parity against the f32 reference ---
    prep32 = prepare_params(params, H, mxu_dtype=None)
    y1, y2 = fwd(x1, x2, prep32, n_heads=H)
    jax.block_until_ready((y1, y2))
    r1, r2 = reference_forward(x1, x2, params, n_heads=H)
    assert y1.shape == (T, B, D) and y2.shape == (T, B, D)
    assert bool(jnp.allclose(y1, r1, atol=2e-2, rtol=2e-2))
    assert bool(jnp.allclose(y2, r2, atol=2e-2, rtol=2e-2))

    # --- bf16-weight path (default) with a key-padding mask (last two keys of batch 1) ---
    prep16 = prepare_params(params, H)                        # bf16 weights in HBM
    mask = jnp.zeros((B, T), jnp.bool_).at[1, -2:].set(True)
    y1m, y2m = fwd(x1, x2, prep16, n_heads=H, attn_mask=mask)
    jax.block_until_ready((y1m, y2m))
    r1m, r2m = reference_forward(x1, x2, params, n_heads=H, attn_mask=mask)
    # gap vs the f32-highest reference is dominated by intended bf16 MXU operands
    assert bool(jnp.allclose(y1m, r1m, atol=5e-2, rtol=5e-2))
    assert bool(jnp.allclose(y2m, r2m, atol=5e-2, rtol=5e-2))

    # --- larger batch folded into the GEMM M dimension (M = T*B = 128 rows) ---
    B2 = 16
    kx3, kx4 = jax.random.split(jax.random.PRNGKey(1))
    x1b = jax.random.normal(kx3, (T, B2, D), jnp.float32)
    x2b = jax.random.normal(kx4, (T, B2, D), jnp.float32)
    y1b, y2b = fwd(x1b, x2b, prep16, n_heads=H)
    jax.block_until_ready((y1b, y2b))
    r1b, r2b = reference_forward(x1b, x2b, params, n_heads=H)
    assert bool(jnp.allclose(y1b, r1b, atol=5e-2, rtol=5e-2))
    assert bool(jnp.allclose(y2b, r2b, atol=5e-2, rtol=5e-2))

    print("KERNEL_OK")
</pallas_src>

<mosaic_0001>
module attributes {stable_mosaic.version = 11 : i64} {
  func.func @reversible_layer_kernel(%arg0: i32, %arg1: memref<16x32xf32, #tpu.memory_space<vmem>>, %arg2: memref<16x32xf32, #tpu.memory_space<vmem>>, %arg3: memref<1x32xf32, #tpu.memory_space<vmem>>, %arg4: memref<1x32xf32, #tpu.memory_space<vmem>>, %arg5: memref<32x96xf32, #tpu.memory_space<vmem>>, %arg6: memref<1x96xf32, #tpu.memory_space<vmem>>, %arg7: memref<32x32xf32, #tpu.memory_space<vmem>>, %arg8: memref<1x32xf32, #tpu.memory_space<vmem>>, %arg9: memref<1x32xf32, #tpu.memory_space<vmem>>, %arg10: memref<1x32xf32, #tpu.memory_space<vmem>>, %arg11: memref<32x128xf32, #tpu.memory_space<vmem>>, %arg12: memref<1x128xf32, #tpu.memory_space<vmem>>, %arg13: memref<128x32xf32, #tpu.memory_space<vmem>>, %arg14: memref<1x32xf32, #tpu.memory_space<vmem>>, %arg15: memref<16x32xf32, #tpu.memory_space<vmem>>, %arg16: memref<16x32xf32, #tpu.memory_space<vmem>>, %arg17: memref<16x96xf32, #tpu.memory_space<vmem>>, %arg18: memref<2x8x96xf32, #tpu.memory_space<vmem>>, %arg19: memref<16x32xf32, #tpu.memory_space<vmem>>, %arg20: memref<16x32xf32, #tpu.memory_space<vmem>>) attributes {dimension_semantics = [#tpu.dimension_semantics<arbitrary>], iteration_bounds = array<i64: 1>, scalar_prefetch = 0 : i64, scratch_operands = 4 : i64, tpu.core_type = #tpu.core_type<tc>, window_params = [{pipeline_mode = #tpu.pipeline_mode<synchronous>, transform_indices = @transform_0, window_bounds = array<i64: 16, 32>}, {pipeline_mode = #tpu.pipeline_mode<synchronous>, transform_indices = @transform_1, window_bounds = array<i64: 16, 32>}, {pipeline_mode = #tpu.pipeline_mode<synchronous>, transform_indices = @transform_2, window_bounds = array<i64: 1, 32>}, {pipeline_mode = #tpu.pipeline_mode<synchronous>, transform_indices = @transform_3, window_bounds = array<i64: 1, 32>}, {pipeline_mode = #tpu.pipeline_mode<synchronous>, transform_indices = @transform_4, window_bounds = array<i64: 32, 96>}, {pipeline_mode = #tpu.pipeline_mode<synchronous>, transform_indices = @transform_5, window_bounds = array<i64: 1, 96>}, {pipeline_mode = #tpu.pipeline_mode<synchronous>, transform_indices = @transform_6, window_bounds = array<i64: 32, 32>}, {pipeline_mode = #tpu.pipeline_mode<synchronous>, transform_indices = @transform_7, window_bounds = array<i64: 1, 32>}, {pipeline_mode = #tpu.pipeline_mode<synchronous>, transform_indices = @transform_8, window_bounds = array<i64: 1, 32>}, {pipeline_mode = #tpu.pipeline_mode<synchronous>, transform_indices = @transform_9, window_bounds = array<i64: 1, 32>}, {pipeline_mode = #tpu.pipeline_mode<synchronous>, transform_indices = @transform_10, window_bounds = array<i64: 32, 128>}, {pipeline_mode = #tpu.pipeline_mode<synchronous>, transform_indices = @transform_11, window_bounds = array<i64: 1, 128>}, {pipeline_mode = #tpu.pipeline_mode<synchronous>, transform_indices = @transform_12, window_bounds = array<i64: 128, 32>}, {pipeline_mode = #tpu.pipeline_mode<synchronous>, transform_indices = @transform_13, window_bounds = array<i64: 1, 32>}, {pipeline_mode = #tpu.pipeline_mode<synchronous>, transform_indices = @transform_14, window_bounds = array<i64: 16, 32>}, {pipeline_mode = #tpu.pipeline_mode<synchronous>, transform_indices = @transform_15, window_bounds = array<i64: 16, 32>}]} {
    %c0 = arith.constant 0 : index
    %c0_0 = arith.constant 0 : index
    %0 = vector.load %arg2[%c0, %c0_0] : memref<16x32xf32, #tpu.memory_space<vmem>>, vector<16x32xf32>
    %cst = arith.constant dense<0.000000e+00> : vector<16xf32>
    %1 = vector.multi_reduction <add>, %0, %cst [1] : vector<16x32xf32> to vector<16xf32>
    %2 = vector.shape_cast %1 : vector<16xf32> to vector<16x1xf32>
    %cst_1 = arith.constant 3.200000e+01 : f32
    %3 = vector.broadcast %cst_1 : f32 to vector<16x1xf32>
    %4 = arith.divf %2, %3 : vector<16x1xf32>
    %5 = vector.broadcast %4 : vector<16x1xf32> to vector<16x32xf32>
    %6 = arith.subf %0, %5 : vector<16x32xf32>
    %7 = arith.mulf %6, %6 : vector<16x32xf32>
    %cst_2 = arith.constant dense<0.000000e+00> : vector<16xf32>
    %8 = vector.multi_reduction <add>, %7, %cst_2 [1] : vector<16x32xf32> to vector<16xf32>
    %9 = vector.shape_cast %8 : vector<16xf32> to vector<16x1xf32>
    %cst_3 = arith.constant 3.200000e+01 : f32
    %10 = vector.broadcast %cst_3 : f32 to vector<16x1xf32>
    %11 = arith.divf %9, %10 : vector<16x1xf32>
    %cst_4 = arith.constant 9.99999974E-6 : f32
    %12 = vector.broadcast %cst_4 : f32 to vector<16x1xf32>
    %13 = arith.addf %11, %12 : vector<16x1xf32>
    %14 = math.rsqrt %13 : vector<16x1xf32>
    %15 = vector.broadcast %14 : vector<16x1xf32> to vector<16x32xf32>
    %16 = arith.mulf %6, %15 : vector<16x32xf32>
    %c0_5 = arith.constant 0 : index
    %c0_6 = arith.constant 0 : index
    %17 = vector.load %arg3[%c0_5, %c0_6] : memref<1x32xf32, #tpu.memory_space<vmem>>, vector<1x32xf32>
    %18 = vector.broadcast %17 : vector<1x32xf32> to vector<16x32xf32>
    %19 = arith.mulf %16, %18 : vector<16x32xf32>
    %c0_7 = arith.constant 0 : index
    %c0_8 = arith.constant 0 : index
    %20 = vector.load %arg4[%c0_7, %c0_8] : memref<1x32xf32, #tpu.memory_space<vmem>>, vector<1x32xf32>
    %21 = vector.broadcast %20 : vector<1x32xf32> to vector<16x32xf32>
    %22 = arith.addf %19, %21 : vector<16x32xf32>
    %c0_9 = arith.constant 0 : index
    %c0_10 = arith.constant 0 : index
    %23 = vector.load %arg5[%c0_9, %c0_10] : memref<32x96xf32, #tpu.memory_space<vmem>>, vector<32x96xf32>
    %cst_11 = arith.constant dense<0.000000e+00> : vector<16x96xf32>
    %24 = tpu.matmul %22, %23, %cst_11 {dimension_numbers = #tpu.dot_dimension_numbers<[1], [0], [0], [1], [0, 0, 1, 1], [], []>, precision = #tpu.contract_precision<fp32>} : vector<16x32xf32>, vector<32x96xf32>, vector<16x96xf32> -> vector<16x96xf32>
    %c0_12 = arith.constant 0 : index
    %c0_13 = arith.constant 0 : index
    %25 = vector.load %arg6[%c0_12, %c0_13] : memref<1x96xf32, #tpu.memory_space<vmem>>, vector<1x96xf32>
    %26 = vector.broadcast %25 : vector<1x96xf32> to vector<16x96xf32>
    %27 = arith.addf %24, %26 : vector<16x96xf32>
    %c0_14 = arith.constant 0 : index
    %c0_15 = arith.constant 0 : index
    %28 = vector.load %arg17[%c0_14, %c0_15] : memref<16x96xf32, #tpu.memory_space<vmem>>, vector<16x96xf32>
    tpu.vector_store %arg17[%c0_14, %c0_15], %27 {strides = array<i32>} : memref<16x96xf32, #tpu.memory_space<vmem>>, vector<16x96xf32>,
    %c0_16 = arith.constant 0 : index
    %c0_17 = arith.constant 0 : index
    %29 = tpu.strided_load %arg17[%c0_16, %c0_17] {strides = array<i32: 2, 1>} : memref<16x96xf32, #tpu.memory_space<vmem>>, vector<8x96xf32>
    %c0_18 = arith.constant 0 : index
    %c0_19 = arith.constant 0 : index
    %c0_20 = arith.constant 0 : index
    %30 = vector.load %arg18[%c0_18, %c0_19, %c0_20] : memref<2x8x96xf32, #tpu.memory_space<vmem>>, vector<1x8x96xf32>
    %31 = vector.shape_cast %30 : vector<1x8x96xf32> to vector<8x96xf32>
    %32 = vector.shape_cast %29 : vector<8x96xf32> to vector<1x8x96xf32>
    tpu.vector_store %arg18[%c0_18, %c0_19, %c0_20], %32 {strides = array<i32>} : memref<2x8x96xf32, #tpu.memory_space<vmem>>, vector<1x8x96xf32>,
    %c1 = arith.constant 1 : index
    %c0_21 = arith.constant 0 : index
    %33 = tpu.strided_load %arg17[%c1, %c0_21] {strides = array<i32: 2, 1>} : memref<16x96xf32, #tpu.memory_space<vmem>>, vector<8x96xf32>
    %c1_22 = arith.constant 1 : index
    %c0_23 = arith.constant 0 : index
    %c0_24 = arith.constant 0 : index
    %34 = vector.load %arg18[%c1_22, %c0_23, %c0_24] : memref<2x8x96xf32, #tpu.memory_space<vmem>>, vector<1x8x96xf32>
    %35 = vector.shape_cast %34 : vector<1x8x96xf32> to vector<8x96xf32>
    %36 = vector.shape_cast %33 : vector<8x96xf32> to vector<1x8x96xf32>
    tpu.vector_store %arg18[%c1_22, %c0_23, %c0_24], %36 {strides = array<i32>} : memref<2x8x96xf32, #tpu.memory_space<vmem>>, vector<1x8x96xf32>,
    %c0_25 = arith.constant 0 : index
    %c0_26 = arith.constant 0 : index
    %c0_27 = arith.constant 0 : index
    %37 = vector.load %arg18[%c0_25, %c0_26, %c0_27] : memref<2x8x96xf32, #tpu.memory_space<vmem>>, vector<2x8x96xf32>
    %38 = vector.extract_strided_slice %37 {offsets = [0, 0, 0], sizes = [2, 8, 8], strides = [1, 1, 1]} : vector<2x8x96xf32> to vector<2x8x8xf32>
    %39 = vector.extract_strided_slice %37 {offsets = [0, 0, 32], sizes = [2, 8, 8], strides = [1, 1, 1]} : vector<2x8x96xf32> to vector<2x8x8xf32>
    %40 = vector.extract_strided_slice %37 {offsets = [0, 0, 64], sizes = [2, 8, 8], strides = [1, 1, 1]} : vector<2x8x96xf32> to vector<2x8x8xf32>
    "tpu.trace_start"() <{level = 10 : i32, message = "bqd,bkd->bqk"}> : () -> ()
    %cst_28 = arith.constant dense<0.000000e+00> : vector<2x8x8xf32>
    %41 = tpu.matmul %38, %39, %cst_28 {dimension_numbers = #tpu.dot_dimension_numbers<[2], [2], [1], [1], [0, 0, 0, 1, 1, 1], [0], [0]>, precision = #tpu.contract_precision<fp32>} : vector<2x8x8xf32>, vector<2x8x8xf32>, vector<2x8x8xf32> -> vector<2x8x8xf32>
    "tpu.trace_stop"() : () -> ()
    %cst_29 = arith.constant dense<0xFF800000> : vector<2x8xf32>
    %42 = vector.multi_reduction <maximumf>, %41, %cst_29 [2] : vector<2x8x8xf32> to vector<2x8xf32>
    %43 = vector.shape_cast %42 : vector<2x8xf32> to vector<2x8x1xf32>
    %44 = vector.broadcast %43 : vector<2x8x1xf32> to vector<2x8x8xf32>
    %45 = arith.subf %41, %44 : vector<2x8x8xf32>
    %46 = math.exp %45 : vector<2x8x8xf32>
    %cst_30 = arith.constant dense<0.000000e+00> : vector<2x8xf32>
    %47 = vector.multi_reduction <add>, %46, %cst_30 [2] : vector<2x8x8xf32> to vector<2x8xf32>
    %48 = vector.shape_cast %47 : vector<2x8xf32> to vector<2x8x1xf32>
    %49 = vector.broadcast %48 : vector<2x8x1xf32> to vector<2x8x8xf32>
    %50 = arith.divf %46, %49 : vector<2x8x8xf32>
    "tpu.trace_start"() <{level = 10 : i32, message = "bqk,bkd->bqd"}> : () -> ()
    %cst_31 = arith.constant dense<0.000000e+00> : vector<2x8x8xf32>
    %51 = tpu.matmul %50, %40, %cst_31 {dimension_numbers = #tpu.dot_dimension_numbers<[2], [1], [1], [2], [0, 0, 0, 1, 1, 2], [0], [0]>, precision = #tpu.contract_precision<fp32>} : vector<2x8x8xf32>, vector<2x8x8xf32>, vector<2x8x8xf32> -> vector<2x8x8xf32>
    "tpu.trace_stop"() : () -> ()
    %52 = vector.extract_strided_slice %51 {offsets = [0, 0, 0], sizes = [1, 8, 8], strides = [1, 1, 1]} : vector<2x8x8xf32> to vector<1x8x8xf32>
    %53 = vector.shape_cast %52 : vector<1x8x8xf32> to vector<8x8xf32>
    %c0_32 = arith.constant 0 : index
    %c0_33 = arith.constant 0 : index
    %54 = vector.load %arg19[%c0_32, %c0_33] : memref<16x32xf32, #tpu.memory_space<vmem>>, vector<8x8xf32>
    tpu.vector_store %arg19[%c0_32, %c0_33], %53 {strides = array<i32>} : memref<16x32xf32, #tpu.memory_space<vmem>>, vector<8x8xf32>,
    %55 = vector.extract_strided_slice %51 {offsets = [1, 0, 0], sizes = [1, 8, 8], strides = [1, 1, 1]} : vector<2x8x8xf32> to vector<1x8x8xf32>
    %56 = vector.shape_cast %55 : vector<1x8x8xf32> to vector<8x8xf32>
    %c8 = arith.constant 8 : index
    %c0_34 = arith.constant 0 : index
    %57 = vector.load %arg19[%c8, %c0_34] : memref<16x32xf32, #tpu.memory_space<vmem>>, vector<8x8xf32>
    tpu.vector_store %arg19[%c8, %c0_34], %56 {strides = array<i32>} : memref<16x32xf32, #tpu.memory_space<vmem>>, vector<8x8xf32>,
    %58 = vector.extract_strided_slice %37 {offsets = [0, 0, 8], sizes = [2, 8, 8], strides = [1, 1, 1]} : vector<2x8x96xf32> to vector<2x8x8xf32>
    %59 = vector.extract_strided_slice %37 {offsets = [0, 0, 40], sizes = [2, 8, 8], strides = [1, 1, 1]} : vector<2x8x96xf32> to vector<2x8x8xf32>
    %60 = vector.extract_strided_slice %37 {offsets = [0, 0, 72], sizes = [2, 8, 8], strides = [1, 1, 1]} : vector<2x8x96xf32> to vector<2x8x8xf32>
    "tpu.trace_start"() <{level = 10 : i32, message = "bqd,bkd->bqk"}> : () -> ()
    %cst_35 = arith.constant dense<0.000000e+00> : vector<2x8x8xf32>
    %61 = tpu.matmul %58, %59, %cst_35 {dimension_numbers = #tpu.dot_dimension_numbers<[2], [2], [1], [1], [0, 0, 0, 1, 1, 1], [0], [0]>, precision = #tpu.contract_precision<fp32>} : vector<2x8x8xf32>, vector<2x8x8xf32>, vector<2x8x8xf32> -> vector<2x8x8xf32>
    "tpu.trace_stop"() : () -> ()
    %cst_36 = arith.constant dense<0xFF800000> : vector<2x8xf32>
    %62 = vector.multi_reduction <maximumf>, %61, %cst_36 [2] : vector<2x8x8xf32> to vector<2x8xf32>
    %63 = vector.shape_cast %62 : vector<2x8xf32> to vector<2x8x1xf32>
    %64 = vector.broadcast %63 : vector<2x8x1xf32> to vector<2x8x8xf32>
    %65 = arith.subf %61, %64 : vector<2x8x8xf32>
    %66 = math.exp %65 : vector<2x8x8xf32>
    %cst_37 = arith.constant dense<0.000000e+00> : vector<2x8xf32>
    %67 = vector.multi_reduction <add>, %66, %cst_37 [2] : vector<2x8x8xf32> to vector<2x8xf32>
    %68 = vector.shape_cast %67 : vector<2x8xf32> to vector<2x8x1xf32>
    %69 = vector.broadcast %68 : vector<2x8x1xf32> to vector<2x8x8xf32>
    %70 = arith.divf %66, %69 : vector<2x8x8xf32>
    "tpu.trace_start"() <{level = 10 : i32, message = "bqk,bkd->bqd"}> : () -> ()
    %cst_38 = arith.constant dense<0.000000e+00> : vector<2x8x8xf32>
    %71 = tpu.matmul %70, %60, %cst_38 {dimension_numbers = #tpu.dot_dimension_numbers<[2], [1], [1], [2], [0, 0, 0, 1, 1, 2], [0], [0]>, precision = #tpu.contract_precision<fp32>} : vector<2x8x8xf32>, vector<2x8x8xf32>, vector<2x8x8xf32> -> vector<2x8x8xf32>
    "tpu.trace_stop"() : () -> ()
    %72 = vector.extract_strided_slice %71 {offsets = [0, 0, 0], sizes = [1, 8, 8], strides = [1, 1, 1]} : vector<2x8x8xf32> to vector<1x8x8xf32>
    %73 = vector.shape_cast %72 : vector<1x8x8xf32> to vector<8x8xf32>
    %c0_39 = arith.constant 0 : index
    %c8_40 = arith.constant 8 : index
    %74 = vector.load %arg19[%c0_39, %c8_40] : memref<16x32xf32, #tpu.memory_space<vmem>>, vector<8x8xf32>
    tpu.vector_store %arg19[%c0_39, %c8_40], %73 {strides = array<i32>} : memref<16x32xf32, #tpu.memory_space<vmem>>, vector<8x8xf32>,
    %75 = vector.extract_strided_slice %71 {offsets = [1, 0, 0], sizes = [1, 8, 8], strides = [1, 1, 1]} : vector<2x8x8xf32> to vector<1x8x8xf32>
    %76 = vector.shape_cast %75 : vector<1x8x8xf32> to vector<8x8xf32>
    %c8_41 = arith.constant 8 : index
    %c8_42 = arith.constant 8 : index
    %77 = vector.load %arg19[%c8_41, %c8_42] : memref<16x32xf32, #tpu.memory_space<vmem>>, vector<8x8xf32>
    tpu.vector_store %arg19[%c8_41, %c8_42], %76 {strides = array<i32>} : memref<16x32xf32, #tpu.memory_space<vmem>>, vector<8x8xf32>,
    %78 = vector.extract_strided_slice %37 {offsets = [0, 0, 16], sizes = [2, 8, 8], strides = [1, 1, 1]} : vector<2x8x96xf32> to vector<2x8x8xf32>
    %79 = vector.extract_strided_slice %37 {offsets = [0, 0, 48], sizes = [2, 8, 8], strides = [1, 1, 1]} : vector<2x8x96xf32> to vector<2x8x8xf32>
    %80 = vector.extract_strided_slice %37 {offsets = [0, 0, 80], sizes = [2, 8, 8], strides = [1, 1, 1]} : vector<2x8x96xf32> to vector<2x8x8xf32>
    "tpu.trace_start"() <{level = 10 : i32, message = "bqd,bkd->bqk"}> : () -> ()
    %cst_43 = arith.constant dense<0.000000e+00> : vector<2x8x8xf32>
    %81 = tpu.matmul %78, %79, %cst_43 {dimension_numbers = #tpu.dot_dimension_numbers<[2], [2], [1], [1], [0, 0, 0, 1, 1, 1], [0], [0]>, precision = #tpu.contract_precision<fp32>} : vector<2x8x8xf32>, vector<2x8x8xf32>, vector<2x8x8xf32> -> vector<2x8x8xf32>
    "tpu.trace_stop"() : () -> ()
    %cst_44 = arith.constant dense<0xFF800000> : vector<2x8xf32>
    %82 = vector.multi_reduction <maximumf>, %81, %cst_44 [2] : vector<2x8x8xf32> to vector<2x8xf32>
    %83 = vector.shape_cast %82 : vector<2x8xf32> to vector<2x8x1xf32>
    %84 = vector.broadcast %83 : vector<2x8x1xf32> to vector<2x8x8xf32>
    %85 = arith.subf %81, %84 : vector<2x8x8xf32>
    %86 = math.exp %85 : vector<2x8x8xf32>
    %cst_45 = arith.constant dense<0.000000e+00> : vector<2x8xf32>
    %87 = vector.multi_reduction <add>, %86, %cst_45 [2] : vector<2x8x8xf32> to vector<2x8xf32>
    %88 = vector.shape_cast %87 : vector<2x8xf32> to vector<2x8x1xf32>
    %89 = vector.broadcast %88 : vector<2x8x1xf32> to vector<2x8x8xf32>
    %90 = arith.divf %86, %89 : vector<2x8x8xf32>
    "tpu.trace_start"() <{level = 10 : i32, message = "bqk,bkd->bqd"}> : () -> ()
    %cst_46 = arith.constant dense<0.000000e+00> : vector<2x8x8xf32>
    %91 = tpu.matmul %90, %80, %cst_46 {dimension_numbers = #tpu.dot_dimension_numbers<[2], [1], [1], [2], [0, 0, 0, 1, 1, 2], [0], [0]>, precision = #tpu.contract_precision<fp32>} : vector<2x8x8xf32>, vector<2x8x8xf32>, vector<2x8x8xf32> -> vector<2x8x8xf32>
    "tpu.trace_stop"() : () -> ()
    %92 = vector.extract_strided_slice %91 {offsets = [0, 0, 0], sizes = [1, 8, 8], strides = [1, 1, 1]} : vector<2x8x8xf32> to vector<1x8x8xf32>
    %93 = vector.shape_cast %92 : vector<1x8x8xf32> to vector<8x8xf32>
    %c0_47 = arith.constant 0 : index
    %c16 = arith.constant 16 : index
    %94 = vector.load %arg19[%c0_47, %c16] : memref<16x32xf32, #tpu.memory_space<vmem>>, vector<8x8xf32>
    tpu.vector_store %arg19[%c0_47, %c16], %93 {strides = array<i32>} : memref<16x32xf32, #tpu.memory_space<vmem>>, vector<8x8xf32>,
    %95 = vector.extract_strided_slice %91 {offsets = [1, 0, 0], sizes = [1, 8, 8], strides = [1, 1, 1]} : vector<2x8x8xf32> to vector<1x8x8xf32>
    %96 = vector.shape_cast %95 : vector<1x8x8xf32> to vector<8x8xf32>
    %c8_48 = arith.constant 8 : index
    %c16_49 = arith.constant 16 : index
    %97 = vector.load %arg19[%c8_48, %c16_49] : memref<16x32xf32, #tpu.memory_space<vmem>>, vector<8x8xf32>
    tpu.vector_store %arg19[%c8_48, %c16_49], %96 {strides = array<i32>} : memref<16x32xf32, #tpu.memory_space<vmem>>, vector<8x8xf32>,
    %98 = vector.extract_strided_slice %37 {offsets = [0, 0, 24], sizes = [2, 8, 8], strides = [1, 1, 1]} : vector<2x8x96xf32> to vector<2x8x8xf32>
    %99 = vector.extract_strided_slice %37 {offsets = [0, 0, 56], sizes = [2, 8, 8], strides = [1, 1, 1]} : vector<2x8x96xf32> to vector<2x8x8xf32>
    %100 = vector.extract_strided_slice %37 {offsets = [0, 0, 88], sizes = [2, 8, 8], strides = [1, 1, 1]} : vector<2x8x96xf32> to vector<2x8x8xf32>
    "tpu.trace_start"() <{level = 10 : i32, message = "bqd,bkd->bqk"}> : () -> ()
    %cst_50 = arith.constant dense<0.000000e+00> : vector<2x8x8xf32>
    %101 = tpu.matmul %98, %99, %cst_50 {dimension_numbers = #tpu.dot_dimension_numbers<[2], [2], [1], [1], [0, 0, 0, 1, 1, 1], [0], [0]>, precision = #tpu.contract_precision<fp32>} : vector<2x8x8xf32>, vector<2x8x8xf32>, vector<2x8x8xf32> -> vector<2x8x8xf32>
    "tpu.trace_stop"() : () -> ()
    %cst_51 = arith.constant dense<0xFF800000> : vector<2x8xf32>
    %102 = vector.multi_reduction <maximumf>, %101, %cst_51 [2] : vector<2x8x8xf32> to vector<2x8xf32>
    %103 = vector.shape_cast %102 : vector<2x8xf32> to vector<2x8x1xf32>
    %104 = vector.broadcast %103 : vector<2x8x1xf32> to vector<2x8x8xf32>
    %105 = arith.subf %101, %104 : vector<2x8x8xf32>
    %106 = math.exp %105 : vector<2x8x8xf32>
    %cst_52 = arith.constant dense<0.000000e+00> : vector<2x8xf32>
    %107 = vector.multi_reduction <add>, %106, %cst_52 [2] : vector<2x8x8xf32> to vector<2x8xf32>
    %108 = vector.shape_cast %107 : vector<2x8xf32> to vector<2x8x1xf32>
    %109 = vector.broadcast %108 : vector<2x8x1xf32> to vector<2x8x8xf32>
    %110 = arith.divf %106, %109 : vector<2x8x8xf32>
    "tpu.trace_start"() <{level = 10 : i32, message = "bqk,bkd->bqd"}> : () -> ()
    %cst_53 = arith.constant dense<0.000000e+00> : vector<2x8x8xf32>
    %111 = tpu.matmul %110, %100, %cst_53 {dimension_numbers = #tpu.dot_dimension_numbers<[2], [1], [1], [2], [0, 0, 0, 1, 1, 2], [0], [0]>, precision = #tpu.contract_precision<fp32>} : vector<2x8x8xf32>, vector<2x8x8xf32>, vector<2x8x8xf32> -> vector<2x8x8xf32>
    "tpu.trace_stop"() : () -> ()
    %112 = vector.extract_strided_slice %111 {offsets = [0, 0, 0], sizes = [1, 8, 8], strides = [1, 1, 1]} : vector<2x8x8xf32> to vector<1x8x8xf32>
    %113 = vector.shape_cast %112 : vector<1x8x8xf32> to vector<8x8xf32>
    %c0_54 = arith.constant 0 : index
    %c24 = arith.constant 24 : index
    %114 = vector.load %arg19[%c0_54, %c24] : memref<16x32xf32, #tpu.memory_space<vmem>>, vector<8x8xf32>
    tpu.vector_store %arg19[%c0_54, %c24], %113 {strides = array<i32>} : memref<16x32xf32, #tpu.memory_space<vmem>>, vector<8x8xf32>,
    %115 = vector.extract_strided_slice %111 {offsets = [1, 0, 0], sizes = [1, 8, 8], strides = [1, 1, 1]} : vector<2x8x8xf32> to vector<1x8x8xf32>
    %116 = vector.shape_cast %115 : vector<1x8x8xf32> to vector<8x8xf32>
    %c8_55 = arith.constant 8 : index
    %c24_56 = arith.constant 24 : index
    %117 = vector.load %arg19[%c8_55, %c24_56] : memref<16x32xf32, #tpu.memory_space<vmem>>, vector<8x8xf32>
    tpu.vector_store %arg19[%c8_55, %c24_56], %116 {strides = array<i32>} : memref<16x32xf32, #tpu.memory_space<vmem>>, vector<8x8xf32>,
    %c0_57 = arith.constant 0 : index
    %c0_58 = arith.constant 0 : index
    %118 = tpu.strided_load %arg19[%c0_57, %c0_58] {strides = array<i32: 8, 1>} : memref<16x32xf32, #tpu.memory_space<vmem>>, vector<2x32xf32>
    %c0_59 = arith.constant 0 : index
    %c0_60 = arith.constant 0 : index
    %119 = vector.load %arg20[%c0_59, %c0_60] : memref<16x32xf32, #tpu.memory_space<vmem>>, vector<2x32xf32>
    tpu.vector_store %arg20[%c0_59, %c0_60], %118 {strides = array<i32>} : memref<16x32xf32, #tpu.memory_space<vmem>>, vector<2x32xf32>,
    %c1_61 = arith.constant 1 : index
    %c0_62 = arith.constant 0 : index
    %120 = tpu.strided_load %arg19[%c1_61, %c0_62] {strides = array<i32: 8, 1>} : memref<16x32xf32, #tpu.memory_space<vmem>>, vector<2x32xf32>
    %c2 = arith.constant 2 : index
    %c0_63 = arith.constant 0 : index
    %121 = vector.load %arg20[%c2, %c0_63] : memref<16x32xf32, #tpu.memory_space<vmem>>, vector<2x32xf32>
    tpu.vector_store %arg20[%c2, %c0_63], %120 {strides = array<i32>} : memref<16x32xf32, #tpu.memory_space<vmem>>, vector<2x32xf32>,
    %c2_64 = arith.constant 2 : index
    %c0_65 = arith.constant 0 : index
    %122 = tpu.strided_load %arg19[%c2_64, %c0_65] {strides = array<i32: 8, 1>} : memref<16x32xf32, #tpu.memory_space<vmem>>, vector<2x32xf32>
    %c4 = arith.constant 4 : index
    %c0_66 = arith.constant 0 : index
    %123 = vector.load %arg20[%c4, %c0_66] : memref<16x32xf32, #tpu.memory_space<vmem>>, vector<2x32xf32>
    tpu.vector_store %arg20[%c4, %c0_66], %122 {strides = array<i32>} : memref<16x32xf32, #tpu.memory_space<vmem>>, vector<2x32xf32>,
    %c3 = arith.constant 3 : index
    %c0_67 = arith.constant 0 : index
    %124 = tpu.strided_load %arg19[%c3, %c0_67] {strides = array<i32: 8, 1>} : memref<16x32xf32, #tpu.memory_space<vmem>>, vector<2x32xf32>
    %c6 = arith.constant 6 : index
    %c0_68 = arith.constant 0 : index
    %125 = vector.load %arg20[%c6, %c0_68] : memref<16x32xf32, #tpu.memory_space<vmem>>, vector<2x32xf32>
    tpu.vector_store %arg20[%c6, %c0_68], %124 {strides = array<i32>} : memref<16x32xf32, #tpu.memory_space<vmem>>, vector<2x32xf32>,
    %c4_69 = arith.constant 4 : index
    %c0_70 = arith.constant 0 : index
    %126 = tpu.strided_load %arg19[%c4_69, %c0_70] {strides = array<i32: 8, 1>} : memref<16x32xf32, #tpu.memory_space<vmem>>, vector<2x32xf32>
    %c8_71 = arith.constant 8 : index
    %c0_72 = arith.constant 0 : index
    %127 = vector.load %arg20[%c8_71, %c0_72] : memref<16x32xf32, #tpu.memory_space<vmem>>, vector<2x32xf32>
    tpu.vector_store %arg20[%c8_71, %c0_72], %126 {strides = array<i32>} : memref<16x32xf32, #tpu.memory_space<vmem>>, vector<2x32xf32>,
    %c5 = arith.constant 5 : index
    %c0_73 = arith.constant 0 : index
    %128 = tpu.strided_load %arg19[%c5, %c0_73] {strides = array<i32: 8, 1>} : memref<16x32xf32, #tpu.memory_space<vmem>>, vector<2x32xf32>
    %c10 = arith.constant 10 : index
    %c0_74 = arith.constant 0 : index
    %129 = vector.load %arg20[%c10, %c0_74] : memref<16x32xf32, #tpu.memory_space<vmem>>, vector<2x32xf32>
    tpu.vector_store %arg20[%c10, %c0_74], %128 {strides = array<i32>} : memref<16x32xf32, #tpu.memory_space<vmem>>, vector<2x32xf32>,
    %c6_75 = arith.constant 6 : index
    %c0_76 = arith.constant 0 : index
    %130 = tpu.strided_load %arg19[%c6_75, %c0_76] {strides = array<i32: 8, 1>} : memref<16x32xf32, #tpu.memory_space<vmem>>, vector<2x32xf32>
    %c12 = arith.constant 12 : index
    %c0_77 = arith.constant 0 : index
    %131 = vector.load %arg20[%c12, %c0_77] : memref<16x32xf32, #tpu.memory_space<vmem>>, vector<2x32xf32>
    tpu.vector_store %arg20[%c12, %c0_77], %130 {strides = array<i32>} : memref<16x32xf32, #tpu.memory_space<vmem>>, vector<2x32xf32>,
    %c7 = arith.constant 7 : index
    %c0_78 = arith.constant 0 : index
    %132 = tpu.strided_load %arg19[%c7, %c0_78] {strides = array<i32: 8, 1>} : memref<16x32xf32, #tpu.memory_space<vmem>>, vector<2x32xf32>
    %c14 = arith.constant 14 : index
    %c0_79 = arith.constant 0 : index
    %133 = vector.load %arg20[%c14, %c0_79] : memref<16x32xf32, #tpu.memory_space<vmem>>, vector<2x32xf32>
    tpu.vector_store %arg20[%c14, %c0_79], %132 {strides = array<i32>} : memref<16x32xf32, #tpu.memory_space<vmem>>, vector<2x32xf32>,
    %c0_80 = arith.constant 0 : index
    %c0_81 = arith.constant 0 : index
    %134 = vector.load %arg20[%c0_80, %c0_81] : memref<16x32xf32, #tpu.memory_space<vmem>>, vector<16x32xf32>
    %c0_82 = arith.constant 0 : index
    %c0_83 = arith.constant 0 : index
    %135 = vector.load %arg7[%c0_82, %c0_83] : memref<32x32xf32, #tpu.memory_space<vmem>>, vector<32x32xf32>
    %cst_84 = arith.constant dense<0.000000e+00> : vector<16x32xf32>
    %136 = tpu.matmul %134, %135, %cst_84 {dimension_numbers = #tpu.dot_dimension_numbers<[1], [0], [0], [1], [0, 0, 1, 1], [], []>, precision = #tpu.contract_precision<fp32>} : vector<16x32xf32>, vector<32x32xf32>, vector<16x32xf32> -> vector<16x32xf32>
    %c0_85 = arith.constant 0 : index
    %c0_86 = arith.constant 0 : index
    %137 = vector.load %arg8[%c0_85, %c0_86] : memref<1x32xf32, #tpu.memory_space<vmem>>, vector<1x32xf32>
    %138 = vector.broadcast %137 : vector<1x32xf32> to vector<16x32xf32>
    %139 = arith.addf %136, %138 : vector<16x32xf32>
    %c0_87 = arith.constant 0 : index
    %c0_88 = arith.constant 0 : index
    %140 = vector.load %arg1[%c0_87, %c0_88] : memref<16x32xf32, #tpu.memory_space<vmem>>, vector<16x32xf32>
    %141 = arith.addf %139, %140 : vector<16x32xf32>
    %c0_89 = arith.constant 0 : index
    %c0_90 = arith.constant 0 : index
    %142 = vector.load %arg15[%c0_89, %c0_90] : memref<16x32xf32, #tpu.memory_space<vmem>>, vector<16x32xf32>
    tpu.vector_store %arg15[%c0_89, %c0_90], %141 {strides = array<i32>} : memref<16x32xf32, #tpu.memory_space<vmem>>, vector<16x32xf32>,
    %cst_91 = arith.constant dense<0.000000e+00> : vector<16xf32>
    %143 = vector.multi_reduction <add>, %141, %cst_91 [1] : vector<16x32xf32> to vector<16xf32>
    %144 = vector.shape_cast %143 : vector<16xf32> to vector<16x1xf32>
    %cst_92 = arith.constant 3.200000e+01 : f32
    %145 = vector.broadcast %cst_92 : f32 to vector<16x1xf32>
    %146 = arith.divf %144, %145 : vector<16x1xf32>
    %147 = vector.broadcast %146 : vector<16x1xf32> to vector<16x32xf32>
    %148 = arith.subf %141, %147 : vector<16x32xf32>
    %149 = arith.mulf %148, %148 : vector<16x32xf32>
    %cst_93 = arith.constant dense<0.000000e+00> : vector<16xf32>
    %150 = vector.multi_reduction <add>, %149, %cst_93 [1] : vector<16x32xf32> to vector<16xf32>
    %151 = vector.shape_cast %150 : vector<16xf32> to vector<16x1xf32>
    %cst_94 = arith.constant 3.200000e+01 : f32
    %152 = vector.broadcast %cst_94 : f32 to vector<16x1xf32>
    %153 = arith.divf %151, %152 : vector<16x1xf32>
    %cst_95 = arith.constant 9.99999974E-6 : f32
    %154 = vector.broadcast %cst_95 : f32 to vector<16x1xf32>
    %155 = arith.addf %153, %154 : vector<16x1xf32>
    %156 = math.rsqrt %155 : vector<16x1xf32>
    %157 = vector.broadcast %156 : vector<16x1xf32> to vector<16x32xf32>
    %158 = arith.mulf %148, %157 : vector<16x32xf32>
    %c0_96 = arith.constant 0 : index
    %c0_97 = arith.constant 0 : index
    %159 = vector.load %arg9[%c0_96, %c0_97] : memref<1x32xf32, #tpu.memory_space<vmem>>, vector<1x32xf32>
    %160 = vector.broadcast %159 : vector<1x32xf32> to vector<16x32xf32>
    %161 = arith.mulf %158, %160 : vector<16x32xf32>
    %c0_98 = arith.constant 0 : index
    %c0_99 = arith.constant 0 : index
    %162 = vector.load %arg10[%c0_98, %c0_99] : memref<1x32xf32, #tpu.memory_space<vmem>>, vector<1x32xf32>
    %163 = vector.broadcast %162 : vector<1x32xf32> to vector<16x32xf32>
    %164 = arith.addf %161, %163 : vector<16x32xf32>
    %c0_100 = arith.constant 0 : index
    %c0_101 = arith.constant 0 : index
    %165 = vector.load %arg11[%c0_100, %c0_101] : memref<32x128xf32, #tpu.memory_space<vmem>>, vector<32x128xf32>
    %cst_102 = arith.constant dense<0.000000e+00> : vector<16x128xf32>
    %166 = tpu.matmul %164, %165, %cst_102 {dimension_numbers = #tpu.dot_dimension_numbers<[1], [0], [0], [1], [0, 0, 1, 1], [], []>, precision = #tpu.contract_precision<fp32>} : vector<16x32xf32>, vector<32x128xf32>, vector<16x128xf32> -> vector<16x128xf32>
    %c0_103 = arith.constant 0 : index
    %c0_104 = arith.constant 0 : index
    %167 = vector.load %arg12[%c0_103, %c0_104] : memref<1x128xf32, #tpu.memory_space<vmem>>, vector<1x128xf32>
    %168 = vector.broadcast %167 : vector<1x128xf32> to vector<16x128xf32>
    %169 = arith.addf %166, %168 : vector<16x128xf32>
    %cst_105 = arith.constant 0.000000e+00 : f32
    %170 = vector.broadcast %cst_105 : f32 to vector<16x128xf32>
    %171 = arith.maximumf %169, %170 : vector<16x128xf32>
    %c0_106 = arith.constant 0 : index
    %c0_107 = arith.constant 0 : index
    %172 = vector.load %arg13[%c0_106, %c0_107] : memref<128x32xf32, #tpu.memory_space<vmem>>, vector<128x32xf32>
    %cst_108 = arith.constant dense<0.000000e+00> : vector<16x32xf32>
    %173 = tpu.matmul %171, %172, %cst_108 {dimension_numbers = #tpu.dot_dimension_numbers<[1], [0], [0], [1], [0, 0, 1, 1], [], []>, precision = #tpu.contract_precision<fp32>} : vector<16x128xf32>, vector<128x32xf32>, vector<16x32xf32> -> vector<16x32xf32>
    %c0_109 = arith.constant 0 : index
    %c0_110 = arith.constant 0 : index
    %174 = vector.load %arg14[%c0_109, %c0_110] : memref<1x32xf32, #tpu.memory_space<vmem>>, vector<1x32xf32>
    %175 = vector.broadcast %174 : vector<1x32xf32> to vector<16x32xf32>
    %176 = arith.addf %173, %175 : vector<16x32xf32>
    %177 = arith.addf %176, %0 : vector<16x32xf32>
    %c0_111 = arith.constant 0 : index
    %c0_112 = arith.constant 0 : index
    %178 = vector.load %arg16[%c0_111, %c0_112] : memref<16x32xf32, #tpu.memory_space<vmem>>, vector<16x32xf32>
    tpu.vector_store %arg16[%c0_111, %c0_112], %177 {strides = array<i32>} : memref<16x32xf32, #tpu.memory_space<vmem>>, vector<16x32xf32>,
    return
  }
  func.func @transform_0(%arg0: i32) -> (i32, i32) {
    %c0_i32 = arith.constant 0 : i32
    %c0_i32_0 = arith.constant 0 : i32
    %c0_i32_1 = arith.constant 0 : i32
    return %c0_i32, %c0_i32_0 : i32, i32
  }
  func.func @transform_1(%arg0: i32) -> (i32, i32) {
    %c0_i32 = arith.constant 0 : i32
    %c0_i32_0 = arith.constant 0 : i32
    %c0_i32_1 = arith.constant 0 : i32
    return %c0_i32, %c0_i32_0 : i32, i32
  }
  func.func @transform_2(%arg0: i32) -> (i32, i32) {
    %c0_i32 = arith.constant 0 : i32
    %c0_i32_0 = arith.constant 0 : i32
    %c0_i32_1 = arith.constant 0 : i32
    return %c0_i32, %c0_i32_0 : i32, i32
  }
  func.func @transform_3(%arg0: i32) -> (i32, i32) {
    %c0_i32 = arith.constant 0 : i32
    %c0_i32_0 = arith.constant 0 : i32
    %c0_i32_1 = arith.constant 0 : i32
    return %c0_i32, %c0_i32_0 : i32, i32
  }
  func.func @transform_4(%arg0: i32) -> (i32, i32) {
    %c0_i32 = arith.constant 0 : i32
    %c0_i32_0 = arith.constant 0 : i32
    %c0_i32_1 = arith.constant 0 : i32
    return %c0_i32, %c0_i32_0 : i32, i32
  }
  func.func @transform_5(%arg0: i32) -> (i32, i32) {
    %c0_i32 = arith.constant 0 : i32
    %c0_i32_0 = arith.constant 0 : i32
    %c0_i32_1 = arith.constant 0 : i32
    return %c0_i32, %c0_i32_0 : i32, i32
  }
  func.func @transform_6(%arg0: i32) -> (i32, i32) {
    %c0_i32 = arith.constant 0 : i32
    %c0_i32_0 = arith.constant 0 : i32
    %c0_i32_1 = arith.constant 0 : i32
    return %c0_i32, %c0_i32_0 : i32, i32
  }
  func.func @transform_7(%arg0: i32) -> (i32, i32) {
    %c0_i32 = arith.constant 0 : i32
    %c0_i32_0 = arith.constant 0 : i32
    %c0_i32_1 = arith.constant 0 : i32
    return %c0_i32, %c0_i32_0 : i32, i32
  }
  func.func @transform_8(%arg0: i32) -> (i32, i32) {
    %c0_i32 = arith.constant 0 : i32
    %c0_i32_0 = arith.constant 0 : i32
    %c0_i32_1 = arith.constant 0 : i32
    return %c0_i32, %c0_i32_0 : i32, i32
  }
  func.func @transform_9(%arg0: i32) -> (i32, i32) {
    %c0_i32 = arith.constant 0 : i32
    %c0_i32_0 = arith.constant 0 : i32
    %c0_i32_1 = arith.constant 0 : i32
    return %c0_i32, %c0_i32_0 : i32, i32
  }
  func.func @transform_10(%arg0: i32) -> (i32, i32) {
    %c0_i32 = arith.constant 0 : i32
    %c0_i32_0 = arith.constant 0 : i32
    %c0_i32_1 = arith.constant 0 : i32
    return %c0_i32, %c0_i32_0 : i32, i32
  }
  func.func @transform_11(%arg0: i32) -> (i32, i32) {
    %c0_i32 = arith.constant 0 : i32
    %c0_i32_0 = arith.constant 0 : i32
    %c0_i32_1 = arith.constant 0 : i32
    return %c0_i32, %c0_i32_0 : i32, i32
  }
  func.func @transform_12(%arg0: i32) -> (i32, i32) {
    %c0_i32 = arith.constant 0 : i32
    %c0_i32_0 = arith.constant 0 : i32
    %c0_i32_1 = arith.constant 0 : i32
    return %c0_i32, %c0_i32_0 : i32, i32
  }
  func.func @transform_13(%arg0: i32) -> (i32, i32) {
    %c0_i32 = arith.constant 0 : i32
    %c0_i32_0 = arith.constant 0 : i32
    %c0_i32_1 = arith.constant 0 : i32
    return %c0_i32, %c0_i32_0 : i32, i32
  }
  func.func @transform_14(%arg0: i32) -> (i32, i32) {
    %c0_i32 = arith.constant 0 : i32
    %c0_i32_0 = arith.constant 0 : i32
    %c0_i32_1 = arith.constant 0 : i32
    return %c0_i32, %c0_i32_0 : i32, i32
  }
  func.func @transform_15(%arg0: i32) -> (i32, i32) {
    %c0_i32 = arith.constant 0 : i32
    %c0_i32_0 = arith.constant 0 : i32
    %c0_i32_1 = arith.constant 0 : i32
    return %c0_i32, %c0_i32_0 : i32, i32
  }
}

</mosaic_0001>

<bundles_post_ra>
// kernel: reversible_encoder_layer_forward.1
= control target key start
LH: loop header
LB: loop body
LE: loop exit
PB: predicated region body
PF: predicated region fallthrough
CT: control target
= control target key end

     0   :  { %21 = vsyncpa [#allocation7], 0  ;;  %vm53_vm0 = vcmask 261120   ;;  %s4809_s0 = inlined_call_operand.vmem [shape: f32[16,32], index: 0, kind: input, shape index: {}]   ;;  %s4810_s1 = inlined_call_operand.vmem [shape: f32[16,32], index: 1, kind: input, shape index: {}]   ;;  %s4811_s2 = inlined_call_operand.vmem [shape: f32[1,32], index: 2, kind: input, shape index: {}]   ;;  %s4812_s3 = inlined_call_operand.vmem [shape: f32[1,32], index: 3, kind: input, shape index: {}]   ;;  %s4813_s4 = inlined_call_operand.vmem [shape: f32[32,96], index: 4, kind: input, shape index: {}]   ;;  %s4814_s5 = inlined_call_operand.vmem [shape: f32[1,96], index: 5, kind: input, shape index: {}]   ;;  %s4815_s6 = inlined_call_operand.vmem [shape: f32[32,32], index: 6, kind: input, shape index: {}]   ;;  %s4816_s7 = inlined_call_operand.vmem [shape: f32[1,32], index: 7, kind: input, shape index: {}]   ;;  %s4817_s8 = inlined_call_operand.vmem [shape: f32[1,32], index: 8, kind: input, shape index: {}]   ;;  %s4818_s9 = inlined_call_operand.vmem [shape: f32[1,32], index: 9, kind: input, shape index: {}]   ;;  %s4819_s10 = inlined_call_operand.vmem [shape: f32[32,128], index: 10, kind: input, shape index: {}]   ;;  %s4820_s11 = inlined_call_operand.vmem [shape: f32[1,128], index: 11, kind: input, shape index: {}]   ;;  %s4821_s12 = inlined_call_operand.vmem [shape: f32[128,32], index: 12, kind: input, shape index: {}]   ;;  %s4822_s13 = inlined_call_operand.vmem [shape: f32[1,32], index: 13, kind: input, shape index: {}]   ;;  %s4823_s14 = inlined_call_operand.hbm [shape: f32[16,32], index: 14, kind: output, shape index: {0}]   ;;  %s4824_s15 = inlined_call_operand.hbm [shape: f32[16,32], index: 15, kind: output, shape index: {1}]  }
   0x1   :  { %v51_v0 = vld [vmem:[%s4810_s1] sm:$0xff] }
   0x2   :  { %v54_v1 = vsel %vm53_vm0, %v51_v0, 0.0 }
   0x3   :  { %55 = vadd.xlane.f32.xlu0 %v54_v1 }
   0x4   :  { %22 = vsyncpa [#allocation9], 0  ;;  %v52_v2 = vld [vmem:[%s4810_s1 + $0x8] sm:$0xff]  ;;  %v4138_v4 = vmov 32.0   ;;  %v120_v21 = vld [vmem:[%s4813_s4 + $0x18] sm:$0xff]  ;;  %vm347_vm8 = vcmask 785408  }
   0x5   :  { %v57_v3 = vsel %vm53_vm0, %v52_v2, 0.0  ;;  %4040 = vrcp.f32 %v4138_v4  ;;  %v143_v22 = vand.u32 4294901760, %v120_v21  ;;  %v119_v23 = vld [vmem:[%s4813_s4 + $0x10] sm:$0xff]  ;;  %v118_v26 = vld [vmem:[%s4813_s4 + $0x8] sm:$0xff]  ;;  %v117_v30 = vld [vmem:[%s4813_s4] sm:$0xff]  ;;  %vm361_vm9 = vcmask 64512  }
   0x6   :  { %v145_v25 = vand.u32 4294901760, %v119_v23  ;;  %v147_v29 = vand.u32 4294901760, %v118_v26  ;;  %v149_v34 = vand.u32 4294901760, %v117_v30  ;;  %v4032_v59 = vld [vmem:[%s4811_s2] ss:$0 sm:$0xff]  ;;  %s4140_s18 = smov 64  }
   0x7   :  { %v181_v24 = vsub.f32 %v120_v21, %v143_v22  ;;  %331 = vmatpush.msra.mxu1 %v143_v22  ;;  %144 = vmatpush.msra.mxu2 %v143_v22  ;;  %v4033_v63 = vld [vmem:[%s4812_s3] ss:$0 sm:$0xff]  ;;  %s4141_s19 = smov 88   ;;  %s4142_s20 = smov 120  }
   0x8   :  { %v187_v28 = vsub.f32 %v119_v23, %v145_v25  ;;  %v193_v33 = vsub.f32 %v118_v26, %v147_v29  ;;  %v199_v38 = vsub.f32 %v117_v30, %v149_v34  ;;  %s4143_s21 = smov 56   ;;  %s4144_s22 = smov 80  }
   0x9   :  { %v182_v27 = vand.u32 4294901760, %v181_v24  ;;  %333 = vmatpush.msra.mxu1 %v145_v25  ;;  %146 = vmatpush.msra.mxu2 %v145_v25  ;;  %s4145_s23 = smov 112   ;;  %s4146_s24 = smov 48  }
   0xa   :  { %v188_v32 = vand.u32 4294901760, %v187_v28  ;;  %v194_v37 = vand.u32 4294901760, %v193_v33  ;;  %v200_v41 = vand.u32 4294901760, %v199_v38  ;;  %s4147_s25 = smov 104   ;;  %s4148_s26 = smov 72  }
   0xb   :  { %58 = vadd.xlane.f32.xlu0 %v57_v3  ;;  %v4041_v5 = vpop.eup %4040  ;;  %v183_v31 = vsub.f32 %v181_v24, %v182_v27  ;;  %296 = vmatpush.msra.mxu0 %v182_v27  ;;  %s4149_s27 = smov 40   ;;  %s4150_s28 = smov 8  }
   0xc   :  { %v61_v6 = vmul.f32 32.0, %v4041_v5  ;;  %vm65_vm1 = vweird.f32 %v4041_v5  ;;  %335 = vmatpush.msra.mxu1 %v147_v29  ;;  %148 = vmatpush.msra.mxu2 %v147_v29  ;;  %v189_v36 = vsub.f32 %v187_v28, %v188_v32  ;;  %v195_v40 = vsub.f32 %v193_v33, %v194_v37  ;;  %s4151_s29 = smov 16   ;;  %s4152_s4 = smov 24  }
   0xd   :  { %v184_v35 = vand.u32 4294901760, %v183_v31  ;;  %300 = vmatpush.msra.mxu0 %v188_v32  ;;  %v201_v43 = vsub.f32 %v199_v38, %v200_v41 }
   0xe   :  { %v62_v7 = vsub.f32 1.0, %v61_v6  ;;  %337 = vmatpush.msra.mxu1 %v149_v34  ;;  %150 = vmatpush.msra.mxu2 %v149_v34  ;;  %v190_v39 = vand.u32 4294901760, %v189_v36  ;;  %v196_v42 = vand.u32 4294901760, %v195_v40 }
   0xf   :  { %185 = vmatpush.msra.mxu3 %v184_v35  ;;  %304 = vmatpush.msra.mxu0 %v194_v37  ;;  %v202_v44 = vand.u32 4294901760, %v201_v43 }
  0x10   :  { %v63_v8 = vmul.f32 %v4041_v5, %v62_v7  ;;  %227 = vmatpush.msrb.mxu2 %v181_v24 }
  0x11   :  { %191 = vmatpush.msra.mxu3 %v190_v39  ;;  %308 = vmatpush.msra.mxu0 %v200_v41 }
  0x12   :  { %v64_v9 = vadd.f32 %v4041_v5, %v63_v8  ;;  %230 = vmatpush.msrb.mxu2 %v187_v28 }
  0x13   :  { %197 = vmatpush.msra.mxu3 %v196_v42 }
  0x14   :  { %v4244_v10 = vsel %vm65_vm1, %v4041_v5, %v64_v9  ;;  %233 = vmatpush.msrb.mxu2 %v193_v33 }
  0x15   :  { %203 = vmatpush.msra.mxu3 %v202_v44 }
  0x16   :  { %236 = vmatpush.msrb.mxu2 %v199_v38 }
  0x17   :  { %261 = vmatpush.msrb.mxu3 %v143_v22 }
  0x19   :  { %263 = vmatpush.msrb.mxu3 %v145_v25  ;;  %v4034_v25 = vld [vmem:[%s4814_s5] ss:$0 sm:$0xff]  ;;  %s4139_s5 = smov 96  }
  0x1b   :  { %265 = vmatpush.msrb.mxu3 %v147_v29 }
  0x1d   :  { %267 = vmatpush.msrb.mxu3 %v149_v34 }
  0x76   :  { %v56_v11 = vpop.xlane.xlu0 %55 }
  0x77   :  { %v67_v12 = vmul.f32 %v4244_v10, %v56_v11 }
  0x79   :  { %v4247_v13 = vsub.f32 %v51_v0, %v67_v12 }
  0x7b   :  { %v71_v14 = vmul.f32 %v4247_v13, %v4247_v13 }
  0x7d   :  { %v73_v15 = vsel %vm53_vm0, %v71_v14, 0.0 }
  0x7e   :  { %74 = vadd.xlane.f32.xlu1 %v73_v15  ;;  %v59_v16 = vpop.xlane.xlu0 %58 }
  0x7f   :  { %v68_v17 = vmul.f32 %v4244_v10, %v59_v16 }
  0x81   :  { %v4253_v18 = vsub.f32 %v52_v2, %v68_v17 }
  0x83   :  { %v72_v19 = vmul.f32 %v4253_v18, %v4253_v18 }
  0x85   :  { %v76_v20 = vsel %vm53_vm0, %v72_v19, 0.0 }
  0x86   :  { %77 = vadd.xlane.f32.xlu1 %v76_v20 }
  0xf1   :  { %v75_v45 = vpop.xlane.xlu1 %74 }
  0xf2   :  { %v79_v46 = vmul.f32 %v75_v45, %v4244_v10 }
  0xf4   :  { %v81_v47 = vadd.f32 1e-05, %v79_v46 }
  0xf6   :  { %4042 = vrsqrt.f32 %v81_v47  ;;  %vm89_vm3 = vweird.f32 %v81_v47 }
  0xf9   :  { %v78_v48 = vpop.xlane.xlu1 %77 }
  0xfa   :  { %v80_v49 = vmul.f32 %v78_v48, %v4244_v10 }
  0xfc   :  { %v4043_v50 = vpop.eup %4042  ;;  %v82_v51 = vadd.f32 1e-05, %v80_v49 }
  0xfd   :  { %v84_v52 = vmul.f32 %v4043_v50, %v81_v47  ;;  %vm90_vm2 = vweird.f32 %v4043_v50 }
  0xfe   :  { %4044 = vrsqrt.f32 %v82_v51  ;;  %vm91_vm4 = vmor %vm89_vm3, %vm90_vm2  ;;  %vm99_vm6 = vweird.f32 %v82_v51 }
  0xff   :  { %v85_v53 = vmul.f32 %v4043_v50, %v84_v52 }
 0x101   :  { %v86_v54 = vmul.f32 0.5, %v85_v53 }
 0x103   :  { %v87_v55 = vsub.f32 1.5, %v86_v54 }
 0x104   :  { %v4045_v56 = vpop.eup %4044 }
 0x105   :  { %v88_v57 = vmul.f32 %v4043_v50, %v87_v55  ;;  %v94_v58 = vmul.f32 %v4045_v56, %v82_v51  ;;  %vm100_vm5 = vweird.f32 %v4045_v56 }
 0x106   :  { %vm101_vm7 = vmor %vm99_vm6, %vm100_vm5 }
 0x107   :  { %v92_v60 = vsel %vm91_vm4, %v4043_v50, %v88_v57  ;;  %v95_v61 = vmul.f32 %v4045_v56, %v94_v58 }
 0x108   :  { %v103_v62 = vmul.f32 %v92_v60, %v4247_v13 }
 0x109   :  { %v96_v0 = vmul.f32 0.5, %v95_v61 }
 0x10a   :  { %v109_v1 = vmul.f32 %v4032_v59, %v103_v62 }
 0x10b   :  { %v97_v2 = vsub.f32 1.5, %v96_v0 }
 0x10c   :  { %v115_v3 = vadd.f32 %v4033_v63, %v109_v1 }
 0x10d   :  { %v98_v4 = vmul.f32 %v4045_v56, %v97_v2 }
 0x10e   :  { %v126_v5 = vsel %vm53_vm0, %v115_v3, 0 }
 0x10f   :  { %v102_v6 = vsel %vm101_vm7, %v4045_v56, %v98_v4  ;;  %v151_v7 = vand.u32 4294901760, %v126_v5 }
 0x110   :  { %v104_v8 = vmul.f32 %v102_v6, %v4253_v18 }
 0x111   :  { %205 = vmatmul.f32.vlgmr.msra.gmra.mxu3 %v151_v7  ;;  %310 = vmatmul.f32.vlgmr.msra.gmra.mxu0 %v151_v7  ;;  %v152_v9 = vsub.f32 %v126_v5, %v151_v7 }
 0x112   :  { %v110_v11 = vmul.f32 %v4032_v59, %v104_v8  ;;  %339 = vmatmul.f32.vlgmr.msra.gmra.mxu1 %v151_v7 }
 0x113   :  { %v153_v12 = vand.u32 4294901760, %v152_v9 }
 0x114   :  { %v116_v13 = vadd.f32 %v4033_v63, %v110_v11 }
 0x115   :  { %v154_v14 = vsub.f32 %v152_v9, %v153_v12 }
 0x116   :  { %v129_v15 = vsel %vm53_vm0, %v116_v13, 0 }
 0x117   :  { %v155_v16 = vand.u32 4294901760, %v154_v14  ;;  %v159_v17 = vand.u32 4294901760, %v129_v15 }
 0x119   :  { %156 = vmatmul.f32.vlgmr.msra.gmra.mxu2 %v155_v16  ;;  %209 = vmatmul.f32.gmra.mxu3 %v159_v17  ;;  %v160_v19 = vsub.f32 %v129_v15, %v159_v17 }
 0x11a   :  { %314 = vmatmul.f32.gmra.mxu0 %v159_v17  ;;  %343 = vmatmul.f32.gmra.mxu1 %v159_v17 }
 0x11b   :  { %v161_v20 = vand.u32 4294901760, %v160_v19 }
 0x11d   :  { %v162_v21 = vsub.f32 %v160_v19, %v161_v20 }
 0x11f   :  { %v163_v18 = vand.u32 4294901760, %v162_v21 }
 0x121   :  { %164 = vmatmul.f32.gmra.mxu2 %v163_v18  ;;  %271 = vmatmul.f32.vlgmr.msrb.gmra.mxu3 %v153_v12 }
 0x129   :  { %239 = vmatmul.f32.vlgmr.msrb.gmra.mxu2 %v152_v9  ;;  %277 = vmatmul.f32.gmra.mxu3 %v161_v20 }
 0x131   :  { %244 = vmatmul.f32.gmra.mxu2 %v160_v19 }
 0x18e   :  { %v311_v32 = vpop.f32.mrf.mxu0 }
 0x18f   :  { %v340_v35 = vpop.f32.mrf.mxu1 }
 0x194   :  { %v206_v22 = vpop.f32.mrf.mxu3 }
 0x197   :  { %v315_v43 = vpop.f32.mrf.mxu0  ;;  %v344_v45 = vpop.f32.mrf.mxu1 }
 0x19c   :  { %v157_v23 = vpop.f32.mrf.mxu2  ;;  %v210_v24 = vpop.f32.mrf.mxu3 }
 0x19d   :  { %v158_v27 = vadd.f32 %v4034_v25, %v157_v23 }
 0x19f   :  { %v207_v28 = vadd.f32 %v206_v22, %v158_v27 }
 0x1a4   :  { %v165_v26 = vpop.f32.mrf.mxu2  ;;  %v272_v29 = vpop.f32.mrf.mxu3 }
 0x1a5   :  { %v166_v33 = vadd.f32 %v4034_v25, %v165_v26 }
 0x1a7   :  { %v211_v38 = vadd.f32 %v210_v24, %v166_v33 }
 0x1ac   :  { %v240_v30 = vpop.f32.mrf.mxu2  ;;  %v278_v41 = vpop.f32.mrf.mxu3 }
 0x1ad   :  { %v241_v31 = vadd.f32 %v240_v30, %v207_v28 }
 0x1af   :  { %v273_v34 = vadd.f32 %v272_v29, %v241_v31 }
 0x1b1   :  { %v312_v36 = vadd.f32 %v311_v32, %v273_v34 }
 0x1b3   :  { %v341_v37 = vadd.f32 %v340_v35, %v312_v36 }
 0x1b4   :  { %v245_v39 = vpop.f32.mrf.mxu2 }
 0x1b5   :  { %348 = vst.msk [vmem:[#allocation2] sm:$0xff] %vm347_vm8, %v341_v37  ;;  %v246_v40 = vadd.f32 %v245_v39, %v211_v38 }
 0x1b7   :  { %v279_v42 = vadd.f32 %v278_v41, %v246_v40 }
 0x1b9   :  { %v316_v44 = vadd.f32 %v315_v43, %v279_v42 }
 0x1bb   :  { %v345_v46 = vadd.f32 %v344_v45, %v316_v44 }
 0x1bd   :  { %349 = vst.msk [vmem:[#allocation2 + $0x8] sm:$0xff] %vm347_vm8, %v345_v46 }
 0x1c4   :  { %v350_v47 = vld [vmem:[#allocation2] ss:$2 sm:$0xff]  ;;  %v353_v48 = vld [vmem:[#allocation2 + $0x1] ss:$2 sm:$0xff] }
 0x1c5   :  { %351 = vst.msk [vmem:[#allocation3] sm:$0xff] %vm347_vm8, %v350_v47 }
 0x1c6   :  { %355 = vst.msk [vmem:[#allocation3 + $0x8] sm:$0xff] %vm347_vm8, %v353_v48 }
 0x1cc   :  { %v4289_v49 = vld [vmem:[#allocation3] sm:$0xff] }
 0x1cd   :  { %359 = vrot.lane.b32.xlu2 %v4289_v49, %s4139_s5  ;;  %v4292_v50 = vld [vmem:[#allocation3 + $0x8] sm:$0xff]  ;;  %v362_v51 = vsel %vm361_vm9, %v4289_v49, 0 }
 0x1ce   :  { %v383_v52 = vand.u32 4294901760, %v362_v51  ;;  %v515_v59 = vsel %vm361_vm9, %v4292_v50, 0 }
 0x1cf   :  { %v536_v62 = vand.u32 4294901760, %v515_v59 }
 0x1d0   :  { %v384_v53 = vsub.f32 %v362_v51, %v383_v52 }
 0x1d1   :  { %v537_v3 = vsub.f32 %v515_v59, %v536_v62 }
 0x1d2   :  { %v385_v54 = vand.u32 4294901760, %v384_v53 }
 0x1d3   :  { %v538_v7 = vand.u32 4294901760, %v537_v3 }
 0x1d4   :  { %v386_v57 = vsub.f32 %v384_v53, %v385_v54 }
 0x1d5   :  { %513 = vrot.lane.b32.xlu2 %v4292_v50, %s4139_s5  ;;  %v539_v11 = vsub.f32 %v537_v3, %v538_v7 }
 0x1d6   :  { %v387_v61 = vand.u32 4294901760, %v386_v57 }
 0x1d7   :  { %v540_v13 = vand.u32 4294901760, %v539_v11 }
 0x227   :  { %v360_v55 = vpop.permute.xlu2 %359 }
 0x228   :  { %v364_v56 = vsel %vm361_vm9, %v360_v55, 0 }
 0x229   :  { %v381_v58 = vand.u32 4294901760, %v364_v56 }
 0x22b   :  { %v408_v60 = vsub.f32 %v364_v56, %v381_v58  ;;  %382 = vmatpush.xpose.msra.mxu2 %v381_v58  ;;  %506 = vmatpush.xpose.msrb.mxu1 %v381_v58 }
 0x22d   :  { %v409_v63 = vand.u32 4294901760, %v408_v60 }
 0x22e   :  { %388 = vmatmul.f32.vlgmr.msra.gmra.mxu2 %v387_v61  ;;  %508 = vmatmul.f32.vlgmr.msrb.gmra.mxu1 %v383_v52 }
 0x22f   :  { %435 = vmatpush.xpose.msrb.mxu2 %v408_v60  ;;  %v410_v0 = vsub.f32 %v408_v60, %v409_v63  ;;  %484 = vmatpush.xpose.msrb.mxu0 %v409_v63  ;;  %v514_v1 = vpop.permute.xlu2 %513 }
 0x230   :  { %v517_v2 = vsel %vm361_vm9, %v514_v1, 0 }
 0x231   :  { %v411_v4 = vand.u32 4294901760, %v410_v0  ;;  %v534_v5 = vand.u32 4294901760, %v517_v2 }
 0x232   :  { %486 = vmatmul.f32.vlgmr.msrb.gmra.mxu0 %v383_v52 }
 0x233   :  { %v561_v6 = vsub.f32 %v517_v2, %v534_v5  ;;  %412 = vmatpush.xpose.msra.mxu3 %v411_v4  ;;  %535 = vmatpush.xpose.msra.mxu2 %v534_v5 }
 0x234   :  { %611 = vmatpush.xpose.msra.mxu1 %v534_v5 }
 0x235   :  { %v562_v8 = vand.u32 4294901760, %v561_v6  ;;  %588 = vmatpush.xpose.msra.mxu0 %v561_v6 }
 0x236   :  { %414 = vmatmul.f32.vlgmr.msra.gmra.mxu3 %v383_v52  ;;  %438 = vmatmul.f32.vlgmr.msrb.gmra.mxu2 %v384_v53 }
 0x237   :  { %458 = vmatpush.xpose.msrb.mxu3 %v381_v58  ;;  %v563_v9 = vsub.f32 %v561_v6, %v562_v8  ;;  %615 = vmatmul.f32.vlgmr.msra.gmra.mxu1 %v538_v7 }
 0x238   :  { %637 = vmatpush.xpose.msrb.mxu2 %v562_v8 }
 0x239   :  { %v564_v12 = vand.u32 4294901760, %v563_v9 }
 0x23a   :  { %591 = vmatmul.f32.vlgmr.msra.gmra.mxu0 %v537_v3 }
 0x23b   :  { %565 = vmatpush.xpose.msra.mxu3 %v564_v12 }
 0x23e   :  { %462 = vmatmul.f32.vlgmr.msrb.gmra.mxu3 %v385_v54  ;;  %541 = vmatmul.f32.vlgmr.msra.gmra.mxu2 %v540_v13 }
 0x23f   :  { %659 = vmatpush.xpose.msrb.mxu3 %v534_v5 }
 0x246   :  { %567 = vmatmul.f32.vlgmr.msra.gmra.mxu3 %v536_v62  ;;  %639 = vmatmul.f32.vlgmr.msrb.gmra.mxu2 %v536_v62 }
 0x24e   :  { %661 = vmatmul.f32.vlgmr.msrb.gmra.mxu3 %v536_v62 }
 0x2ab   :  { %v509_v22 = vpop.f32.mrf.mxu1 }
 0x2af   :  { %v487_v20 = vpop.f32.mrf.mxu0 }
 0x2b1   :  { %v389_v14 = vpop.f32.mrf.mxu2 }
 0x2b4   :  { %v616_v31 = vpop.f32.mrf.mxu1 }
 0x2b7   :  { %v592_v29 = vpop.f32.mrf.mxu0 }
 0x2b9   :  { %v415_v15 = vpop.f32.mrf.mxu3  ;;  %v439_v16 = vpop.f32.mrf.mxu2 }
 0x2ba   :  { %v416_v17 = vadd.f32 %v415_v15, %v389_v14 }
 0x2bc   :  { %v440_v19 = vadd.f32 %v439_v16, %v416_v17 }
 0x2c1   :  { %v463_v21 = vpop.f32.mrf.mxu3  ;;  %v542_v24 = vpop.f32.mrf.mxu2 }
 0x2c2   :  { %v464_v18 = vadd.f32 %v463_v21, %v440_v19 }
 0x2c4   :  { %v488_v23 = vadd.f32 %v487_v20, %v464_v18 }
 0x2c6   :  { %v510_v25 = vadd.f32 %v509_v22, %v488_v23 }
 0x2c8   :  { %v665_v26 = vsel %vm361_vm9, %v510_v25, -inf }
 0x2c9   :  { %v568_v27 = vpop.f32.mrf.mxu3  ;;  %666 = vmax.xlane.f32.xlu0 %v665_v26  ;;  %v640_v33 = vpop.f32.mrf.mxu2 }
 0x2ca   :  { %v569_v28 = vadd.f32 %v568_v27, %v542_v24 }
 0x2cc   :  { %v593_v30 = vadd.f32 %v592_v29, %v569_v28 }
 0x2ce   :  { %v617_v32 = vadd.f32 %v616_v31, %v593_v30 }
 0x2d0   :  { %v641_v34 = vadd.f32 %v640_v33, %v617_v32 }
 0x2d1   :  { %v662_v35 = vpop.f32.mrf.mxu3 }
 0x2d2   :  { %v663_v36 = vadd.f32 %v662_v35, %v641_v34 }
 0x2d4   :  { %v668_v37 = vsel %vm361_vm9, %v663_v36, -inf }
 0x2d5   :  { %669 = vmax.xlane.f32.xlu1 %v668_v37 }
 0x2dd   :  { %865 = vrot.lane.b32.xlu0 %v4292_v50, %s4140_s18 }
 0x2ee   :  { %713 = vrot.lane.b32.xlu1 %v4289_v49, %s4140_s18 }
 0x2f6   :  { %1021 = vrot.lane.b32.xlu1 %v4289_v49, %s4141_s19 }
 0x2fe   :  { %1175 = vrot.lane.b32.xlu1 %v4292_v50, %s4141_s19 }
 0x33c   :  { %v667_v38 = vpop.xlane.xlu0 %666 }
 0x33d   :  { %v671_v39 = vsub.f32 %v510_v25, %v667_v38 }
 0x33f   :  { %v673_v40 = vmul.f32 1.442695, %v671_v39 }
 0x341   :  { %4046 = vpow2.f32 %v673_v40 }
 0x347   :  { %v4047_v41 = vpop.eup %4046 }
 0x348   :  { %v670_v42 = vpop.xlane.xlu1 %669  ;;  %v677_v43 = vsel %vm361_vm9, %v4047_v41, 0.0 }
 0x349   :  { %v672_v44 = vsub.f32 %v663_v36, %v670_v42  ;;  %678 = vadd.xlane.f32.xlu2 %v677_v43 }
 0x34b   :  { %v675_v45 = vmul.f32 1.442695, %v672_v44 }
 0x34d   :  { %4048 = vpow2.f32 %v675_v45 }
 0x34f   :  { %v866_v46 = vpop.permute.xlu0 %865 }
 0x350   :  { %v4308_v47 = vand.u32 4294901760, %v866_v46 }
 0x352   :  { %v4315_v52 = vsub.f32 %v866_v46, %v4308_v47 }
 0x353   :  { %v4310_v48 = vpop.eup %4048 }
 0x354   :  { %v680_v51 = vsel %vm361_vm9, %v4310_v48, 0.0  ;;  %v914_v53 = vand.u32 4294901760, %v4315_v52 }
 0x355   :  { %681 = vadd.xlane.f32.xlu0 %v680_v51 }
 0x356   :  { %v915_v54 = vsub.f32 %v4315_v52, %v914_v53 }
 0x358   :  { %v916_v57 = vand.u32 4294901760, %v915_v54 }
 0x360   :  { %v714_v55 = vpop.permute.xlu1 %713 }
 0x361   :  { %v734_v56 = vand.u32 4294901760, %v714_v55  ;;  %1173 = vrot.lane.b32.xlu2 %v4292_v50, %s4142_s20 }
 0x363   :  { %v761_v58 = vsub.f32 %v714_v55, %v734_v56  ;;  %735 = vmatpush.msrb.mxu0 %v734_v56  ;;  %811 = vmatpush.msra.mxu3 %v734_v56 }
 0x365   :  { %917 = vmatpush.msrb.mxu3 %v916_v57  ;;  %v762_v59 = vand.u32 4294901760, %v761_v58  ;;  %788 = vmatpush.msra.mxu2 %v761_v58 }
 0x367   :  { %887 = vmatpush.msrb.mxu2 %v4308_v47  ;;  %v763_v60 = vsub.f32 %v761_v58, %v762_v59  ;;  %837 = vmatpush.msra.mxu0 %v762_v59 }
 0x368   :  { %v1022_v0 = vpop.permute.xlu1 %1021 }
 0x369   :  { %v764_v61 = vand.u32 4294901760, %v763_v60  ;;  %1019 = vrot.lane.b32.xlu0 %v4289_v49, %s4142_s20  ;;  %v1025_v3 = vsel %vm361_vm9, %v1022_v0, 0 }
 0x36a   :  { %v1042_v8 = vand.u32 4294901760, %v1025_v3 }
 0x36b   :  { %765 = vmatpush.msrb.mxu1 %v764_v61 }
 0x36c   :  { %v4325_v14 = vsub.f32 %v1025_v3, %v1042_v8 }
 0x36d   :  { %859 = vmatpush.msra.mxu1 %v734_v56 }
 0x36e   :  { %v1070_v18 = vand.u32 4294901760, %v4325_v14 }
 0x370   :  { %v1176_v17 = vpop.permute.xlu1 %1175  ;;  %v1071_v29 = vsub.f32 %v4325_v14, %v1070_v18 }
 0x371   :  { %v1179_v23 = vsel %vm361_vm9, %v1176_v17, 0 }
 0x372   :  { %v1196_v30 = vand.u32 4294901760, %v1179_v23  ;;  %v1072_v37 = vand.u32 4294901760, %v1071_v29 }
 0x374   :  { %v1223_v38 = vsub.f32 %v1179_v23, %v1196_v30 }
 0x376   :  { %v1224_v43 = vand.u32 4294901760, %v1223_v38 }
 0x378   :  { %v1225_v51 = vsub.f32 %v1223_v38, %v1224_v43 }
 0x37a   :  { %v1226_v54 = vand.u32 4294901760, %v1225_v51 }
 0x3bc   :  { %v679_v62 = vpop.xlane.xlu2 %678 }
 0x3bd   :  { %4050 = vrcp.f32 %v679_v62  ;;  %v694_v4 = vand.u32 2147483648, %v679_v62  ;;  %v692_v6 = vand.u32 2147483647, %v679_v62  ;;  %vm688_vm11 = vweird.f32 %v679_v62 }
 0x3bf   :  { %v695_v11 = vor.u32 1.1754944e-38, %v694_v4  ;;  %vm693_vm13 = vcmp.eq.f32.partialorder %v692_v6, 8.507059e+37 }
 0x3c3   :  { %v4051_v63 = vpop.eup %4050 }
 0x3c4   :  { %v684_v1 = vmul.f32 %v4051_v63, %v679_v62  ;;  %vm689_vm10 = vweird.f32 %v4051_v63  ;;  %v1174_v55 = vpop.permute.xlu2 %1173 }
 0x3c5   :  { %vm690_vm12 = vmor %vm688_vm11, %vm689_vm10  ;;  %v1177_v57 = vsel %vm361_vm9, %v1174_v55, 0 }
 0x3c6   :  { %v685_v2 = vsub.f32 1.0, %v684_v1  ;;  %v1198_v58 = vand.u32 4294901760, %v1177_v57 }
 0x3c8   :  { %v686_v5 = vmul.f32 %v4051_v63, %v685_v2  ;;  %v682_v7 = vpop.xlane.xlu0 %681  ;;  %v1199_v60 = vsub.f32 %v1177_v57, %v1198_v58 }
 0x3c9   :  { %4052 = vrcp.f32 %v682_v7  ;;  %v709_v24 = vand.u32 2147483648, %v682_v7  ;;  %v707_v27 = vand.u32 2147483647, %v682_v7  ;;  %vm703_vm15 = vweird.f32 %v682_v7 }
 0x3ca   :  { %v687_v9 = vadd.f32 %v4051_v63, %v686_v5  ;;  %v1200_v62 = vand.u32 4294901760, %v1199_v60 }
 0x3cb   :  { %v710_v32 = vor.u32 1.1754944e-38, %v709_v24  ;;  %vm708_vm2 = vcmp.eq.f32.partialorder %v707_v27, 8.507059e+37 }
 0x3cc   :  { %v691_v12 = vsel %vm690_vm12, %v4051_v63, %v687_v9  ;;  %v1201_v63 = vsub.f32 %v1199_v60, %v1200_v62 }
 0x3cd   :  { %v696_v13 = vsel %vm693_vm13, %v695_v11, %v691_v12 }
 0x3ce   :  { %v697_v15 = vmul.f32 %v4047_v41, %v696_v13  ;;  %v1202_v0 = vand.u32 4294901760, %v1201_v63 }
 0x3cf   :  { %v4053_v16 = vpop.eup %4052 }
 0x3d0   :  { %v699_v19 = vmul.f32 %v4053_v16, %v682_v7  ;;  %v717_v20 = vsel %vm361_vm9, %v697_v15, 0  ;;  %vm704_vm14 = vweird.f32 %v4053_v16 }
 0x3d1   :  { %v736_v21 = vand.u32 4294901760, %v717_v20  ;;  %vm705_vm1 = vmor %vm703_vm15, %vm704_vm14 }
 0x3d2   :  { %v700_v22 = vsub.f32 1.0, %v699_v19 }
 0x3d3   :  { %767 = vmatmul.f32.vlgmr.msrb.gmra.mxu1 %v736_v21  ;;  %v737_v25 = vsub.f32 %v717_v20, %v736_v21 }
 0x3d4   :  { %v701_v26 = vmul.f32 %v4053_v16, %v700_v22  ;;  %963 = vmatpush.msrb.mxu1 %v4308_v47 }
 0x3d5   :  { %791 = vmatmul.f32.vlgmr.msra.gmra.mxu2 %v737_v25  ;;  %v738_v28 = vand.u32 4294901760, %v737_v25 }
 0x3d6   :  { %v702_v31 = vadd.f32 %v4053_v16, %v701_v26  ;;  %989 = vmatpush.msra.mxu2 %v914_v53 }
 0x3d7   :  { %815 = vmatmul.f32.vlgmr.msra.gmra.mxu3 %v738_v28  ;;  %v739_v33 = vsub.f32 %v737_v25, %v738_v28 }
 0x3d8   :  { %v706_v34 = vsel %vm705_vm1, %v4053_v16, %v702_v31  ;;  %1011 = vmatpush.msra.mxu3 %v4308_v47 }
 0x3d9   :  { %v711_v35 = vsel %vm708_vm2, %v710_v32, %v706_v34  ;;  %v740_v36 = vand.u32 4294901760, %v739_v33 }
 0x3da   :  { %v712_v39 = vmul.f32 %v4310_v48, %v711_v35 }
 0x3db   :  { %741 = vmatmul.f32.vlgmr.msrb.gmra.mxu0 %v740_v36  ;;  %861 = vmatmul.f32.vlgmr.msra.gmra.mxu1 %v736_v21  ;;  %v1020_v40 = vpop.permute.xlu0 %1019 }
 0x3dc   :  { %940 = vmatpush.msrb.mxu0 %v4315_v52  ;;  %1073 = vmatpush.xpose.msra.mxu1 %v1072_v37  ;;  %v869_v41 = vsel %vm361_vm9, %v712_v39, 0  ;;  %v1023_v44 = vsel %vm361_vm9, %v1020_v40, 0 }
 0x3dd   :  { %v888_v42 = vand.u32 4294901760, %v869_v41  ;;  %v1044_v46 = vand.u32 4294901760, %v1023_v44 }
 0x3df   :  { %v889_v45 = vsub.f32 %v869_v41, %v888_v42  ;;  %919 = vmatmul.f32.vlgmr.msrb.gmra.mxu3 %v888_v42  ;;  %v1045_v53 = vsub.f32 %v1023_v44, %v1044_v46 }
 0x3e0   :  { %1119 = vmatpush.xpose.msrb.mxu3 %v1042_v8 }
 0x3e1   :  { %v890_v47 = vand.u32 4294901760, %v889_v45  ;;  %v1046_v56 = vand.u32 4294901760, %v1045_v53 }
 0x3e3   :  { %839 = vmatmul.f32.vlgmr.msra.gmra.mxu0 %v736_v21  ;;  %967 = vmatmul.f32.vlgmr.msrb.gmra.mxu1 %v890_v47  ;;  %v891_v48 = vsub.f32 %v889_v45, %v890_v47  ;;  %v1047_v59 = vsub.f32 %v1045_v53, %v1046_v56 }
 0x3e4   :  { %1043 = vmatpush.xpose.msra.mxu0 %v1042_v8  ;;  %1167 = vmatpush.xpose.msrb.mxu1 %v1042_v8 }
 0x3e5   :  { %v892_v52 = vand.u32 4294901760, %v891_v48  ;;  %v1048_v61 = vand.u32 4294901760, %v1047_v59 }
 0x3e7   :  { %893 = vmatmul.f32.vlgmr.msrb.gmra.mxu2 %v892_v52  ;;  %1013 = vmatmul.f32.vlgmr.msra.gmra.mxu3 %v888_v42 }
 0x3e8   :  { %1096 = vmatpush.xpose.msrb.mxu2 %v4325_v14  ;;  %1227 = vmatpush.xpose.msra.mxu3 %v1226_v54 }
 0x3eb   :  { %943 = vmatmul.f32.vlgmr.msrb.gmra.mxu0 %v889_v45  ;;  %1075 = vmatmul.f32.vlgmr.msra.gmra.mxu1 %v1044_v46 }
 0x3ec   :  { %1145 = vmatpush.xpose.msrb.mxu0 %v1070_v18  ;;  %1273 = vmatpush.xpose.msra.mxu1 %v1196_v30 }
 0x3ef   :  { %991 = vmatmul.f32.vlgmr.msra.gmra.mxu2 %v888_v42  ;;  %1123 = vmatmul.f32.vlgmr.msrb.gmra.mxu3 %v1046_v56 }
 0x3f0   :  { %1197 = vmatpush.xpose.msra.mxu2 %v1196_v30  ;;  %1321 = vmatpush.xpose.msrb.mxu3 %v1196_v30 }
 0x3f3   :  { %1049 = vmatmul.f32.vlgmr.msra.gmra.mxu0 %v1048_v61  ;;  %1169 = vmatmul.f32.vlgmr.msrb.gmra.mxu1 %v1044_v46 }
 0x3f4   :  { %1250 = vmatpush.xpose.msra.mxu0 %v1223_v38 }
 0x3f7   :  { %1099 = vmatmul.f32.vlgmr.msrb.gmra.mxu2 %v1045_v53  ;;  %1229 = vmatmul.f32.vlgmr.msra.gmra.mxu3 %v1198_v58 }
 0x3f8   :  { %1299 = vmatpush.xpose.msrb.mxu2 %v1224_v43 }
 0x3fb   :  { %1147 = vmatmul.f32.vlgmr.msrb.gmra.mxu0 %v1044_v46  ;;  %1277 = vmatmul.f32.vlgmr.msra.gmra.mxu1 %v1200_v62 }
 0x3ff   :  { %1203 = vmatmul.f32.vlgmr.msra.gmra.mxu2 %v1202_v0  ;;  %1323 = vmatmul.f32.vlgmr.msrb.gmra.mxu3 %v1198_v58 }
 0x403   :  { %1253 = vmatmul.f32.vlgmr.msra.gmra.mxu0 %v1199_v60 }
 0x407   :  { %1301 = vmatmul.f32.vlgmr.msrb.gmra.mxu2 %v1198_v58 }
 0x450   :  { %v768_v1 = vpop.f32.mrf.mxu1 }
 0x458   :  { %v742_v2 = vpop.f32.mrf.mxu0  ;;  %v792_v4 = vpop.f32.mrf.mxu2 }
 0x459   :  { %v769_v3 = vadd.f32 %v768_v1, %v742_v2  ;;  %v862_v8 = vpop.f32.mrf.mxu1 }
 0x45a   :  { %v816_v5 = vpop.f32.mrf.mxu3 }
 0x45b   :  { %v793_v6 = vadd.f32 %v792_v4, %v769_v3 }
 0x45d   :  { %v817_v7 = vadd.f32 %v816_v5, %v793_v6 }
 0x460   :  { %v840_v9 = vpop.f32.mrf.mxu0 }
 0x461   :  { %v841_v11 = vadd.f32 %v840_v9, %v817_v7  ;;  %v968_v15 = vpop.f32.mrf.mxu1 }
 0x462   :  { %v920_v13 = vpop.f32.mrf.mxu3 }
 0x463   :  { %v863_v12 = vadd.f32 %v862_v8, %v841_v11 }
 0x465   :  { %1017 = vst.msk [vmem:[#allocation4] sm:$0xff] %vm361_vm9, %v863_v12 }
 0x468   :  { %v944_v14 = vpop.f32.mrf.mxu0 }
 0x469   :  { %v1076_v24 = vpop.f32.mrf.mxu1 }
 0x46a   :  { %v894_v16 = vpop.f32.mrf.mxu2  ;;  %v1014_v20 = vpop.f32.mrf.mxu3 }
 0x46b   :  { %v921_v17 = vadd.f32 %v920_v13, %v894_v16 }
 0x46d   :  { %v945_v19 = vadd.f32 %v944_v14, %v921_v17 }
 0x46f   :  { %v969_v18 = vadd.f32 %v968_v15, %v945_v19 }
 0x470   :  { %v1050_v21 = vpop.f32.mrf.mxu0 }
 0x471   :  { %v1077_v27 = vadd.f32 %v1076_v24, %v1050_v21  ;;  %v1170_v32 = vpop.f32.mrf.mxu1 }
 0x472   :  { %v992_v22 = vpop.f32.mrf.mxu2  ;;  %v1124_v26 = vpop.f32.mrf.mxu3 }
 0x473   :  { %v993_v23 = vadd.f32 %v992_v22, %v969_v18 }
 0x475   :  { %v1015_v25 = vadd.f32 %v1014_v20, %v993_v23 }
 0x477   :  { %1018 = vst.msk [vmem:[#allocation4 + $0x8] sm:$0xff] %vm361_vm9, %v1015_v25 }
 0x478   :  { %v1148_v28 = vpop.f32.mrf.mxu0 }
 0x479   :  { %v1278_v41 = vpop.f32.mrf.mxu1 }
 0x47a   :  { %v1100_v29 = vpop.f32.mrf.mxu2  ;;  %v1230_v35 = vpop.f32.mrf.mxu3 }
 0x47b   :  { %v1101_v30 = vadd.f32 %v1100_v29, %v1077_v27 }
 0x47d   :  { %v1125_v31 = vadd.f32 %v1124_v26, %v1101_v30 }
 0x47f   :  { %v1149_v33 = vadd.f32 %v1148_v28, %v1125_v31 }
 0x480   :  { %v1254_v39 = vpop.f32.mrf.mxu0 }
 0x481   :  { %v1171_v34 = vadd.f32 %v1170_v32, %v1149_v33 }
 0x482   :  { %v1204_v36 = vpop.f32.mrf.mxu2  ;;  %v1324_v45 = vpop.f32.mrf.mxu3 }
 0x483   :  { %v1231_v37 = vadd.f32 %v1230_v35, %v1204_v36  ;;  %v1327_v38 = vsel %vm361_vm9, %v1171_v34, -inf }
 0x484   :  { %1328 = vmax.xlane.f32.xlu0 %v1327_v38 }
 0x485   :  { %v1255_v40 = vadd.f32 %v1254_v39, %v1231_v37 }
 0x487   :  { %v1279_v42 = vadd.f32 %v1278_v41, %v1255_v40 }
 0x48a   :  { %v1302_v43 = vpop.f32.mrf.mxu2 }
 0x48b   :  { %v1303_v44 = vadd.f32 %v1302_v43, %v1279_v42 }
 0x48d   :  { %v1325_v46 = vadd.f32 %v1324_v45, %v1303_v44 }
 0x48f   :  { %v1330_v47 = vsel %vm361_vm9, %v1325_v46, -inf }
 0x490   :  { %1331 = vmax.xlane.f32.xlu1 %v1330_v47 }
 0x498   :  { %1527 = vrot.lane.b32.xlu0 %v4292_v50, %s4143_s21 }
 0x4a9   :  { %1375 = vrot.lane.b32.xlu1 %v4289_v49, %s4143_s21 }
 0x4b1   :  { %1846 = vrot.lane.b32.xlu1 %v4292_v50, %s4144_s22 }
 0x4f7   :  { %v1329_v51 = vpop.xlane.xlu0 %1328 }
 0x4f8   :  { %v1333_v48 = vsub.f32 %v1171_v34, %v1329_v51 }
 0x4fa   :  { %v1335_v53 = vmul.f32 1.442695, %v1333_v48 }
 0x4fc   :  { %4054 = vpow2.f32 %v1335_v53 }
 0x502   :  { %v4055_v52 = vpop.eup %4054 }
 0x503   :  { %v1332_v54 = vpop.xlane.xlu1 %1331  ;;  %v1339_v55 = vsel %vm361_vm9, %v4055_v52, 0.0 }
 0x504   :  { %v1334_v56 = vsub.f32 %v1325_v46, %v1332_v54  ;;  %1340 = vadd.xlane.f32.xlu2 %v1339_v55 }
 0x506   :  { %v1337_v57 = vmul.f32 1.442695, %v1334_v56 }
 0x508   :  { %4056 = vpow2.f32 %v1337_v57 }
 0x50a   :  { %v1528_v58 = vpop.permute.xlu0 %1527 }
 0x50b   :  { %v4349_v59 = vand.u32 4294901760, %v1528_v58 }
 0x50d   :  { %v4356_v62 = vsub.f32 %v1528_v58, %v4349_v59 }
 0x50e   :  { %v4351_v60 = vpop.eup %4056 }
 0x50f   :  { %v1342_v61 = vsel %vm361_vm9, %v4351_v60, 0.0  ;;  %v1576_v63 = vand.u32 4294901760, %v4356_v62 }
 0x510   :  { %1343 = vadd.xlane.f32.xlu0 %v1342_v61 }
 0x511   :  { %v1577_v0 = vsub.f32 %v4356_v62, %v1576_v63 }
 0x513   :  { %v1578_v3 = vand.u32 4294901760, %v1577_v0 }
 0x51b   :  { %v1376_v1 = vpop.permute.xlu1 %1375 }
 0x51c   :  { %v1396_v2 = vand.u32 4294901760, %v1376_v1  ;;  %1692 = vrot.lane.b32.xlu2 %v4289_v49, %s4144_s22 }
 0x51e   :  { %v1423_v4 = vsub.f32 %v1376_v1, %v1396_v2  ;;  %1397 = vmatpush.msrb.mxu0 %v1396_v2  ;;  %1473 = vmatpush.msra.mxu3 %v1396_v2 }
 0x520   :  { %1579 = vmatpush.msrb.mxu3 %v1578_v3  ;;  %v1424_v5 = vand.u32 4294901760, %v1423_v4  ;;  %1450 = vmatpush.msra.mxu2 %v1423_v4 }
 0x522   :  { %1549 = vmatpush.msrb.mxu2 %v4349_v59  ;;  %v1425_v6 = vsub.f32 %v1423_v4, %v1424_v5  ;;  %1499 = vmatpush.msra.mxu0 %v1424_v5 }
 0x523   :  { %v1847_v27 = vpop.permute.xlu1 %1846 }
 0x524   :  { %v1426_v7 = vand.u32 4294901760, %v1425_v6  ;;  %1690 = vrot.lane.b32.xlu0 %v4289_v49, %s4145_s23  ;;  %v1850_v33 = vsel %vm361_vm9, %v1847_v27, 0 }
 0x525   :  { %v1867_v39 = vand.u32 4294901760, %v1850_v33 }
 0x526   :  { %1427 = vmatpush.msrb.mxu1 %v1426_v7 }
 0x527   :  { %v1894_v47 = vsub.f32 %v1850_v33, %v1867_v39 }
 0x528   :  { %1521 = vmatpush.msra.mxu1 %v1396_v2 }
 0x529   :  { %v1895_v55 = vand.u32 4294901760, %v1894_v47 }
 0x52b   :  { %v1896_v61 = vsub.f32 %v1894_v47, %v1895_v55 }
 0x52c   :  { %1844 = vrot.lane.b32.xlu0 %v4292_v50, %s4145_s23  ;;  %s4153_s23 = smov [#allocation6]  }
 0x52d   :  { %v1897_v0 = vand.u32 4294901760, %v1896_v61 }
 0x577   :  { %v1341_v8 = vpop.xlane.xlu2 %1340 }
 0x578   :  { %4058 = vrcp.f32 %v1341_v8  ;;  %v1356_v14 = vand.u32 2147483648, %v1341_v8  ;;  %v1354_v17 = vand.u32 2147483647, %v1341_v8  ;;  %vm1350_vm4 = vweird.f32 %v1341_v8 }
 0x57a   :  { %v1357_v18 = vor.u32 1.1754944e-38, %v1356_v14  ;;  %vm1355_vm6 = vcmp.eq.f32.partialorder %v1354_v17, 8.507059e+37 }
 0x57e   :  { %v4059_v9 = vpop.eup %4058 }
 0x57f   :  { %v1346_v11 = vmul.f32 %v4059_v9, %v1341_v8  ;;  %v1693_v12 = vpop.permute.xlu2 %1692  ;;  %vm1351_vm3 = vweird.f32 %v4059_v9 }
 0x580   :  { %v1696_v15 = vsel %vm361_vm9, %v1693_v12, 0  ;;  %vm1352_vm5 = vmor %vm1350_vm4, %vm1351_vm3 }
 0x581   :  { %v1347_v13 = vsub.f32 1.0, %v1346_v11  ;;  %v1713_v21 = vand.u32 4294901760, %v1696_v15 }
 0x583   :  { %v1348_v16 = vmul.f32 %v4059_v9, %v1347_v13  ;;  %v1344_v19 = vpop.xlane.xlu0 %1343  ;;  %v4367_v24 = vsub.f32 %v1696_v15, %v1713_v21 }
 0x584   :  { %4060 = vrcp.f32 %v1344_v19  ;;  %v1371_v34 = vand.u32 2147483648, %v1344_v19  ;;  %v1369_v37 = vand.u32 2147483647, %v1344_v19  ;;  %vm1365_vm8 = vweird.f32 %v1344_v19 }
 0x585   :  { %v1349_v20 = vadd.f32 %v4059_v9, %v1348_v16  ;;  %v1741_v31 = vand.u32 4294901760, %v4367_v24 }
 0x586   :  { %v1372_v42 = vor.u32 1.1754944e-38, %v1371_v34  ;;  %vm1370_vm11 = vcmp.eq.f32.partialorder %v1369_v37, 8.507059e+37 }
 0x587   :  { %v1353_v22 = vsel %vm1352_vm5, %v4059_v9, %v1349_v20  ;;  %v1742_v40 = vsub.f32 %v4367_v24, %v1741_v31  ;;  %vm1683_vm5 = vcmask 130112  }
 0x588   :  { %v1358_v23 = vsel %vm1355_vm6, %v1357_v18, %v1353_v22 }
 0x589   :  { %v1359_v25 = vmul.f32 %v4055_v52, %v1358_v23  ;;  %v1743_v51 = vand.u32 4294901760, %v1742_v40 }
 0x58a   :  { %v4061_v26 = vpop.eup %4060 }
 0x58b   :  { %v1361_v28 = vmul.f32 %v4061_v26, %v1344_v19  ;;  %v1379_v29 = vsel %vm361_vm9, %v1359_v25, 0  ;;  %vm1366_vm7 = vweird.f32 %v4061_v26 }
 0x58c   :  { %v1398_v30 = vand.u32 4294901760, %v1379_v29  ;;  %vm1367_vm10 = vmor %vm1365_vm8, %vm1366_vm7 }
 0x58d   :  { %v1362_v32 = vsub.f32 1.0, %v1361_v28 }
 0x58e   :  { %1429 = vmatmul.f32.vlgmr.msrb.gmra.mxu1 %v1398_v30  ;;  %v1399_v35 = vsub.f32 %v1379_v29, %v1398_v30 }
 0x58f   :  { %v1363_v36 = vmul.f32 %v4061_v26, %v1362_v32  ;;  %1625 = vmatpush.msrb.mxu1 %v4349_v59 }
 0x590   :  { %1453 = vmatmul.f32.vlgmr.msra.gmra.mxu2 %v1399_v35  ;;  %v1400_v38 = vand.u32 4294901760, %v1399_v35 }
 0x591   :  { %v1364_v41 = vadd.f32 %v4061_v26, %v1363_v36  ;;  %1651 = vmatpush.msra.mxu2 %v1576_v63 }
 0x592   :  { %1477 = vmatmul.f32.vlgmr.msra.gmra.mxu3 %v1400_v38  ;;  %v1401_v43 = vsub.f32 %v1399_v35, %v1400_v38 }
 0x593   :  { %v1368_v44 = vsel %vm1367_vm10, %v4061_v26, %v1364_v41  ;;  %1673 = vmatpush.msra.mxu3 %v4349_v59 }
 0x594   :  { %v1373_v45 = vsel %vm1370_vm11, %v1372_v42, %v1368_v44  ;;  %v1402_v46 = vand.u32 4294901760, %v1401_v43 }
 0x595   :  { %v1374_v48 = vmul.f32 %v4351_v60, %v1373_v45 }
 0x596   :  { %1403 = vmatmul.f32.vlgmr.msrb.gmra.mxu0 %v1402_v46  ;;  %1523 = vmatmul.f32.vlgmr.msra.gmra.mxu1 %v1398_v30  ;;  %v1691_v53 = vpop.permute.xlu0 %1690 }
 0x597   :  { %1602 = vmatpush.msrb.mxu0 %v4356_v62  ;;  %1744 = vmatpush.xpose.msra.mxu1 %v1743_v51  ;;  %v1531_v52 = vsel %vm361_vm9, %v1374_v48, 0  ;;  %v1694_v56 = vsel %vm361_vm9, %v1691_v53, 0 }
 0x598   :  { %v1550_v54 = vand.u32 4294901760, %v1531_v52  ;;  %v1715_v58 = vand.u32 4294901760, %v1694_v56 }
 0x59a   :  { %v1551_v57 = vsub.f32 %v1531_v52, %v1550_v54  ;;  %1581 = vmatmul.f32.vlgmr.msrb.gmra.mxu3 %v1550_v54  ;;  %v1716_v63 = vsub.f32 %v1694_v56, %v1715_v58 }
 0x59b   :  { %1790 = vmatpush.xpose.msrb.mxu3 %v1713_v21 }
 0x59c   :  { %v1552_v59 = vand.u32 4294901760, %v1551_v57  ;;  %v1717_v2 = vand.u32 4294901760, %v1716_v63 }
 0x59e   :  { %1501 = vmatmul.f32.vlgmr.msra.gmra.mxu0 %v1398_v30  ;;  %1629 = vmatmul.f32.vlgmr.msrb.gmra.mxu1 %v1552_v59  ;;  %v1553_v60 = vsub.f32 %v1551_v57, %v1552_v59  ;;  %v1845_v1 = vpop.permute.xlu0 %1844  ;;  %v1718_v4 = vsub.f32 %v1716_v63, %v1717_v2 }
 0x59f   :  { %1714 = vmatpush.xpose.msra.mxu0 %v1713_v21  ;;  %1838 = vmatpush.xpose.msrb.mxu1 %v1713_v21  ;;  %v1848_v3 = vsel %vm361_vm9, %v1845_v1, 0 }
 0x5a0   :  { %v1554_v62 = vand.u32 4294901760, %v1553_v60  ;;  %v1869_v5 = vand.u32 4294901760, %v1848_v3  ;;  %v1719_v6 = vand.u32 4294901760, %v1718_v4 }
 0x5a2   :  { %1555 = vmatmul.f32.vlgmr.msrb.gmra.mxu2 %v1554_v62  ;;  %1675 = vmatmul.f32.vlgmr.msra.gmra.mxu3 %v1550_v54  ;;  %v1870_v7 = vsub.f32 %v1848_v3, %v1869_v5 }
 0x5a3   :  { %1767 = vmatpush.xpose.msrb.mxu2 %v4367_v24  ;;  %1898 = vmatpush.xpose.msra.mxu3 %v1897_v0 }
 0x5a4   :  { %v1871_v8 = vand.u32 4294901760, %v1870_v7 }
 0x5a6   :  { %1605 = vmatmul.f32.vlgmr.msrb.gmra.mxu0 %v1551_v57  ;;  %1746 = vmatmul.f32.vlgmr.msra.gmra.mxu1 %v1715_v58  ;;  %v1872_v9 = vsub.f32 %v1870_v7, %v1871_v8 }
 0x5a7   :  { %1816 = vmatpush.xpose.msrb.mxu0 %v1741_v31  ;;  %1944 = vmatpush.xpose.msra.mxu1 %v1867_v39 }
 0x5a8   :  { %v1873_v11 = vand.u32 4294901760, %v1872_v9 }
 0x5aa   :  { %1653 = vmatmul.f32.vlgmr.msra.gmra.mxu2 %v1550_v54  ;;  %1794 = vmatmul.f32.vlgmr.msrb.gmra.mxu3 %v1717_v2 }
 0x5ab   :  { %1868 = vmatpush.xpose.msra.mxu2 %v1867_v39  ;;  %1992 = vmatpush.xpose.msrb.mxu3 %v1867_v39 }
 0x5ae   :  { %1720 = vmatmul.f32.vlgmr.msra.gmra.mxu0 %v1719_v6  ;;  %1840 = vmatmul.f32.vlgmr.msrb.gmra.mxu1 %v1715_v58  ;;  %v4398_v6 = vld [vmem:[#allocation3] sm:$0xff] }
 0x5af   :  { %1921 = vmatpush.xpose.msra.mxu0 %v1894_v47 }
 0x5b2   :  { %1770 = vmatmul.f32.vlgmr.msrb.gmra.mxu2 %v1716_v63  ;;  %1900 = vmatmul.f32.vlgmr.msra.gmra.mxu3 %v1869_v5 }
 0x5b3   :  { %1970 = vmatpush.xpose.msrb.mxu2 %v1895_v55 }
 0x5b6   :  { %1818 = vmatmul.f32.vlgmr.msrb.gmra.mxu0 %v1715_v58  ;;  %1948 = vmatmul.f32.vlgmr.msra.gmra.mxu1 %v1871_v8 }
 0x5ba   :  { %1874 = vmatmul.f32.vlgmr.msra.gmra.mxu2 %v1873_v11  ;;  %1994 = vmatmul.f32.vlgmr.msrb.gmra.mxu3 %v1869_v5 }
 0x5be   :  { %1924 = vmatmul.f32.vlgmr.msra.gmra.mxu0 %v1870_v7  ;;  %v4401_v7 = vld [vmem:[#allocation3 + $0x8] sm:$0xff] }
 0x5c2   :  { %1972 = vmatmul.f32.vlgmr.msrb.gmra.mxu2 %v1869_v5 }
 0x60b   :  { %v1430_v12 = vpop.f32.mrf.mxu1 }
 0x613   :  { %v1404_v13 = vpop.f32.mrf.mxu0  ;;  %v1454_v15 = vpop.f32.mrf.mxu2 }
 0x614   :  { %v1431_v14 = vadd.f32 %v1430_v12, %v1404_v13  ;;  %v1524_v20 = vpop.f32.mrf.mxu1 }
 0x615   :  { %v1478_v16 = vpop.f32.mrf.mxu3 }
 0x616   :  { %v1455_v17 = vadd.f32 %v1454_v15, %v1431_v14 }
 0x618   :  { %v1479_v19 = vadd.f32 %v1478_v16, %v1455_v17 }
 0x61b   :  { %v1502_v21 = vpop.f32.mrf.mxu0 }
 0x61c   :  { %v1503_v18 = vadd.f32 %v1502_v21, %v1479_v19  ;;  %v1630_v25 = vpop.f32.mrf.mxu1 }
 0x61d   :  { %v1582_v23 = vpop.f32.mrf.mxu3 }
 0x61e   :  { %v4383_v22 = vadd.f32 %v1524_v20, %v1503_v18 }
 0x623   :  { %v1606_v24 = vpop.f32.mrf.mxu0 }
 0x624   :  { %v1747_v34 = vpop.f32.mrf.mxu1 }
 0x625   :  { %v1556_v26 = vpop.f32.mrf.mxu2  ;;  %v1676_v29 = vpop.f32.mrf.mxu3 }
 0x626   :  { %v1583_v27 = vadd.f32 %v1582_v23, %v1556_v26 }
 0x628   :  { %v1607_v28 = vadd.f32 %v1606_v24, %v1583_v27 }
 0x62a   :  { %v1631_v30 = vadd.f32 %v1630_v25, %v1607_v28 }
 0x62b   :  { %v1721_v31 = vpop.f32.mrf.mxu0 }
 0x62c   :  { %v1748_v37 = vadd.f32 %v1747_v34, %v1721_v31  ;;  %v1841_v42 = vpop.f32.mrf.mxu1 }
 0x62d   :  { %v1654_v32 = vpop.f32.mrf.mxu2  ;;  %v1795_v36 = vpop.f32.mrf.mxu3 }
 0x62e   :  { %v1655_v33 = vadd.f32 %v1654_v32, %v1631_v30 }
 0x630   :  { %v4385_v35 = vadd.f32 %v1676_v29, %v1655_v33 }
 0x633   :  { %v1819_v38 = vpop.f32.mrf.mxu0 }
 0x634   :  { %v1949_v52 = vpop.f32.mrf.mxu1 }
 0x635   :  { %v1771_v39 = vpop.f32.mrf.mxu2  ;;  %v1901_v45 = vpop.f32.mrf.mxu3 }
 0x636   :  { %v1772_v40 = vadd.f32 %v1771_v39, %v1748_v37 }
 0x638   :  { %v1796_v41 = vadd.f32 %v1795_v36, %v1772_v40 }
 0x63a   :  { %v1820_v43 = vadd.f32 %v1819_v38, %v1796_v41 }
 0x63b   :  { %v1925_v48 = vpop.f32.mrf.mxu0 }
 0x63c   :  { %v1842_v44 = vadd.f32 %v1841_v42, %v1820_v43 }
 0x63d   :  { %v1875_v46 = vpop.f32.mrf.mxu2  ;;  %v1995_v57 = vpop.f32.mrf.mxu3 }
 0x63e   :  { %v1902_v47 = vadd.f32 %v1901_v45, %v1875_v46  ;;  %v1998_v51 = vsel %vm361_vm9, %v1842_v44, -inf }
 0x63f   :  { %1999 = vmax.xlane.f32.xlu1 %v1998_v51 }
 0x640   :  { %v1926_v53 = vadd.f32 %v1925_v48, %v1902_v47 }
 0x642   :  { %v1950_v54 = vadd.f32 %v1949_v52, %v1926_v53 }
 0x645   :  { %v1973_v55 = vpop.f32.mrf.mxu2 }
 0x646   :  { %v1974_v56 = vadd.f32 %v1973_v55, %v1950_v54 }
 0x648   :  { %v1996_v58 = vadd.f32 %v1995_v57, %v1974_v56 }
 0x64a   :  { %v2001_v59 = vsel %vm361_vm9, %v1996_v58, -inf }
 0x64b   :  { %2002 = vmax.xlane.f32.xlu0 %v2001_v59 }
 0x65f   :  { %2198 = vrot.lane.b32.xlu0 %v4292_v50, %s4146_s24 }
 0x667   :  { %2361 = vrot.lane.b32.xlu0 %v4289_v49, %s4147_s25 }
 0x6b2   :  { %v2000_v61 = vpop.xlane.xlu1 %1999 }
 0x6b3   :  { %v2004_v60 = vsub.f32 %v1842_v44, %v2000_v61 }
 0x6b5   :  { %v2006_v63 = vmul.f32 1.442695, %v2004_v60 }
 0x6b7   :  { %4062 = vpow2.f32 %v2006_v63 }
 0x6bd   :  { %v4063_v62 = vpop.eup %4062 }
 0x6be   :  { %v2003_v0 = vpop.xlane.xlu0 %2002  ;;  %v2010_v1 = vsel %vm361_vm9, %v4063_v62, 0.0 }
 0x6bf   :  { %v2005_v2 = vsub.f32 %v1996_v58, %v2003_v0  ;;  %2011 = vadd.xlane.f32.xlu2 %v2010_v1 }
 0x6c1   :  { %v2008_v3 = vmul.f32 1.442695, %v2005_v2 }
 0x6c3   :  { %4064 = vpow2.f32 %v2008_v3 }
 0x6c9   :  { %v4392_v4 = vpop.eup %4064 }
 0x6ca   :  { %v2013_v5 = vsel %vm361_vm9, %v4392_v4, 0.0 }
 0x6cb   :  { %2014 = vadd.xlane.f32.xlu1 %v2013_v5 }
 0x6d1   :  { %v2199_v8 = vpop.permute.xlu0 %2198 }
 0x6d2   :  { %v4404_v9 = vand.u32 4294901760, %v2199_v8 }
 0x6d4   :  { %v4407_v11 = vsub.f32 %v2199_v8, %v4404_v9 }
 0x6d7   :  { %2046 = vrot.lane.b32.xlu2 %v4289_v49, %s4146_s24  ;;  %v2247_v49 = vand.u32 4294901760, %v4407_v11  ;;  %s4154_s24 = smov 128  }
 0x6d9   :  { %v2362_v57 = vpop.permute.xlu0 %2361 }
 0x6da   :  { %v2365_v61 = vsel %vm361_vm9, %v2362_v57, 0 }
 0x6db   :  { %v2386_v0 = vand.u32 4294901760, %v2365_v61 }
 0x6df   :  { %2517 = vrot.lane.b32.xlu2 %v4292_v50, %s4148_s26  ;;  %v2248_v50 = vsub.f32 %v4407_v11, %v2247_v49 }
 0x6e1   :  { %v2249_v17 = vand.u32 4294901760, %v2248_v50 }
 0x6e4   :  { %2363 = vrot.lane.b32.xlu1 %v4398_v6, %s4148_s26 }
 0x6ec   :  { %2515 = vrot.lane.b32.xlu1 %v4401_v7, %s4147_s25 }
 0x732   :  { %v2012_v12 = vpop.xlane.xlu2 %2011 }
 0x733   :  { %4066 = vrcp.f32 %v2012_v12  ;;  %v2027_v20 = vand.u32 2147483648, %v2012_v12  ;;  %v2025_v23 = vand.u32 2147483647, %v2012_v12  ;;  %vm2021_vm13 = vweird.f32 %v2012_v12 }
 0x735   :  { %v2028_v27 = vor.u32 1.1754944e-38, %v2027_v20  ;;  %vm2026_vm15 = vcmp.eq.f32.partialorder %v2025_v23, 8.507059e+37 }
 0x739   :  { %v4067_v13 = vpop.eup %4066 }
 0x73a   :  { %v2017_v14 = vmul.f32 %v4067_v13, %v2012_v12  ;;  %v2047_v15 = vpop.permute.xlu2 %2046  ;;  %vm2022_vm12 = vweird.f32 %v4067_v13 }
 0x73b   :  { %v2067_v16 = vand.u32 4294901760, %v2047_v15  ;;  %vm2023_vm14 = vmor %vm2021_vm13, %vm2022_vm12 }
 0x73c   :  { %v2018_v19 = vsub.f32 1.0, %v2017_v14 }
 0x73d   :  { %v2094_v21 = vsub.f32 %v2047_v15, %v2067_v16  ;;  %2068 = vmatpush.msrb.mxu0 %v2067_v16  ;;  %2144 = vmatpush.msra.mxu3 %v2067_v16 }
 0x73e   :  { %v2019_v18 = vmul.f32 %v4067_v13, %v2018_v19  ;;  %v2015_v24 = vpop.xlane.xlu1 %2014 }
 0x73f   :  { %2250 = vmatpush.msrb.mxu3 %v2249_v17  ;;  %v2095_v25 = vand.u32 4294901760, %v2094_v21  ;;  %4068 = vrcp.f32 %v2015_v24  ;;  %2121 = vmatpush.msra.mxu2 %v2094_v21  ;;  %v2042_v40 = vand.u32 2147483648, %v2015_v24  ;;  %v2040_v44 = vand.u32 2147483647, %v2015_v24 }
 0x740   :  { %v2020_v26 = vadd.f32 %v4067_v13, %v2019_v18  ;;  %vm2036_vm2 = vweird.f32 %v2015_v24 }
 0x741   :  { %2220 = vmatpush.msrb.mxu2 %v4404_v9  ;;  %v2096_v28 = vsub.f32 %v2094_v21, %v2095_v25  ;;  %2170 = vmatpush.msra.mxu0 %v2095_v25  ;;  %v2043_v51 = vor.u32 1.1754944e-38, %v2042_v40  ;;  %vm2041_vm4 = vcmp.eq.f32.partialorder %v2040_v44, 8.507059e+37 }
 0x742   :  { %v2024_v29 = vsel %vm2023_vm14, %v4067_v13, %v2020_v26  ;;  %v2518_v36 = vpop.permute.xlu2 %2517 }
 0x743   :  { %v2029_v30 = vsel %vm2026_vm15, %v2028_v27, %v2024_v29  ;;  %v2097_v31 = vand.u32 4294901760, %v2096_v28  ;;  %v2521_v41 = vsel %vm361_vm9, %v2518_v36, 0  ;;  %vm2354_vm15 = vcmask 195712  }
 0x744   :  { %v2030_v32 = vmul.f32 %v4063_v62, %v2029_v30  ;;  %v2538_v47 = vand.u32 4294901760, %v2521_v41 }
 0x745   :  { %v4069_v33 = vpop.eup %4068  ;;  %2098 = vmatpush.msrb.mxu1 %v2097_v31 }
 0x746   :  { %v2032_v34 = vmul.f32 %v4069_v33, %v2015_v24  ;;  %v2050_v37 = vsel %vm361_vm9, %v2030_v32, 0  ;;  %vm2037_vm1 = vweird.f32 %v4069_v33  ;;  %v2565_v55 = vsub.f32 %v2521_v41, %v2538_v47 }
 0x747   :  { %2192 = vmatpush.msra.mxu1 %v2067_v16  ;;  %v2069_v38 = vand.u32 4294901760, %v2050_v37  ;;  %vm2038_vm3 = vmor %vm2036_vm2, %vm2037_vm1  ;;  %vm3033_vm1 = vcmask 254976  }
 0x748   :  { %v2033_v39 = vsub.f32 1.0, %v2032_v34  ;;  %v2566_v60 = vand.u32 4294901760, %v2565_v55 }
 0x749   :  { %2100 = vmatmul.f32.vlgmr.msrb.gmra.mxu1 %v2069_v38  ;;  %v2070_v42 = vsub.f32 %v2050_v37, %v2069_v38 }
 0x74a   :  { %v2034_v43 = vmul.f32 %v4069_v33, %v2033_v39  ;;  %2296 = vmatpush.msrb.mxu1 %v4404_v9  ;;  %v2567_v3 = vsub.f32 %v2565_v55, %v2566_v60 }
 0x74b   :  { %2124 = vmatmul.f32.vlgmr.msra.gmra.mxu2 %v2070_v42  ;;  %v2071_v45 = vand.u32 4294901760, %v2070_v42 }
 0x74c   :  { %v2035_v46 = vadd.f32 %v4069_v33, %v2034_v43  ;;  %2322 = vmatpush.msra.mxu2 %v2247_v49  ;;  %v2568_v12 = vand.u32 4294901760, %v2567_v3 }
 0x74d   :  { %2148 = vmatmul.f32.vlgmr.msra.gmra.mxu3 %v2071_v45  ;;  %v2072_v48 = vsub.f32 %v2070_v42, %v2071_v45 }
 0x74e   :  { %v2039_v53 = vsel %vm2038_vm3, %v4069_v33, %v2035_v46  ;;  %2344 = vmatpush.msra.mxu3 %v4404_v9  ;;  %v2387_v9 = vsub.f32 %v2365_v61, %v2386_v0 }
 0x74f   :  { %v2044_v52 = vsel %vm2041_vm4, %v2043_v51, %v2039_v53  ;;  %v2073_v54 = vand.u32 4294901760, %v2072_v48 }
 0x750   :  { %v2045_v56 = vmul.f32 %v4392_v4, %v2044_v52  ;;  %v2388_v14 = vand.u32 4294901760, %v2387_v9 }
 0x751   :  { %2074 = vmatmul.f32.vlgmr.msrb.gmra.mxu0 %v2073_v54  ;;  %2194 = vmatmul.f32.vlgmr.msra.gmra.mxu1 %v2069_v38 }
 0x752   :  { %2273 = vmatpush.msrb.mxu0 %v4407_v11  ;;  %v2202_v58 = vsel %vm361_vm9, %v2045_v56, 0  ;;  %v2389_v17 = vsub.f32 %v2387_v9, %v2388_v14 }
 0x753   :  { %v2221_v59 = vand.u32 4294901760, %v2202_v58 }
 0x754   :  { %v2390_v20 = vand.u32 4294901760, %v2389_v17 }
 0x755   :  { %v2222_v63 = vsub.f32 %v2202_v58, %v2221_v59  ;;  %2252 = vmatmul.f32.vlgmr.msrb.gmra.mxu3 %v2221_v59 }
 0x756   :  { %v2364_v62 = vpop.permute.xlu1 %2363 }
 0x757   :  { %v2367_v1 = vsel %vm361_vm9, %v2364_v62, 0  ;;  %v2223_v2 = vand.u32 4294901760, %v2222_v63 }
 0x758   :  { %v2384_v4 = vand.u32 4294901760, %v2367_v1 }
 0x759   :  { %2172 = vmatmul.f32.vlgmr.msra.gmra.mxu0 %v2069_v38  ;;  %2300 = vmatmul.f32.vlgmr.msrb.gmra.mxu1 %v2223_v2  ;;  %v2224_v5 = vsub.f32 %v2222_v63, %v2223_v2 }
 0x75a   :  { %v2411_v8 = vsub.f32 %v2367_v1, %v2384_v4  ;;  %2385 = vmatpush.xpose.msra.mxu0 %v2384_v4  ;;  %2461 = vmatpush.xpose.msrb.mxu3 %v2384_v4 }
 0x75b   :  { %v2225_v11 = vand.u32 4294901760, %v2224_v5 }
 0x75c   :  { %v2412_v49 = vand.u32 4294901760, %v2411_v8 }
 0x75d   :  { %2226 = vmatmul.f32.vlgmr.msrb.gmra.mxu2 %v2225_v11  ;;  %2346 = vmatmul.f32.vlgmr.msra.gmra.mxu3 %v2221_v59 }
 0x75e   :  { %v2413_v50 = vsub.f32 %v2411_v8, %v2412_v49  ;;  %2438 = vmatpush.xpose.msrb.mxu2 %v2411_v8  ;;  %2569 = vmatpush.xpose.msra.mxu3 %v2568_v12  ;;  %v2516_v13 = vpop.permute.xlu1 %2515 }
 0x75f   :  { %v2519_v16 = vsel %vm361_vm9, %v2516_v13, 0 }
 0x760   :  { %v2414_v15 = vand.u32 4294901760, %v2413_v50  ;;  %v2540_v19 = vand.u32 4294901760, %v2519_v16 }
 0x761   :  { %2276 = vmatmul.f32.vlgmr.msrb.gmra.mxu0 %v2222_v63 }
 0x762   :  { %2487 = vmatpush.xpose.msrb.mxu0 %v2412_v49  ;;  %2415 = vmatpush.xpose.msra.mxu1 %v2414_v15  ;;  %v2541_v21 = vsub.f32 %v2519_v16, %v2540_v19 }
 0x764   :  { %v2542_v18 = vand.u32 4294901760, %v2541_v21 }
 0x765   :  { %2324 = vmatmul.f32.vlgmr.msra.gmra.mxu2 %v2221_v59  ;;  %2417 = vmatmul.f32.vlgmr.msra.gmra.mxu1 %v2386_v0 }
 0x766   :  { %2509 = vmatpush.xpose.msrb.mxu1 %v2384_v4  ;;  %2465 = vmatmul.f32.vlgmr.msrb.gmra.mxu3 %v2388_v14  ;;  %v2543_v23 = vsub.f32 %v2541_v21, %v2542_v18 }
 0x767   :  { %2539 = vmatpush.xpose.msra.mxu2 %v2538_v47  ;;  %2663 = vmatpush.xpose.msrb.mxu3 %v2538_v47 }
 0x768   :  { %v2544_v24 = vand.u32 4294901760, %v2543_v23 }
 0x769   :  { %2391 = vmatmul.f32.vlgmr.msra.gmra.mxu0 %v2390_v20 }
 0x76a   :  { %2615 = vmatpush.xpose.msra.mxu1 %v2538_v47  ;;  %2592 = vmatpush.xpose.msra.mxu0 %v2565_v55 }
 0x76d   :  { %2441 = vmatmul.f32.vlgmr.msrb.gmra.mxu2 %v2387_v9  ;;  %2511 = vmatmul.f32.vlgmr.msrb.gmra.mxu1 %v2386_v0 }
 0x76e   :  { %2571 = vmatmul.f32.vlgmr.msra.gmra.mxu3 %v2540_v19  ;;  %2641 = vmatpush.xpose.msrb.mxu2 %v2566_v60 }
 0x771   :  { %2489 = vmatmul.f32.vlgmr.msrb.gmra.mxu0 %v2386_v0 }
 0x775   :  { %2545 = vmatmul.f32.vlgmr.msra.gmra.mxu2 %v2544_v24  ;;  %2619 = vmatmul.f32.vlgmr.msra.gmra.mxu1 %v2542_v18 }
 0x776   :  { %2665 = vmatmul.f32.vlgmr.msrb.gmra.mxu3 %v2540_v19 }
 0x779   :  { %2595 = vmatmul.f32.vlgmr.msra.gmra.mxu0 %v2541_v21 }
 0x77d   :  { %2643 = vmatmul.f32.vlgmr.msrb.gmra.mxu2 %v2540_v19 }
 0x7c6   :  { %v2101_v25 = vpop.f32.mrf.mxu1 }
 0x7ce   :  { %v2075_v26 = vpop.f32.mrf.mxu0  ;;  %v2125_v28 = vpop.f32.mrf.mxu2 }
 0x7cf   :  { %v2102_v27 = vadd.f32 %v2101_v25, %v2075_v26  ;;  %v2195_v34 = vpop.f32.mrf.mxu1 }
 0x7d0   :  { %v2149_v29 = vpop.f32.mrf.mxu3 }
 0x7d1   :  { %v2126_v30 = vadd.f32 %v2125_v28, %v2102_v27 }
 0x7d3   :  { %v2150_v31 = vadd.f32 %v2149_v29, %v2126_v30 }
 0x7d6   :  { %v2173_v32 = vpop.f32.mrf.mxu0 }
 0x7d7   :  { %v2174_v33 = vadd.f32 %v2173_v32, %v2150_v31  ;;  %v2301_v41 = vpop.f32.mrf.mxu1 }
 0x7d8   :  { %v2253_v37 = vpop.f32.mrf.mxu3 }
 0x7d9   :  { %v4422_v36 = vadd.f32 %v2195_v34, %v2174_v33 }
 0x7de   :  { %v2277_v38 = vpop.f32.mrf.mxu0 }
 0x7e0   :  { %v2227_v39 = vpop.f32.mrf.mxu2  ;;  %v2347_v43 = vpop.f32.mrf.mxu3 }
 0x7e1   :  { %v2254_v40 = vadd.f32 %v2253_v37, %v2227_v39 }
 0x7e2   :  { %v2418_v51 = vpop.f32.mrf.mxu1 }
 0x7e3   :  { %v2278_v42 = vadd.f32 %v2277_v38, %v2254_v40 }
 0x7e5   :  { %v2302_v44 = vadd.f32 %v2301_v41, %v2278_v42 }
 0x7e6   :  { %v2392_v45 = vpop.f32.mrf.mxu0 }
 0x7e7   :  { %v2419_v52 = vadd.f32 %v2418_v51, %v2392_v45 }
 0x7e8   :  { %v2325_v46 = vpop.f32.mrf.mxu2 }
 0x7e9   :  { %v2326_v47 = vadd.f32 %v2325_v46, %v2302_v44  ;;  %v2466_v53 = vpop.f32.mrf.mxu3 }
 0x7ea   :  { %v2512_v58 = vpop.f32.mrf.mxu1 }
 0x7eb   :  { %v2348_v48 = vadd.f32 %v2347_v43, %v2326_v47 }
 0x7ee   :  { %v2490_v54 = vpop.f32.mrf.mxu0 }
 0x7f0   :  { %v2442_v55 = vpop.f32.mrf.mxu2 }
 0x7f1   :  { %v2443_v56 = vadd.f32 %v2442_v55, %v2419_v52  ;;  %v2572_v60 = vpop.f32.mrf.mxu3 }
 0x7f2   :  { %v2620_v3 = vpop.f32.mrf.mxu1 }
 0x7f3   :  { %v2467_v57 = vadd.f32 %v2466_v53, %v2443_v56 }
 0x7f5   :  { %v2491_v59 = vadd.f32 %v2490_v54, %v2467_v57 }
 0x7f6   :  { %v2596_v1 = vpop.f32.mrf.mxu0 }
 0x7f7   :  { %v2513_v61 = vadd.f32 %v2512_v58, %v2491_v59 }
 0x7f8   :  { %v2546_v63 = vpop.f32.mrf.mxu2 }
 0x7f9   :  { %v2573_v62 = vadd.f32 %v2572_v60, %v2546_v63  ;;  %v2669_v0 = vsel %vm361_vm9, %v2513_v61, -inf  ;;  %v2666_v9 = vpop.f32.mrf.mxu3 }
 0x7fa   :  { %2670 = vmax.xlane.f32.xlu0 %v2669_v0 }
 0x7fb   :  { %v2597_v2 = vadd.f32 %v2596_v1, %v2573_v62 }
 0x7fd   :  { %v2621_v4 = vadd.f32 %v2620_v3, %v2597_v2 }
 0x800   :  { %v2644_v5 = vpop.f32.mrf.mxu2 }
 0x801   :  { %v2645_v8 = vadd.f32 %v2644_v5, %v2621_v4 }
 0x803   :  { %v2667_v11 = vadd.f32 %v2666_v9, %v2645_v8 }
 0x805   :  { %v2672_v12 = vsel %vm361_vm9, %v2667_v11, -inf }
 0x806   :  { %2673 = vmax.xlane.f32.xlu2 %v2672_v12 }
 0x81e   :  { %2717 = vrot.lane.b32.xlu2 %v4398_v6, %s4149_s27 }
 0x826   :  { %1686 = vrot.lane.b32.xlu2 %v4385_v35, %s4150_s28 }
 0x86d   :  { %v2671_v49 = vpop.xlane.xlu0 %2670 }
 0x86e   :  { %v2675_v50 = vsub.f32 %v2513_v61, %v2671_v49 }
 0x870   :  { %v2677_v13 = vmul.f32 1.442695, %v2675_v50 }
 0x872   :  { %4070 = vpow2.f32 %v2677_v13 }
 0x878   :  { %v4071_v14 = vpop.eup %4070 }
 0x879   :  { %v2674_v15 = vpop.xlane.xlu2 %2673  ;;  %v2681_v16 = vsel %vm361_vm9, %v4071_v14, 0.0 }
 0x87a   :  { %v2676_v17 = vsub.f32 %v2667_v11, %v2674_v15  ;;  %2682 = vadd.xlane.f32.xlu1 %v2681_v16 }
 0x87c   :  { %v2679_v19 = vmul.f32 1.442695, %v2676_v17 }
 0x87e   :  { %4072 = vpow2.f32 %v2679_v19 }
 0x881   :  { %v2718_v20 = vpop.permute.xlu2 %2717 }
 0x882   :  { %v2738_v21 = vand.u32 4294901760, %v2718_v20 }
 0x884   :  { %v4431_v18 = vpop.eup %4072  ;;  %v2765_v6 = vsub.f32 %v2718_v20, %v2738_v21  ;;  %2739 = vmatpush.msrb.mxu0 %v2738_v21  ;;  %2815 = vmatpush.msra.mxu3 %v2738_v21 }
 0x885   :  { %v2684_v35 = vsel %vm361_vm9, %v4431_v18, 0.0 }
 0x886   :  { %v2766_v23 = vand.u32 4294901760, %v2765_v6  ;;  %2792 = vmatpush.msra.mxu2 %v2765_v6  ;;  %2685 = vadd.xlane.f32.xlu0 %v2684_v35 }
 0x888   :  { %v2767_v24 = vsub.f32 %v2765_v6, %v2766_v23  ;;  %2841 = vmatpush.msra.mxu0 %v2766_v23 }
 0x889   :  { %v1687_v25 = vpop.permute.xlu2 %1686 }
 0x88a   :  { %v2768_v26 = vand.u32 4294901760, %v2767_v24  ;;  %1689 = vst.msk [vmem:[#allocation4 + $0x8] sm:$0xff] %vm1683_vm5, %v1687_v25 }
 0x88c   :  { %2769 = vmatpush.msrb.mxu1 %v2768_v26 }
 0x88e   :  { %2863 = vmatpush.msra.mxu1 %v2738_v21 }
 0x893   :  { %2869 = vrot.lane.b32.xlu1 %v4401_v7, %s4149_s27 }
 0x89a   :  { %1680 = vrot.lane.b32.xlu0 %v4383_v22, %s4150_s28 }
 0x89b   :  { %2357 = vrot.lane.b32.xlu1 %v2348_v48, %s4151_s29 }
 0x8a2   :  { %2351 = vrot.lane.b32.xlu0 %v4422_v36, %s4151_s29 }
 0x8ed   :  { %v2683_v27 = vpop.xlane.xlu1 %2682 }
 0x8ee   :  { %4074 = vrcp.f32 %v2683_v27  ;;  %v2698_v31 = vand.u32 2147483648, %v2683_v27  ;;  %v2696_v33 = vand.u32 2147483647, %v2683_v27  ;;  %vm2692_vm7 = vweird.f32 %v2683_v27 }
 0x8f0   :  { %v2699_v7 = vor.u32 1.1754944e-38, %v2698_v31  ;;  %vm2697_vm10 = vcmp.eq.f32.partialorder %v2696_v33, 8.507059e+37 }
 0x8f4   :  { %v4075_v28 = vpop.eup %4074 }
 0x8f5   :  { %v2688_v29 = vmul.f32 %v4075_v28, %v2683_v27  ;;  %vm2693_vm6 = vweird.f32 %v4075_v28 }
 0x8f6   :  { %vm2694_vm8 = vmor %vm2692_vm7, %vm2693_vm6 }
 0x8f7   :  { %v2689_v30 = vsub.f32 1.0, %v2688_v29 }
 0x8f9   :  { %v2690_v32 = vmul.f32 %v4075_v28, %v2689_v30  ;;  %v2686_v34 = vpop.xlane.xlu0 %2685 }
 0x8fa   :  { %4076 = vrcp.f32 %v2686_v34  ;;  %v2713_v44 = vand.u32 2147483648, %v2686_v34  ;;  %v2711_v47 = vand.u32 2147483647, %v2686_v34  ;;  %vm2707_vm12 = vweird.f32 %v2686_v34 }
 0x8fb   :  { %v2691_v37 = vadd.f32 %v4075_v28, %v2690_v32  ;;  %v3061_v32 = vld [vmem:[%s4815_s6 + $0x18] sm:$0xff] }
 0x8fc   :  { %v2714_v54 = vor.u32 1.1754944e-38, %v2713_v44  ;;  %vm2712_vm14 = vcmp.eq.f32.partialorder %v2711_v47, 8.507059e+37  ;;  %v3084_v33 = vand.u32 4294901760, %v3061_v32 }
 0x8fd   :  { %v2695_v22 = vsel %vm2694_vm8, %v4075_v28, %v2691_v37 }
 0x8fe   :  { %v2700_v38 = vsel %vm2697_vm10, %v2699_v7, %v2695_v22  ;;  %v3122_v37 = vsub.f32 %v3061_v32, %v3084_v33  ;;  %v3059_v22 = vld [vmem:[%s4815_s6 + $0x8] sm:$0xff] }
 0x8ff   :  { %v2701_v39 = vmul.f32 %v4071_v14, %v2700_v38 }
 0x900   :  { %v4077_v36 = vpop.eup %4076  ;;  %v3123_v38 = vand.u32 4294901760, %v3122_v37 }
 0x901   :  { %v2703_v40 = vmul.f32 %v4077_v36, %v2686_v34  ;;  %v2721_v41 = vsel %vm361_vm9, %v2701_v39, 0  ;;  %vm2708_vm11 = vweird.f32 %v4077_v36  ;;  %v3060_v34 = vld [vmem:[%s4815_s6 + $0x10] sm:$0xff] }
 0x902   :  { %v2740_v42 = vand.u32 4294901760, %v2721_v41  ;;  %vm2709_vm13 = vmor %vm2707_vm12, %vm2708_vm11  ;;  %v3086_v7 = vand.u32 4294901760, %v3060_v34 }
 0x903   :  { %v2704_v43 = vsub.f32 1.0, %v2703_v40  ;;  %v3058_v40 = vld [vmem:[%s4815_s6] sm:$0xff] }
 0x904   :  { %v2741_v45 = vsub.f32 %v2721_v41, %v2740_v42  ;;  %2771 = vmatmul.f32.vlgmr.msrb.gmra.mxu1 %v2740_v42  ;;  %v3128_v39 = vsub.f32 %v3060_v34, %v3086_v7  ;;  %v3124_v41 = vsub.f32 %v3122_v37, %v3123_v38  ;;  %v3090_v44 = vand.u32 4294901760, %v3058_v40 }
 0x905   :  { %v2705_v46 = vmul.f32 %v4077_v36, %v2704_v43  ;;  %v2870_v51 = vpop.permute.xlu1 %2869 }
 0x906   :  { %v2890_v48 = vand.u32 4294901760, %v2870_v51  ;;  %2795 = vmatmul.f32.vlgmr.msra.gmra.mxu2 %v2741_v45  ;;  %v2742_v53 = vand.u32 4294901760, %v2741_v45 }
 0x907   :  { %v2706_v52 = vadd.f32 %v4077_v36, %v2705_v46 }
 0x908   :  { %v2917_v55 = vsub.f32 %v2870_v51, %v2890_v48  ;;  %2819 = vmatmul.f32.vlgmr.msra.gmra.mxu3 %v2742_v53  ;;  %2891 = vmatpush.msrb.mxu2 %v2890_v48  ;;  %v2743_v56 = vsub.f32 %v2741_v45, %v2742_v53  ;;  %v3125_v45 = vand.u32 4294901760, %v3124_v41  ;;  %v3140_v51 = vsub.f32 %v3058_v40, %v3090_v44 }
 0x909   :  { %v2710_v57 = vsel %vm2709_vm13, %v4077_v36, %v2706_v52  ;;  %2967 = vmatpush.msrb.mxu1 %v2890_v48  ;;  %v3088_v36 = vand.u32 4294901760, %v3059_v22 }
 0x90a   :  { %v2715_v58 = vsel %vm2712_vm14, %v2714_v54, %v2710_v57  ;;  %v2918_v59 = vand.u32 4294901760, %v2917_v55  ;;  %v2744_v61 = vand.u32 4294901760, %v2743_v56  ;;  %v3141_v52 = vand.u32 4294901760, %v3140_v51 }
 0x90b   :  { %v2716_v60 = vmul.f32 %v4431_v18, %v2715_v58  ;;  %v3134_v43 = vsub.f32 %v3059_v22, %v3088_v36 }
 0x90c   :  { %v2919_v63 = vsub.f32 %v2917_v55, %v2918_v59  ;;  %2745 = vmatmul.f32.vlgmr.msrb.gmra.mxu0 %v2744_v61  ;;  %2865 = vmatmul.f32.vlgmr.msra.gmra.mxu1 %v2740_v42  ;;  %v1681_v62 = vpop.permute.xlu0 %1680 }
 0x90d   :  { %2944 = vmatpush.msrb.mxu0 %v2917_v55  ;;  %2993 = vmatpush.msra.mxu2 %v2918_v59  ;;  %1684 = vst.msk [vmem:[#allocation4] sm:$0xff] %vm1683_vm5, %v1681_v62  ;;  %v2358_v0 = vpop.permute.xlu1 %2357  ;;  %v2873_v1 = vsel %vm361_vm9, %v2716_v60, 0  ;;  %vm3025_vm9 = vcmask 261312   ;;  %v3135_v47 = vand.u32 4294901760, %v3134_v43  ;;  %v3142_v55 = vsub.f32 %v3140_v51, %v3141_v52 }
 0x90e   :  { %v2920_v2 = vand.u32 4294901760, %v2919_v63  ;;  %2360 = vst.msk [vmem:[#allocation4 + $0x8] sm:$0xff] %vm2354_vm15, %v2358_v0  ;;  %v2892_v3 = vand.u32 4294901760, %v2873_v1  ;;  %3126 = vmatpush.msra.mxu1 %v3125_v45 }
 0x90f   :  { %v3136_v53 = vsub.f32 %v3134_v43, %v3135_v47  ;;  %v3143_v56 = vand.u32 4294901760, %v3142_v55 }
 0x910   :  { %2921 = vmatpush.msrb.mxu3 %v2920_v2  ;;  %v2893_v4 = vsub.f32 %v2873_v1, %v2892_v3 }
 0x911   :  { %2923 = vmatmul.f32.vlgmr.msrb.gmra.mxu3 %v2892_v3  ;;  %v3137_v54 = vand.u32 4294901760, %v3136_v53 }
 0x912   :  { %3015 = vmatpush.msra.mxu3 %v2890_v48  ;;  %v2894_v5 = vand.u32 4294901760, %v2893_v4 }
 0x914   :  { %2843 = vmatmul.f32.vlgmr.msra.gmra.mxu0 %v2740_v42  ;;  %2971 = vmatmul.f32.vlgmr.msrb.gmra.mxu1 %v2894_v5  ;;  %v2352_v8 = vpop.permute.xlu0 %2351  ;;  %v2895_v9 = vsub.f32 %v2893_v4, %v2894_v5  ;;  %v3129_v42 = vand.u32 4294901760, %v3128_v39 }
 0x915   :  { %2355 = vst.msk [vmem:[#allocation4] sm:$0xff] %vm2354_vm15, %v2352_v8  ;;  %3202 = vmatpush.msrb.mxu3 %v3084_v33  ;;  %3085 = vmatpush.msra.mxu0 %v3084_v33 }
 0x916   :  { %v2896_v11 = vand.u32 4294901760, %v2895_v9  ;;  %v3130_v46 = vsub.f32 %v3128_v39, %v3129_v42 }
 0x917   :  { %3204 = vmatpush.msrb.mxu3 %v3086_v7  ;;  %3087 = vmatpush.msra.mxu0 %v3086_v7 }
 0x918   :  { %2897 = vmatmul.f32.vlgmr.msrb.gmra.mxu2 %v2896_v11  ;;  %v3131_v48 = vand.u32 4294901760, %v3130_v46 }
 0x919   :  { %3017 = vmatmul.f32.vlgmr.msra.gmra.mxu3 %v2892_v3  ;;  %3168 = vmatpush.msrb.mxu2 %v3122_v37 }
 0x91a   :  { %3206 = vmatpush.msrb.mxu3 %v3088_v36  ;;  %3089 = vmatpush.msra.mxu0 %v3088_v36 }
 0x91b   :  { %3171 = vmatpush.msrb.mxu2 %v3128_v39  ;;  %3132 = vmatpush.msra.mxu1 %v3131_v48 }
 0x91c   :  { %2947 = vmatmul.f32.vlgmr.msrb.gmra.mxu0 %v2893_v4  ;;  %3208 = vmatpush.msrb.mxu3 %v3090_v44 }
 0x91d   :  { %3174 = vmatpush.msrb.mxu2 %v3134_v43  ;;  %3091 = vmatpush.msra.mxu0 %v3090_v44 }
 0x91e   :  { %3138 = vmatpush.msra.mxu1 %v3137_v54 }
 0x91f   :  { %3177 = vmatpush.msrb.mxu2 %v3140_v51  ;;  %3237 = vmatpush.msrb.mxu0 %v3123_v38 }
 0x920   :  { %2995 = vmatmul.f32.vlgmr.msra.gmra.mxu2 %v2892_v3  ;;  %3144 = vmatpush.msra.mxu1 %v3143_v56 }
 0x921   :  { %3241 = vmatpush.msrb.mxu0 %v3129_v42  ;;  %v3289_v42 = vld [vmem:[%s4809_s0 + $0x8] sm:$0xff] }
 0x922   :  { %3272 = vmatpush.msrb.mxu1 %v3084_v33  ;;  %v3288_v33 = vld [vmem:[%s4809_s0] sm:$0xff]  ;;  %s3982_s0 = sshll.u32 %s4153_s23, 4  ;;  %s3983_s0 = int_to_ptr.vmem [resolvable:$true] %s3982_s0 }
 0x923   :  { %3245 = vmatpush.msrb.mxu0 %v3135_v47 }
 0x924   :  { %3274 = vmatpush.msrb.mxu1 %v3086_v7 }
 0x925   :  { %3249 = vmatpush.msrb.mxu0 %v3141_v52 }
 0x926   :  { %3276 = vmatpush.msrb.mxu1 %v3088_v36 }
 0x928   :  { %3278 = vmatpush.msrb.mxu1 %v3090_v44 }
 0x981   :  { %v2772_v12 = vpop.f32.mrf.mxu1 }
 0x989   :  { %v2746_v49 = vpop.f32.mrf.mxu0  ;;  %v2796_v13 = vpop.f32.mrf.mxu2 }
 0x98a   :  { %v2773_v50 = vadd.f32 %v2772_v12, %v2746_v49  ;;  %v2866_v20 = vpop.f32.mrf.mxu1 }
 0x98b   :  { %v2820_v15 = vpop.f32.mrf.mxu3 }
 0x98c   :  { %v2797_v14 = vadd.f32 %v2796_v13, %v2773_v50 }
 0x98e   :  { %v2821_v16 = vadd.f32 %v2820_v15, %v2797_v14 }
 0x991   :  { %v2844_v17 = vpop.f32.mrf.mxu0 }
 0x992   :  { %v2845_v19 = vadd.f32 %v2844_v17, %v2821_v16  ;;  %v2972_v25 = vpop.f32.mrf.mxu1 }
 0x994   :  { %v2867_v21 = vadd.f32 %v2866_v20, %v2845_v19  ;;  %v2924_v18 = vpop.f32.mrf.mxu3  ;;  %v4035_v19 = vld [vmem:[%s4816_s7] ss:$0 sm:$0xff]  ;;  %s3984_s7 = sshll.u32 %s4823_s14, 4  ;;  %s3985_s7 = int_to_ptr.hbm [resolvable:$true] %s3984_s7 }
 0x996   :  { %3022 = vrot.lane.b32.xlu2 %v2867_v21, %s4152_s4 }
 0x999   :  { %v2948_v23 = vpop.f32.mrf.mxu0 }
 0x99b   :  { %v2898_v6 = vpop.f32.mrf.mxu2 }
 0x99c   :  { %v2925_v35 = vadd.f32 %v2924_v18, %v2898_v6  ;;  %v3018_v29 = vpop.f32.mrf.mxu3 }
 0x99e   :  { %v2949_v24 = vadd.f32 %v2948_v23, %v2925_v35 }
 0x9a0   :  { %v2973_v26 = vadd.f32 %v2972_v25, %v2949_v24 }
 0x9a3   :  { %v2996_v27 = vpop.f32.mrf.mxu2 }
 0x9a4   :  { %v2997_v28 = vadd.f32 %v2996_v27, %v2973_v26 }
 0x9a6   :  { %v3019_v30 = vadd.f32 %v3018_v29, %v2997_v28 }
 0x9a8   :  { %3028 = vrot.lane.b32.xlu0 %v3019_v30, %s4152_s4 }
 0x9f0   :  { %v3023_v31 = vpop.permute.xlu2 %3022 }
 0x9f1   :  { %3026 = vst.msk [vmem:[#allocation4] sm:$0xff] %vm3025_vm9, %v3023_v31 }
 0xa1a   :  { %v3029_v57 = vpop.permute.xlu0 %3028 }
 0xa1b   :  { %3031 = vst.msk [vmem:[#allocation4 + $0x8] sm:$0xff] %vm3025_vm9, %v3029_v57 }
 0xa22   :  { %v3032_v58 = vld [vmem:[#allocation4] ss:$8 sm:$0x3]  ;;  %v3036_v59 = vld [vmem:[#allocation4 + $0x1] ss:$8 sm:$0x3] }
 0xa23   :  { %3034 = vst.msk [vmem:[#allocation5] sm:$0x3] %vm3033_vm1, %v3032_v58  ;;  %v3039_v61 = vld [vmem:[#allocation4 + $0x2] ss:$8 sm:$0x3]  ;;  %v3353_v58 = vld [vmem:[%s4819_s10 + $0x18] sm:$0xff] }
 0xa24   :  { %3037 = vst.msk [vmem:[#allocation5 + $0x2] sm:$0x3] %vm3033_vm1, %v3036_v59  ;;  %v3042_v60 = vld [vmem:[#allocation4 + $0x3] ss:$8 sm:$0x3]  ;;  %v3376_v59 = vand.u32 4294901760, %v3353_v58 }
 0xa25   :  { %3040 = vst.msk [vmem:[#allocation5 + $0x4] sm:$0x3] %vm3033_vm1, %v3039_v61  ;;  %v3045_v63 = vld [vmem:[#allocation4 + $0x4] ss:$8 sm:$0x3]  ;;  %v3352_v61 = vld [vmem:[%s4819_s10 + $0x10] sm:$0xff] }
 0xa26   :  { %3043 = vst.msk [vmem:[#allocation5 + $0x6] sm:$0x3] %vm3033_vm1, %v3042_v60  ;;  %v3048_v62 = vld [vmem:[#allocation4 + $0x5] ss:$8 sm:$0x3]  ;;  %v3414_v60 = vsub.f32 %v3353_v58, %v3376_v59  ;;  %3377 = vmatpush.msra.mxu2 %v3376_v59 }
 0xa27   :  { %3046 = vst.msk [vmem:[#allocation5 + $0x8] sm:$0x3] %vm3033_vm1, %v3045_v63  ;;  %v3051_v0 = vld [vmem:[#allocation4 + $0x6] ss:$8 sm:$0x3]  ;;  %v3378_v63 = vand.u32 4294901760, %v3352_v61 }
 0xa28   :  { %3049 = vst.msk [vmem:[#allocation5 + $0xa] sm:$0x3] %vm3033_vm1, %v3048_v62  ;;  %v3054_v1 = vld [vmem:[#allocation4 + $0x7] ss:$8 sm:$0x3] }
 0xa29   :  { %3052 = vst.msk [vmem:[#allocation5 + $0xc] sm:$0x3] %vm3033_vm1, %v3051_v0  ;;  %v3351_v62 = vld [vmem:[%s4819_s10 + $0x8] sm:$0xff]  ;;  %v3415_v0 = vand.u32 4294901760, %v3414_v60  ;;  %3379 = vmatpush.msra.mxu2 %v3378_v63 }
 0xa2a   :  { %3055 = vst.msk [vmem:[#allocation5 + $0xe] sm:$0x3] %vm3033_vm1, %v3054_v1  ;;  %v3420_v1 = vsub.f32 %v3352_v61, %v3378_v63 }
 0xa2d   :  { %v3056_v2 = vld [vmem:[#allocation5] sm:$0xff] }
 0xa2e   :  { %v3067_v3 = vsel %vm53_vm0, %v3056_v2, 0  ;;  %v3380_v2 = vand.u32 4294901760, %v3351_v62 }
 0xa2f   :  { %v3092_v4 = vand.u32 4294901760, %v3067_v3 }
 0xa30   :  { %3381 = vmatpush.msra.mxu2 %v3380_v2 }
 0xa31   :  { %3146 = vmatmul.f32.vlgmr.msra.gmra.mxu1 %v3092_v4  ;;  %v3093_v5 = vsub.f32 %v3067_v3, %v3092_v4  ;;  %v3057_v8 = vld [vmem:[#allocation5 + $0x8] sm:$0xff]  ;;  %v3350_v3 = vld [vmem:[%s4819_s10] sm:$0xff]  ;;  %s3997_s10 = sshll.u32 %s4824_s15, 4  ;;  %s3998_s10 = int_to_ptr.hbm [resolvable:$true] %s3997_s10 }
 0xa32   :  { %v3070_v9 = vsel %vm53_vm0, %v3057_v8, 0  ;;  %3494 = vmatpush.msra.mxu1 %v3376_v59  ;;  %v3426_v8 = vsub.f32 %v3351_v62, %v3380_v2 }
 0xa33   :  { %3180 = vmatmul.f32.vlgmr.msrb.gmra.mxu2 %v3093_v5  ;;  %v3094_v11 = vand.u32 4294901760, %v3093_v5  ;;  %v3100_v12 = vand.u32 4294901760, %v3070_v9 }
 0xa34   :  { %3496 = vmatpush.msra.mxu1 %v3378_v63 }
 0xa35   :  { %3212 = vmatmul.f32.vlgmr.msrb.gmra.mxu3 %v3094_v11  ;;  %v3095_v49 = vsub.f32 %v3093_v5, %v3094_v11  ;;  %v3101_v50 = vsub.f32 %v3070_v9, %v3100_v12  ;;  %v3421_v5 = vand.u32 4294901760, %v3420_v1  ;;  %v3382_v9 = vand.u32 4294901760, %v3350_v3 }
 0xa36   :  { %3498 = vmatpush.msra.mxu1 %v3380_v2 }
 0xa37   :  { %v3096_v13 = vand.u32 4294901760, %v3095_v49  ;;  %v3102_v14 = vand.u32 4294901760, %v3101_v50  ;;  %v3427_v49 = vand.u32 4294901760, %v3426_v8  ;;  %3383 = vmatpush.msra.mxu2 %v3382_v9 }
 0xa38   :  { %3500 = vmatpush.msra.mxu1 %v3382_v9 }
 0xa39   :  { %3097 = vmatmul.f32.vlgmr.msra.gmra.mxu0 %v3096_v13  ;;  %3150 = vmatmul.f32.gmra.mxu1 %v3100_v12  ;;  %v3103_v15 = vsub.f32 %v3101_v50, %v3102_v14 }
 0xa3a   :  { %3460 = vmatpush.msra.mxu0 %v3414_v60  ;;  %3529 = vmatpush.msrb.mxu2 %v3415_v0 }
 0xa3b   :  { %3185 = vmatmul.f32.gmra.mxu2 %v3101_v50  ;;  %v3104_v16 = vand.u32 4294901760, %v3103_v15  ;;  %v3432_v50 = vsub.f32 %v3350_v3, %v3382_v9 }
 0xa3c   :  { %3463 = vmatpush.msra.mxu0 %v3420_v1  ;;  %3533 = vmatpush.msrb.mxu2 %v3421_v5 }
 0xa3d   :  { %3218 = vmatmul.f32.gmra.mxu3 %v3102_v14  ;;  %v3428_v14 = vsub.f32 %v3426_v8, %v3427_v49  ;;  %v3433_v15 = vand.u32 4294901760, %v3432_v50 }
 0xa3e   :  { %3466 = vmatpush.msra.mxu0 %v3426_v8  ;;  %3537 = vmatpush.msrb.mxu2 %v3427_v49 }
 0xa40   :  { %3469 = vmatpush.msra.mxu0 %v3432_v50  ;;  %3541 = vmatpush.msrb.mxu2 %v3433_v15 }
 0xa41   :  { %3105 = vmatmul.f32.gmra.mxu0 %v3104_v16  ;;  %3280 = vmatmul.f32.vlgmr.msrb.gmra.mxu1 %v3092_v4  ;;  %v3429_v16 = vand.u32 4294901760, %v3428_v14 }
 0xa49   :  { %3251 = vmatmul.f32.vlgmr.msrb.gmra.mxu0 %v3092_v4  ;;  %3284 = vmatmul.f32.gmra.mxu1 %v3100_v12  ;;  %v3416_v4 = vsub.f32 %v3414_v60, %v3415_v0 }
 0xa4b   :  { %v3417_v11 = vand.u32 4294901760, %v3416_v4 }
 0xa4d   :  { %3418 = vmatpush.msra.mxu3 %v3417_v11 }
 0xa51   :  { %3255 = vmatmul.f32.gmra.mxu0 %v3100_v12  ;;  %v3422_v12 = vsub.f32 %v3420_v1, %v3421_v5 }
 0xa53   :  { %v3423_v13 = vand.u32 4294901760, %v3422_v12 }
 0xa55   :  { %3424 = vmatpush.msra.mxu3 %v3423_v13 }
 0xa57   :  { %3430 = vmatpush.msra.mxu3 %v3429_v16 }
 0xaae   :  { %v3147_v17 = vpop.f32.mrf.mxu1 }
 0xab6   :  { %v3098_v20 = vpop.f32.mrf.mxu0  ;;  %v3151_v18 = vpop.f32.mrf.mxu1 }
 0xab7   :  { %v3099_v21 = vadd.f32 %v4035_v19, %v3098_v20  ;;  %v3181_v35 = vpop.f32.mrf.mxu2 }
 0xab8   :  { %v3213_v26 = vpop.f32.mrf.mxu3 }
 0xab9   :  { %v3148_v6 = vadd.f32 %v3147_v17, %v3099_v21  ;;  %v3434_v17 = vsub.f32 %v3432_v50, %v3433_v15 }
 0xabb   :  { %v3182_v24 = vadd.f32 %v3181_v35, %v3148_v6  ;;  %v3435_v21 = vand.u32 4294901760, %v3434_v17 }
 0xabd   :  { %v3214_v27 = vadd.f32 %v3213_v26, %v3182_v24  ;;  %3436 = vmatpush.msra.mxu3 %v3435_v21 }
 0xabe   :  { %v3106_v23 = vpop.f32.mrf.mxu0  ;;  %v3281_v29 = vpop.f32.mrf.mxu1 }
 0xabf   :  { %v3107_v25 = vadd.f32 %v4035_v19, %v3106_v23  ;;  %v3186_v32 = vpop.f32.mrf.mxu2  ;;  %3564 = vmatpush.msrb.mxu3 %v3376_v59 }
 0xac0   :  { %v3219_v22 = vpop.f32.mrf.mxu3 }
 0xac1   :  { %v3152_v28 = vadd.f32 %v3151_v18, %v3107_v25  ;;  %3566 = vmatpush.msrb.mxu3 %v3378_v63 }
 0xac3   :  { %v3187_v34 = vadd.f32 %v3186_v32, %v3152_v28  ;;  %3568 = vmatpush.msrb.mxu3 %v3380_v2  ;;  %v4036_v32 = vld [vmem:[%s4817_s8] ss:$0 sm:$0xff] }
 0xac5   :  { %v3220_v38 = vadd.f32 %v3219_v22, %v3187_v34  ;;  %3570 = vmatpush.msrb.mxu3 %v3382_v9  ;;  %v4037_v34 = vld [vmem:[%s4818_s9] ss:$0 sm:$0xff] }
 0xac6   :  { %v3252_v30 = vpop.f32.mrf.mxu0  ;;  %v3285_v41 = vpop.f32.mrf.mxu1 }
 0xac7   :  { %v3253_v31 = vadd.f32 %v3252_v30, %v3214_v27 }
 0xac9   :  { %v3282_v37 = vadd.f32 %v3281_v29, %v3253_v31 }
 0xacb   :  { %v3290_v7 = vadd.f32 %v3288_v33, %v3282_v37 }
 0xacd   :  { %3292 = vst.msk [vmem:[#allocation6] sm:$0xff] %vm53_vm0, %v3290_v7  ;;  %v3294_v39 = vsel %vm53_vm0, %v3290_v7, 0.0 }
 0xace   :  { %v3256_v36 = vpop.f32.mrf.mxu0  ;;  %3295 = vadd.xlane.f32.xlu1 %v3294_v39 }
 0xacf   :  { %v3257_v40 = vadd.f32 %v3256_v36, %v3220_v38 }
 0xad1   :  { %v3286_v43 = vadd.f32 %v3285_v41, %v3257_v40 }
 0xad3   :  { %v3291_v44 = vadd.f32 %v3289_v42, %v3286_v43 }
 0xad5   :  { %3293 = vst.msk [vmem:[#allocation6 + $0x8] sm:$0xff] %vm53_vm0, %v3291_v44  ;;  %v3297_v45 = vsel %vm53_vm0, %v3291_v44, 0.0 }
 0xad6   :  { %3298 = vadd.xlane.f32.xlu2 %v3297_v45  ;;  %v3597_v45 = vld [vmem:[%s4821_s12 + $0x78] sm:$0xff] }
 0xad7   :  { %3990 = dma.vmem_to_hbm [thread:$0]  %s3983_s0, 256, %s3985_s7, [#allocation7], %s4154_s24, %s4154_s24, %s4150_s28  }
 0xb41   :  { %v3296_v46 = vpop.xlane.xlu1 %3295 }
 0xb42   :  { %v3300_v47 = vmul.f32 %v3296_v46, %v4244_v10  ;;  %v3596_v46 = vld [vmem:[%s4821_s12 + $0x70] sm:$0xff] }
 0xb44   :  { %v4485_v51 = vsub.f32 %v3290_v7, %v3300_v47  ;;  %v3595_v47 = vld [vmem:[%s4821_s12 + $0x68] sm:$0xff] }
 0xb46   :  { %v3304_v48 = vmul.f32 %v4485_v51, %v4485_v51 }
 0xb48   :  { %v3306_v53 = vsel %vm53_vm0, %v3304_v48, 0.0  ;;  %v4532_v48 = vand.u32 4294901760, %v3597_v45 }
 0xb49   :  { %v3299_v52 = vpop.xlane.xlu2 %3298  ;;  %3307 = vadd.xlane.f32.xlu0 %v3306_v53  ;;  %v4534_v53 = vand.u32 4294901760, %v3596_v46 }
 0xb4a   :  { %v3301_v54 = vmul.f32 %v3299_v52, %v4244_v10  ;;  %v4536_v52 = vand.u32 4294901760, %v3595_v47  ;;  %v4549_v61 = vsub.f32 %v3597_v45, %v4532_v48  ;;  %3603 = vmatpush.msrb.mxu0 %v4532_v48 }
 0xb4b   :  { %v4552_v60 = vsub.f32 %v3596_v46, %v4534_v53 }
 0xb4c   :  { %v4491_v55 = vsub.f32 %v3291_v44, %v3301_v54  ;;  %v3594_v54 = vld [vmem:[%s4821_s12 + $0x60] sm:$0xff]  ;;  %v4555_v63 = vsub.f32 %v3595_v47, %v4536_v52  ;;  %v3653_v3 = vand.u32 4294901760, %v4549_v61  ;;  %3605 = vmatpush.msrb.mxu0 %v4534_v53 }
 0xb4d   :  { %v3659_v4 = vand.u32 4294901760, %v4552_v60 }
 0xb4e   :  { %v3305_v56 = vmul.f32 %v4491_v55, %v4491_v55  ;;  %v3665_v5 = vand.u32 4294901760, %v4555_v63  ;;  %v3654_v12 = vsub.f32 %v4549_v61, %v3653_v3  ;;  %3607 = vmatpush.msrb.mxu0 %v4536_v52 }
 0xb4f   :  { %v3660_v49 = vsub.f32 %v4552_v60, %v3659_v4 }
 0xb50   :  { %v3309_v57 = vsel %vm53_vm0, %v3305_v56, 0.0  ;;  %v3666_v50 = vsub.f32 %v4555_v63, %v3665_v5  ;;  %v3655_v15 = vand.u32 4294901760, %v3654_v12 }
 0xb51   :  { %3310 = vadd.xlane.f32.xlu1 %v3309_v57  ;;  %v4544_v57 = vand.u32 4294901760, %v3594_v54  ;;  %v3661_v16 = vand.u32 4294901760, %v3660_v49 }
 0xb52   :  { %3656 = vmatpush.msrb.mxu1 %v3655_v15 }
 0xb53   :  { %v4559_v0 = vsub.f32 %v3594_v54, %v4544_v57  ;;  %3609 = vmatpush.msrb.mxu0 %v4544_v57 }
 0xb54   :  { %3662 = vmatpush.msrb.mxu1 %v3661_v16 }
 0xb55   :  { %v3671_v11 = vand.u32 4294901760, %v4559_v0 }
 0xb57   :  { %v3672_v17 = vsub.f32 %v4559_v0, %v3671_v11 }
 0xbbc   :  { %v3308_v19 = vpop.xlane.xlu0 %3307 }
 0xbbd   :  { %v3312_v20 = vmul.f32 %v3308_v19, %v4244_v10 }
 0xbbf   :  { %v3314_v18 = vadd.f32 1e-05, %v3312_v20  ;;  %v3667_v20 = vand.u32 4294901760, %v3666_v50 }
 0xbc1   :  { %4078 = vrsqrt.f32 %v3314_v18  ;;  %vm3322_vm3 = vweird.f32 %v3314_v18  ;;  %3668 = vmatpush.msrb.mxu1 %v3667_v20 }
 0xbc4   :  { %v3311_v6 = vpop.xlane.xlu1 %3310 }
 0xbc5   :  { %v3313_v35 = vmul.f32 %v3311_v6, %v4244_v10  ;;  %v3673_v6 = vand.u32 4294901760, %v3672_v17 }
 0xbc7   :  { %v4079_v23 = vpop.eup %4078  ;;  %v3315_v24 = vadd.f32 1e-05, %v3313_v35  ;;  %3674 = vmatpush.msrb.mxu1 %v3673_v6 }
 0xbc8   :  { %v3317_v25 = vmul.f32 %v4079_v23, %v3314_v18  ;;  %vm3323_vm2 = vweird.f32 %v4079_v23 }
 0xbc9   :  { %4080 = vrsqrt.f32 %v3315_v24  ;;  %vm3324_vm4 = vmor %vm3322_vm3, %vm3323_vm2  ;;  %vm3332_vm6 = vweird.f32 %v3315_v24 }
 0xbca   :  { %v3318_v26 = vmul.f32 %v4079_v23, %v3317_v25 }
 0xbcc   :  { %v3319_v27 = vmul.f32 0.5, %v3318_v26  ;;  %v3591_v26 = vld [vmem:[%s4821_s12 + $0x48] sm:$0xff] }
 0xbce   :  { %v3320_v28 = vsub.f32 1.5, %v3319_v27 }
 0xbcf   :  { %v4081_v29 = vpop.eup %4080 }
 0xbd0   :  { %v3321_v30 = vmul.f32 %v4079_v23, %v3320_v28  ;;  %v3327_v31 = vmul.f32 %v4081_v29, %v3315_v24  ;;  %vm3333_vm5 = vweird.f32 %v4081_v29  ;;  %v3592_v24 = vld [vmem:[%s4821_s12 + $0x50] sm:$0xff]  ;;  %v4612_v28 = vand.u32 4294901760, %v3591_v26 }
 0xbd1   :  { %vm3334_vm7 = vmor %vm3332_vm6, %vm3333_vm5  ;;  %v4604_v25 = vand.u32 4294901760, %v3592_v24 }
 0xbd2   :  { %v3325_v33 = vsel %vm3324_vm4, %v4079_v23, %v3321_v30  ;;  %v3328_v10 = vmul.f32 %v4081_v29, %v3327_v31  ;;  %v4621_v31 = vsub.f32 %v3591_v26, %v4612_v28  ;;  %v3582_v26 = vld [vmem:[%s4821_s12] sm:$0xff] }
 0xbd3   :  { %v3336_v37 = vmul.f32 %v3325_v33, %v4485_v51  ;;  %v4610_v27 = vsub.f32 %v3592_v24, %v4604_v25  ;;  %v3589_v33 = vld [vmem:[%s4821_s12 + $0x38] sm:$0xff] }
 0xbd4   :  { %v3329_v7 = vmul.f32 0.5, %v3328_v10 }
 0xbd5   :  { %v3342_v22 = vmul.f32 %v4036_v32, %v3336_v37  ;;  %v3683_v30 = vand.u32 4294901760, %v4610_v27 }
 0xbd6   :  { %v3330_v38 = vsub.f32 1.5, %v3329_v7  ;;  %v4638_v7 = vand.u32 4294901760, %v3589_v33 }
 0xbd7   :  { %v3348_v39 = vadd.f32 %v4037_v34, %v3342_v22  ;;  %v3684_v10 = vsub.f32 %v4610_v27, %v3683_v30  ;;  %v3588_v22 = vld [vmem:[%s4821_s12 + $0x30] sm:$0xff] }
 0xbd8   :  { %v3331_v36 = vmul.f32 %v4081_v29, %v3330_v38 }
 0xbd9   :  { %v3359_v40 = vsel %vm53_vm0, %v3348_v39, 0  ;;  %v3685_v38 = vand.u32 4294901760, %v3684_v10 }
 0xbda   :  { %v3335_v41 = vsel %vm3334_vm7, %v4081_v29, %v3331_v36  ;;  %v4518_v42 = vand.u32 4294901760, %v3359_v40  ;;  %v3590_v29 = vld [vmem:[%s4821_s12 + $0x40] sm:$0xff] }
 0xbdb   :  { %v3337_v43 = vmul.f32 %v3335_v41, %v4491_v55  ;;  %v3593_v55 = vld [vmem:[%s4821_s12 + $0x58] sm:$0xff]  ;;  %v4655_v41 = vand.u32 4294901760, %v3588_v22 }
 0xbdc   :  { %3438 = vmatmul.f32.vlgmr.msra.gmra.mxu3 %v4518_v42  ;;  %v3385_v44 = vsub.f32 %v3359_v40, %v4518_v42  ;;  %v4546_v58 = vand.u32 4294901760, %v3593_v55  ;;  %v4651_v40 = vsub.f32 %v3589_v33, %v4638_v7 }
 0xbdd   :  { %v3343_v51 = vmul.f32 %v4036_v32, %v3337_v43  ;;  %3816 = vmatpush.msra.mxu3 %v4532_v48  ;;  %v4623_v32 = vand.u32 4294901760, %v3590_v29  ;;  %v4669_v47 = vsub.f32 %v3588_v22, %v4655_v41  ;;  %v4733_v22 = vand.u32 4294901760, %v3582_v26 }
 0xbde   :  { %3472 = vmatmul.f32.vlgmr.msra.gmra.mxu0 %v3385_v44  ;;  %v3386_v56 = vand.u32 4294901760, %v3385_v44  ;;  %v4562_v1 = vsub.f32 %v3593_v55, %v4546_v58  ;;  %v3701_v45 = vand.u32 4294901760, %v4651_v40 }
 0xbdf   :  { %v3349_v59 = vadd.f32 %v4037_v34, %v3343_v51  ;;  %3818 = vmatpush.msra.mxu3 %v4534_v53  ;;  %3611 = vmatpush.msrb.mxu0 %v4546_v58  ;;  %v3689_v34 = vand.u32 4294901760, %v4621_v31  ;;  %v4636_v37 = vsub.f32 %v3590_v29, %v4623_v32  ;;  %v3586_v51 = vld [vmem:[%s4821_s12 + $0x20] sm:$0xff] }
 0xbe0   :  { %3504 = vmatmul.f32.vlgmr.msra.gmra.mxu1 %v3386_v56  ;;  %v3387_v62 = vsub.f32 %v3385_v44, %v3386_v56  ;;  %v3677_v13 = vand.u32 4294901760, %v4562_v1  ;;  %v3702_v55 = vsub.f32 %v4651_v40, %v3701_v45 }
 0xbe1   :  { %v3362_v2 = vsel %vm53_vm0, %v3349_v59, 0  ;;  %3820 = vmatpush.msra.mxu3 %v4536_v52  ;;  %3613 = vmatpush.msrb.mxu0 %v4604_v25  ;;  %v3690_v39 = vsub.f32 %v4621_v31, %v3689_v34  ;;  %v3695_v36 = vand.u32 4294901760, %v4636_v37  ;;  %v4682_v59 = vand.u32 4294901760, %v3586_v51 }
 0xbe2   :  { %v3388_v8 = vand.u32 4294901760, %v3387_v62  ;;  %v3392_v9 = vand.u32 4294901760, %v3362_v2  ;;  %v3678_v21 = vsub.f32 %v4562_v1, %v3677_v13  ;;  %v3707_v62 = vand.u32 4294901760, %v4669_v47 }
 0xbe3   :  { %3822 = vmatpush.msra.mxu3 %v4544_v57  ;;  %3615 = vmatpush.msrb.mxu0 %v4612_v28  ;;  %v3691_v43 = vand.u32 4294901760, %v3690_v39  ;;  %v3696_v44 = vsub.f32 %v4636_v37, %v3695_v36  ;;  %v4692_v12 = vsub.f32 %v3586_v51, %v4682_v59 }
 0xbe4   :  { %3389 = vmatmul.f32.vlgmr.msra.gmra.mxu2 %v3388_v8  ;;  %3442 = vmatmul.f32.gmra.mxu3 %v3392_v9  ;;  %v3393_v14 = vsub.f32 %v3362_v2, %v3392_v9  ;;  %v3679_v23 = vand.u32 4294901760, %v3678_v21  ;;  %v3585_v2 = vld [vmem:[%s4821_s12 + $0x18] sm:$0xff]  ;;  %v3703_v8 = vand.u32 4294901760, %v3702_v55  ;;  %v3708_v50 = vsub.f32 %v4669_v47, %v3707_v62  ;;  %v3583_v21 = vld [vmem:[%s4821_s12 + $0x8] sm:$0xff] }
 0xbe5   :  { %3758 = vmatpush.msra.mxu2 %v4549_v61  ;;  %3824 = vmatpush.msra.mxu3 %v4546_v58  ;;  %v3697_v54 = vand.u32 4294901760, %v3696_v44  ;;  %v4694_v49 = vand.u32 4294901760, %v3585_v2  ;;  %v3719_v16 = vand.u32 4294901760, %v4692_v12  ;;  %v4726_v24 = vand.u32 4294901760, %v3583_v21 }
 0xbe6   :  { %3477 = vmatmul.f32.gmra.mxu0 %v3393_v14  ;;  %v3394_v19 = vand.u32 4294901760, %v3393_v14  ;;  %3680 = vmatpush.msrb.mxu1 %v3679_v23  ;;  %v3709_v20 = vand.u32 4294901760, %v3708_v50 }
 0xbe7   :  { %3761 = vmatpush.msra.mxu2 %v4552_v60  ;;  %3826 = vmatpush.msra.mxu3 %v4604_v25  ;;  %v4710_v17 = vsub.f32 %v3585_v2, %v4694_v49  ;;  %v3720_v6 = vsub.f32 %v4692_v12, %v3719_v16 }
 0xbe8   :  { %3510 = vmatmul.f32.gmra.mxu1 %v3394_v19  ;;  %v3395_v18 = vsub.f32 %v3393_v14, %v3394_v19  ;;  %3617 = vmatpush.msrb.mxu0 %v4623_v32  ;;  %v3584_v14 = vld [vmem:[%s4821_s12 + $0x10] sm:$0xff] }
 0xbe9   :  { %3764 = vmatpush.msra.mxu2 %v4555_v63  ;;  %3828 = vmatpush.msra.mxu3 %v4612_v28  ;;  %v4712_v19 = vand.u32 4294901760, %v3584_v14  ;;  %v3721_v29 = vand.u32 4294901760, %v3720_v6 }
 0xbea   :  { %v3396_v35 = vand.u32 4294901760, %v3395_v18  ;;  %3619 = vmatpush.msrb.mxu0 %v4638_v7  ;;  %3686 = vmatpush.msrb.mxu1 %v3685_v38  ;;  %v3736_v38 = vsub.f32 %v3583_v21, %v4726_v24 }
 0xbeb   :  { %3767 = vmatpush.msra.mxu2 %v4559_v0  ;;  %3830 = vmatpush.msra.mxu3 %v4623_v32  ;;  %v3730_v23 = vsub.f32 %v3584_v14, %v4712_v19 }
 0xbec   :  { %3397 = vmatmul.f32.gmra.mxu2 %v3396_v35  ;;  %3572 = vmatmul.f32.vlgmr.msrb.gmra.mxu3 %v4518_v42  ;;  %v3725_v35 = vand.u32 4294901760, %v4710_v17  ;;  %v3737_v44 = vand.u32 4294901760, %v3736_v38 }
 0xbed   :  { %3770 = vmatpush.msra.mxu2 %v4562_v1  ;;  %3832 = vmatpush.msra.mxu3 %v4638_v7  ;;  %v3731_v10 = vand.u32 4294901760, %v3730_v23 }
 0xbee   :  { %3621 = vmatpush.msrb.mxu0 %v4655_v41  ;;  %3692 = vmatpush.msrb.mxu1 %v3691_v43  ;;  %v3726_v33 = vsub.f32 %v4710_v17, %v3725_v35  ;;  %v3742_v43 = vsub.f32 %v3582_v26, %v4733_v22  ;;  %v3738_v55 = vsub.f32 %v3736_v38, %v3737_v44 }
 0xbef   :  { %3773 = vmatpush.msra.mxu2 %v4610_v27  ;;  %3834 = vmatpush.msra.mxu3 %v4655_v41 }
 0xbf0   :  { %3698 = vmatpush.msrb.mxu1 %v3697_v54  ;;  %v3727_v39 = vand.u32 4294901760, %v3726_v33  ;;  %v3743_v54 = vand.u32 4294901760, %v3742_v43 }
 0xbf1   :  { %3776 = vmatpush.msra.mxu2 %v4621_v31 }
 0xbf2   :  { %3704 = vmatpush.msrb.mxu1 %v3703_v8  ;;  %v3744_v2 = vsub.f32 %v3742_v43, %v3743_v54  ;;  %v3739_v8 = vand.u32 4294901760, %v3738_v55 }
 0xbf3   :  { %3779 = vmatpush.msra.mxu2 %v4636_v37 }
 0xbf4   :  { %3543 = vmatmul.f32.vlgmr.msrb.gmra.mxu2 %v4518_v42  ;;  %3576 = vmatmul.f32.gmra.mxu3 %v3392_v9  ;;  %v3587_v42 = vld [vmem:[%s4821_s12 + $0x28] sm:$0xff]  ;;  %v3745_v50 = vand.u32 4294901760, %v3744_v2 }
 0xbf5   :  { %v4665_v46 = vand.u32 4294901760, %v3587_v42  ;;  %3782 = vmatpush.msra.mxu2 %v4651_v40  ;;  %3710 = vmatpush.msrb.mxu1 %v3709_v20 }
 0xbf7   :  { %v4680_v56 = vsub.f32 %v3587_v42, %v4665_v46  ;;  %3623 = vmatpush.msrb.mxu0 %v4665_v46  ;;  %3785 = vmatpush.msra.mxu2 %v4669_v47  ;;  %v3732_v42 = vsub.f32 %v3730_v23, %v3731_v10 }
 0xbf8   :  { %3836 = vmatpush.msra.mxu3 %v4665_v46 }
 0xbf9   :  { %3625 = vmatpush.msrb.mxu0 %v4682_v59  ;;  %3788 = vmatpush.msra.mxu2 %v4680_v56  ;;  %v3733_v51 = vand.u32 4294901760, %v3732_v42 }
 0xbfa   :  { %3838 = vmatpush.msra.mxu3 %v4682_v59 }
 0xbfb   :  { %3627 = vmatpush.msrb.mxu0 %v4694_v49  ;;  %3791 = vmatpush.msra.mxu2 %v4692_v12 }
 0xbfc   :  { %3547 = vmatmul.f32.gmra.mxu2 %v3392_v9  ;;  %v3713_v9 = vand.u32 4294901760, %v4680_v56  ;;  %3840 = vmatpush.msra.mxu3 %v4694_v49 }
 0xbfd   :  { %3629 = vmatpush.msrb.mxu0 %v4712_v19  ;;  %3794 = vmatpush.msra.mxu2 %v4710_v17 }
 0xbfe   :  { %v3714_v15 = vsub.f32 %v4680_v56, %v3713_v9  ;;  %3842 = vmatpush.msra.mxu3 %v4712_v19 }
 0xbff   :  { %3631 = vmatpush.msrb.mxu0 %v4726_v24  ;;  %3797 = vmatpush.msra.mxu2 %v3730_v23 }
 0xc00   :  { %v3715_v18 = vand.u32 4294901760, %v3714_v15  ;;  %3844 = vmatpush.msra.mxu3 %v4726_v24 }
 0xc01   :  { %3633 = vmatpush.msrb.mxu0 %v4733_v22  ;;  %3800 = vmatpush.msra.mxu2 %v3736_v38 }
 0xc02   :  { %3716 = vmatpush.msrb.mxu1 %v3715_v18  ;;  %3846 = vmatpush.msra.mxu3 %v4733_v22 }
 0xc03   :  { %3863 = vmatpush.msra.mxu0 %v3653_v3  ;;  %3803 = vmatpush.msra.mxu2 %v3742_v43  ;;  %v4084_v43 = vld [vmem:[%s4810_s1] sm:$0xff] }
 0xc04   :  { %3722 = vmatpush.msrb.mxu1 %v3721_v29 }
 0xc05   :  { %3867 = vmatpush.msra.mxu0 %v3659_v4 }
 0xc06   :  { %3728 = vmatpush.msrb.mxu1 %v3727_v39 }
 0xc07   :  { %3871 = vmatpush.msra.mxu0 %v3665_v5 }
 0xc08   :  { %3734 = vmatpush.msrb.mxu1 %v3733_v51 }
 0xc09   :  { %3875 = vmatpush.msra.mxu0 %v3671_v11 }
 0xc0a   :  { %3740 = vmatpush.msrb.mxu1 %v3739_v8 }
 0xc0b   :  { %3879 = vmatpush.msra.mxu0 %v3677_v13 }
 0xc0c   :  { %3746 = vmatpush.msrb.mxu1 %v3745_v50 }
 0xc0d   :  { %3883 = vmatpush.msra.mxu0 %v3683_v30 }
 0xc0e   :  { %3934 = vmatpush.msra.mxu1 %v4532_v48 }
 0xc0f   :  { %3887 = vmatpush.msra.mxu0 %v3689_v34 }
 0xc10   :  { %3936 = vmatpush.msra.mxu1 %v4534_v53  ;;  %v4038_v53 = vld [vmem:[%s4820_s11] ss:$0 sm:$0xff] }
 0xc11   :  { %3891 = vmatpush.msra.mxu0 %v3695_v36 }
 0xc12   :  { %3938 = vmatpush.msra.mxu1 %v4536_v52 }
 0xc13   :  { %3895 = vmatpush.msra.mxu0 %v3701_v45 }
 0xc14   :  { %3940 = vmatpush.msra.mxu1 %v4544_v57 }
 0xc15   :  { %3899 = vmatpush.msra.mxu0 %v3707_v62 }
 0xc16   :  { %3942 = vmatpush.msra.mxu1 %v4546_v58 }
 0xc17   :  { %3903 = vmatpush.msra.mxu0 %v3713_v9 }
 0xc18   :  { %3944 = vmatpush.msra.mxu1 %v4604_v25 }
 0xc19   :  { %3907 = vmatpush.msra.mxu0 %v3719_v16  ;;  %v4039_v16 = vld [vmem:[%s4822_s13] ss:$0 sm:$0xff]  ;;  %s4155_s13 = smov [#allocation8]  }
 0xc1a   :  { %3946 = vmatpush.msra.mxu1 %v4612_v28  ;;  %s3995_s29 = sshll.u32 %s4155_s13, 4  ;;  %s3996_s29 = int_to_ptr.vmem [resolvable:$true] %s3995_s29 }
 0xc1b   :  { %3911 = vmatpush.msra.mxu0 %v3725_v35 }
 0xc1c   :  { %3948 = vmatpush.msra.mxu1 %v4623_v32 }
 0xc1d   :  { %3915 = vmatpush.msra.mxu0 %v3731_v10 }
 0xc1e   :  { %3950 = vmatpush.msra.mxu1 %v4638_v7 }
 0xc1f   :  { %3919 = vmatpush.msra.mxu0 %v3737_v44 }
 0xc20   :  { %3952 = vmatpush.msra.mxu1 %v4655_v41 }
 0xc21   :  { %3923 = vmatpush.msra.mxu0 %v3743_v54 }
 0xc22   :  { %3954 = vmatpush.msra.mxu1 %v4665_v46 }
 0xc24   :  { %3956 = vmatpush.msra.mxu1 %v4682_v59 }
 0xc26   :  { %3958 = vmatpush.msra.mxu1 %v4694_v49 }
 0xc28   :  { %3960 = vmatpush.msra.mxu1 %v4712_v19 }
 0xc2a   :  { %3962 = vmatpush.msra.mxu1 %v4726_v24 }
 0xc2c   :  { %3964 = vmatpush.msra.mxu1 %v4733_v22 }
 0xc5b   :  { %v3473_v60 = vpop.f32.mrf.mxu0 }
 0xc5d   :  { %v3505_v3 = vpop.f32.mrf.mxu1 }
 0xc5f   :  { %v3439_v48 = vpop.f32.mrf.mxu3 }
 0xc63   :  { %v3478_v27 = vpop.f32.mrf.mxu0 }
 0xc65   :  { %v3511_v32 = vpop.f32.mrf.mxu1 }
 0xc67   :  { %v3390_v52 = vpop.f32.mrf.mxu2  ;;  %v3443_v58 = vpop.f32.mrf.mxu3 }
 0xc68   :  { %v3391_v57 = vadd.f32 %v4038_v53, %v3390_v52 }
 0xc6a   :  { %v3440_v61 = vadd.f32 %v3439_v48, %v3391_v57  ;;  %v4085_v48 = vld [vmem:[%s4810_s1 + $0x8] sm:$0xff] }
 0xc6c   :  { %v3474_v1 = vadd.f32 %v3473_v60, %v3440_v61 }
 0xc6e   :  { %v3506_v5 = vadd.f32 %v3505_v3, %v3474_v1 }
 0xc6f   :  { %v3398_v63 = vpop.f32.mrf.mxu2  ;;  %v3573_v11 = vpop.f32.mrf.mxu3 }
 0xc70   :  { %v3399_v0 = vadd.f32 %v4038_v53, %v3398_v63 }
 0xc72   :  { %v3444_v4 = vadd.f32 %v3443_v58, %v3399_v0 }
 0xc74   :  { %v3479_v30 = vadd.f32 %v3478_v27, %v3444_v4 }
 0xc76   :  { %v3512_v37 = vadd.f32 %v3511_v32, %v3479_v30 }
 0xc77   :  { %v3544_v13 = vpop.f32.mrf.mxu2  ;;  %v3577_v41 = vpop.f32.mrf.mxu3 }
 0xc78   :  { %v3545_v25 = vadd.f32 %v3544_v13, %v3506_v5 }
 0xc7a   :  { %v3574_v28 = vadd.f32 %v3573_v11, %v3545_v25 }
 0xc7c   :  { %v3580_v31 = vmax.f32 %v3574_v28, 0.0 }
 0xc7e   :  { %v3634_v34 = vand.u32 4294901760, %v3580_v31 }
 0xc7f   :  { %v3548_v7 = vpop.f32.mrf.mxu2 }
 0xc80   :  { %v3635_v36 = vsub.f32 %v3580_v31, %v3634_v34  ;;  %v3549_v40 = vadd.f32 %v3548_v7, %v3512_v37  ;;  %3748 = vmatmul.f32.vlgmr.msrb.gmra.mxu1 %v3634_v34 }
 0xc82   :  { %v3636_v45 = vand.u32 4294901760, %v3635_v36  ;;  %v3578_v46 = vadd.f32 %v3577_v41, %v3549_v40  ;;  %3806 = vmatmul.f32.vlgmr.msra.gmra.mxu2 %v3635_v36 }
 0xc84   :  { %v3637_v47 = vsub.f32 %v3635_v36, %v3636_v45  ;;  %v3581_v56 = vmax.f32 %v3578_v46, 0.0  ;;  %3850 = vmatmul.f32.vlgmr.msra.gmra.mxu3 %v3636_v45 }
 0xc86   :  { %v3638_v59 = vand.u32 4294901760, %v3637_v47  ;;  %v3642_v62 = vand.u32 4294901760, %v3581_v56 }
 0xc88   :  { %3639 = vmatmul.f32.vlgmr.msrb.gmra.mxu0 %v3638_v59  ;;  %3752 = vmatmul.f32.gmra.mxu1 %v3642_v62  ;;  %v3643_v9 = vsub.f32 %v3581_v56, %v3642_v62 }
 0xc8a   :  { %3811 = vmatmul.f32.gmra.mxu2 %v3643_v9  ;;  %v3644_v12 = vand.u32 4294901760, %v3643_v9 }
 0xc8c   :  { %3856 = vmatmul.f32.gmra.mxu3 %v3644_v12  ;;  %v3645_v49 = vsub.f32 %v3643_v9, %v3644_v12 }
 0xc8e   :  { %v3646_v14 = vand.u32 4294901760, %v3645_v49 }
 0xc90   :  { %3647 = vmatmul.f32.gmra.mxu0 %v3646_v14  ;;  %3966 = vmatmul.f32.vlgmr.msra.gmra.mxu1 %v3634_v34 }
 0xc98   :  { %3925 = vmatmul.f32.vlgmr.msra.gmra.mxu0 %v3634_v34  ;;  %3970 = vmatmul.f32.gmra.mxu1 %v3642_v62 }
 0xca0   :  { %3929 = vmatmul.f32.gmra.mxu0 %v3642_v62 }
 0xcfd   :  { %v3749_v15 = vpop.f32.mrf.mxu1 }
 0xd05   :  { %v3640_v17 = vpop.f32.mrf.mxu0  ;;  %v3753_v20 = vpop.f32.mrf.mxu1 }
 0xd06   :  { %v3641_v19 = vadd.f32 %v4039_v16, %v3640_v17  ;;  %v3807_v18 = vpop.f32.mrf.mxu2 }
 0xd07   :  { %v3851_v24 = vpop.f32.mrf.mxu3 }
 0xd08   :  { %v3750_v21 = vadd.f32 %v3749_v15, %v3641_v19 }
 0xd0a   :  { %v3808_v35 = vadd.f32 %v3807_v18, %v3750_v21 }
 0xd0c   :  { %v3852_v26 = vadd.f32 %v3851_v24, %v3808_v35 }
 0xd0d   :  { %v3648_v6 = vpop.f32.mrf.mxu0  ;;  %v3967_v33 = vpop.f32.mrf.mxu1 }
 0xd0e   :  { %v3649_v23 = vadd.f32 %v4039_v16, %v3648_v6  ;;  %v3812_v38 = vpop.f32.mrf.mxu2 }
 0xd0f   :  { %v3857_v51 = vpop.f32.mrf.mxu3 }
 0xd10   :  { %v3754_v29 = vadd.f32 %v3753_v20, %v3649_v23 }
 0xd12   :  { %v3813_v39 = vadd.f32 %v3812_v38, %v3754_v29 }
 0xd14   :  { %v3858_v54 = vadd.f32 %v3857_v51, %v3813_v39 }
 0xd15   :  { %v3926_v10 = vpop.f32.mrf.mxu0  ;;  %v3971_v8 = vpop.f32.mrf.mxu1 }
 0xd16   :  { %v3927_v22 = vadd.f32 %v3926_v10, %v3852_v26 }
 0xd18   :  { %v3968_v42 = vadd.f32 %v3967_v33, %v3927_v22 }
 0xd1a   :  { %v3974_v44 = vadd.f32 %v4084_v43, %v3968_v42 }
 0xd1c   :  { %3976 = vst.msk [vmem:[#allocation8] sm:$0xff] %vm53_vm0, %v3974_v44 }
 0xd1d   :  { %v3930_v55 = vpop.f32.mrf.mxu0 }
 0xd1e   :  { %v3931_v2 = vadd.f32 %v3930_v55, %v3858_v54 }
 0xd20   :  { %v3972_v50 = vadd.f32 %v3971_v8, %v3931_v2 }
 0xd22   :  { %v3975_v53 = vadd.f32 %v4085_v48, %v3972_v50 }
 0xd24   :  { %3977 = vst.msk [vmem:[#allocation8 + $0x8] sm:$0xff] %vm53_vm0, %v3975_v53 }
 0xd25   :  { %4003 = dma.vmem_to_hbm [thread:$0]  %s3996_s29, 256, %s3998_s10, [#allocation9], %s4154_s24, %s4154_s24, %s4150_s28  }
 0xd26   :  { %4134 = dma.done.wait [#allocation7], 256  }
 0xd27   :  { %4135 = vsyncadd [#allocation7], 4294967040 }
 0xd28   :  { %4136 = dma.done.wait [#allocation9], 256  }
 0xd29   :  { %4137 = vsyncadd [#allocation9], 4294967040 }
 0xd2a   :  { %4012 = vsyncpa [#allocation7], 1 }
 0xd2b   :  { %4013 = vsyncpa [#allocation9], 1 }

</bundles_post_ra>
